<compile_context>
chip_gen: v7x
topology: tpu7x:2x2x1
jax: 0.10.0
libtpu: 0.0.40
codegen_flags: <defaults>
</compile_context>

<pallas_src>
import numpy as np
import jax
import jax.numpy as jnp
from jax.experimental import pallas as pl
from jax.experimental.pallas import tpu as pltpu

MOE_TOP_K = 2


def _round_up(a: int, b: int) -> int:
    return (a + b - 1) // b * b


def _default_tm() -> int:
    """Token-tile default: 512 on 128-MiB VMEM chips (v5e/v6e), else 256 (v7x)."""
    try:
        info = pltpu.get_tpu_info()
        vmem = getattr(info, "vmem_capacity_bytes", None)
        if vmem is not None and int(vmem) >= 100 * 1024 * 1024:
            return 512
    except Exception:
        pass
    return 256


def _choose_tm(T: int, tm: int) -> int:
    """Clamp the token tile to the token count and keep >= 2 grid steps."""
    tm = max(8, _round_up(min(tm, _round_up(T, 8)), 8))
    # v7x has 2 TensorCores; a single-step grid leaves one idle.  Splitting a
    # single-step grid into two also lets DMA/compute overlap on 1-TC chips.
    if T >= 16 and -(-T // tm) < 2:
        tm = _round_up(-(-T // 2), 8)
    return tm


def make_router_kernel(is_gate_mlp: bool, has_residual: bool, num_experts: int):
    """Build a Pallas kernel closure for a given Router configuration."""

    def kernel(*refs):
        it = iter(refs)
        x_ref = next(it)                      # (tm, D)
        if is_gate_mlp:
            w1_ref = next(it)                 # (D, H)   pre-transposed
            w2_ref = next(it)                 # (H, E)   pre-transposed
        else:
            wg_ref = next(it)                 # (D, E)   pre-transposed
        if has_residual:
            wp_ref = next(it)                 # (E, E)   pre-transposed
            pre_ref = next(it)                # (tm, E)
        logits_ref = next(it)                 # (tm, E)
        selw_ref = next(it)                   # (tm, MOE_TOP_K)
        seli_ref = next(it)                   # (tm, MOE_TOP_K)

        x = x_ref[...]                        # native compute dtype

        # --- gate_layer (MXU, f32 accumulate) ---
        if is_gate_mlp:
            h = jnp.tanh(jnp.dot(x, w1_ref[...],
                                 preferred_element_type=jnp.float32))
            h = h.astype(x.dtype)
            logits = jnp.dot(h, w2_ref[...],
                             preferred_element_type=jnp.float32)
        else:
            logits = jnp.dot(x, wg_ref[...],
                             preferred_element_type=jnp.float32)

        # --- optional pre_gate(pre_router_residual) ---
        if has_residual:
            logits = logits + jnp.dot(pre_ref[...], wp_ref[...],
                                      preferred_element_type=jnp.float32)

        # True-width (tm, E) store — no padded lanes to mask.
        logits_ref[...] = logits.astype(logits_ref.dtype)

        # --- top-2 directly on logits (softmax is monotone) ---
        E = num_experts
        col = jax.lax.broadcasted_iota(jnp.int32, logits.shape, 1)
        neg_inf = jnp.float32(-jnp.inf)

        m1 = jnp.max(logits, axis=1, keepdims=True)
        i1 = jnp.min(jnp.where(logits == m1, col, E), axis=1, keepdims=True)
        masked = jnp.where(col == i1, neg_inf, logits)
        m2 = jnp.max(masked, axis=1, keepdims=True)
        i2 = jnp.min(jnp.where(masked == m2, col, E), axis=1, keepdims=True)

        # --- pair-wise softmax renorm with "last expert" zeroing ---
        #   w1 = e1/(e1+e2), e1 = exp(m1-m1) = 1, e2 = exp(m2-m1),
        #   with e_k := 0 when the selected expert is the last one.
        e1 = jnp.where(i1 == E - 1, 0.0, 1.0)
        e2 = jnp.where(i2 == E - 1, 0.0, jnp.exp(m2 - m1))
        # Exact divide (approx reciprocal ~1e-3 would break 1e-5 parity).
        # denom == 0 only for degenerate E < 2 (reference also emits NaN).
        inv = 1.0 / (e1 + e2)
        w1s = e1 * inv
        w2s = e2 * inv

        # --- narrow (tm, 2) writes: col 0 -> top-1, col 1 -> top-2 ---
        ocol = jax.lax.broadcasted_iota(jnp.int32, selw_ref.shape, 1)
        selw_ref[...] = jnp.where(ocol == 0, w1s, w2s).astype(selw_ref.dtype)
        seli_ref[...] = jnp.where(ocol == 0, i1, i2).astype(jnp.int32)

    return kernel


def router_forward(x, params, pre_router_residual=None, *, is_gate_mlp,
                   num_experts, tm=None, compute_dtype=jnp.float32,
                   vmem_limit_bytes=48 * 1024 * 1024):
    """Dense Router forward: returns (router_logits, sel_weights, sel_idx).

    compute_dtype=f32 matches the PyTorch module's `.float()` semantics
    exactly; pass jnp.bfloat16 on v5e for bf16 models (f32 accumulation kept).
    """
    T, D = x.shape
    has_residual = pre_router_residual is not None
    E = num_experts
    cd = compute_dtype

    if tm is None:
        tm = _default_tm()
    tm = _choose_tm(T, tm)
    grid = (pl.cdiv(T, tm),)

    # --- wrapper-side layout plumbing: transpose weights once, no padding ---
    xc = x.astype(cd)
    inputs = [xc]
    in_specs = [pl.BlockSpec((tm, D), lambda i: (i, 0))]

    if is_gate_mlp:
        w1t = params["w1"].astype(cd).T          # (D, H)  torch (out,in) -> (in,out)
        w2t = params["w2"].astype(cd).T          # (H, E)
        inputs += [w1t, w2t]
        in_specs += [pl.BlockSpec(w1t.shape, lambda i: (0, 0)),
                     pl.BlockSpec(w2t.shape, lambda i: (0, 0))]
    else:
        wgt = params["wg"].astype(cd).T          # (D, E)
        inputs += [wgt]
        in_specs += [pl.BlockSpec(wgt.shape, lambda i: (0, 0))]

    if has_residual:
        wpt = params["wp"].astype(cd).T          # (E, E)
        prec = pre_router_residual.astype(cd)    # (T, E)
        inputs += [wpt, prec]
        in_specs += [pl.BlockSpec(wpt.shape, lambda i: (0, 0)),
                     pl.BlockSpec((tm, E), lambda i: (i, 0))]

    out_shape = (
        jax.ShapeDtypeStruct((T, E), jnp.float32),           # router_logits
        jax.ShapeDtypeStruct((T, MOE_TOP_K), jnp.float32),    # selected weights
        jax.ShapeDtypeStruct((T, MOE_TOP_K), jnp.int32),      # selected expert ids
    )
    out_specs = [
        pl.BlockSpec((tm, E), lambda i: (i, 0)),
        pl.BlockSpec((tm, MOE_TOP_K), lambda i: (i, 0)),
        pl.BlockSpec((tm, MOE_TOP_K), lambda i: (i, 0)),
    ]

    kernel = make_router_kernel(is_gate_mlp, has_residual, num_experts)
    logits, selw, seli = pl.pallas_call(
        kernel,
        out_shape=out_shape,
        grid_spec=pltpu.PrefetchScalarGridSpec(
            num_scalar_prefetch=0,
            grid=grid,
            in_specs=in_specs,
            out_specs=out_specs,
        ),
        compiler_params=pltpu.CompilerParams(
            dimension_semantics=("parallel",),     # token axis shards across TCs
            vmem_limit_bytes=vmem_limit_bytes,     # <= v7x's 64 MiB physical
        ),
    )(*inputs)
    return logits, selw, seli


def build_expert_info(sel_idx, sel_weights, num_experts):
    """Host-side glue mirroring the PyTorch per-expert dict (dynamic shapes)."""
    # TODO(synk): expert_info is inherently dynamic-shape (per-expert ragged
    # token lists); assembled on host from the kernel's dense outputs.
    sel_idx = np.asarray(sel_idx)
    sel_weights = np.asarray(sel_weights)
    expert_info = {}
    for expert_id in range(num_experts):
        token_ids, weight_ids = np.where(sel_idx == expert_id)
        expert_info[expert_id] = [token_ids, sel_weights[token_ids, weight_ids]]
    return expert_info


def _reference(x, params, pre, *, is_gate_mlp, num_experts):
    x = x.astype(jnp.float32)
    if is_gate_mlp:
        logits = jnp.tanh(x @ params["w1"].T) @ params["w2"].T
    else:
        logits = x @ params["wg"].T
    if pre is not None:
        logits = logits + pre.astype(jnp.float32) @ params["wp"].T
    probs = jax.nn.softmax(logits, axis=1)
    vals, idx = jax.lax.top_k(probs, MOE_TOP_K)
    vals = jnp.where(idx == num_experts - 1, 0.0, vals)
    vals = vals / jnp.sum(vals, axis=-1, keepdims=True)
    return logits, vals, idx


if __name__ == "__main__":
    key = jax.random.PRNGKey(0)
    model_dim = 32
    num_experts = 8
    T = 512  # tokens: at least two grid steps on every chip

    k = jax.random.split(key, 6)
    x = jax.random.normal(k[0], (T, model_dim), dtype=jnp.float32)
    pre_residual = jax.random.normal(k[1], (T, num_experts), dtype=jnp.float32)

    # Deterministic synthetic weights (PyTorch Linear convention: (out, in)).
    params_mlp = {
        "w1": 0.1 * jax.random.normal(k[2], (num_experts * 8, model_dim), jnp.float32),
        "w2": 0.1 * jax.random.normal(k[3], (num_experts, num_experts * 8), jnp.float32),
        "wp": 0.1 * jax.random.normal(k[4], (num_experts, num_experts), jnp.float32),
    }
    params_lin = {
        "wg": 0.1 * jax.random.normal(k[5], (num_experts, model_dim), jnp.float32),
        "wp": params_mlp["wp"],
    }

    # Case 1: is_gate_mlp=True, with pre_router_residual.
    logits, selw, seli = router_forward(
        x, params_mlp, pre_residual, is_gate_mlp=True, num_experts=num_experts)
    jax.block_until_ready((logits, selw, seli))
    rl, rw, ri = _reference(x, params_mlp, pre_residual,
                            is_gate_mlp=True, num_experts=num_experts)
    np.testing.assert_allclose(np.asarray(logits), np.asarray(rl), rtol=1e-5, atol=1e-5)
    np.testing.assert_allclose(np.asarray(selw), np.asarray(rw), rtol=1e-5, atol=1e-5)
    np.testing.assert_array_equal(np.asarray(seli), np.asarray(ri))
    expert_info = build_expert_info(seli, selw, num_experts)
    assert len(expert_info) == num_experts

    # Case 2: is_gate_mlp=False, no residual.
    logits2, selw2, seli2 = router_forward(
        x, params_lin, None, is_gate_mlp=False, num_experts=num_experts)
    jax.block_until_ready((logits2, selw2, seli2))
    rl2, rw2, ri2 = _reference(x, params_lin, None,
                               is_gate_mlp=False, num_experts=num_experts)
    np.testing.assert_allclose(np.asarray(logits2), np.asarray(rl2), rtol=1e-5, atol=1e-5)
    np.testing.assert_allclose(np.asarray(selw2), np.asarray(rw2), rtol=1e-5, atol=1e-5)
    np.testing.assert_array_equal(np.asarray(seli2), np.asarray(ri2))

    print("KERNEL_OK")
</pallas_src>

<mosaic_0001>
module attributes {stable_mosaic.version = 11 : i64} {
  func.func @kernel(%arg0: i32, %arg1: memref<256x32xf32, #tpu.memory_space<vmem>>, %arg2: memref<32x64xf32, #tpu.memory_space<vmem>>, %arg3: memref<64x8xf32, #tpu.memory_space<vmem>>, %arg4: memref<8x8xf32, #tpu.memory_space<vmem>>, %arg5: memref<256x8xf32, #tpu.memory_space<vmem>>, %arg6: memref<256x8xf32, #tpu.memory_space<vmem>>, %arg7: memref<256x2xf32, #tpu.memory_space<vmem>>, %arg8: memref<256x2xi32, #tpu.memory_space<vmem>>) attributes {dimension_semantics = [#tpu.dimension_semantics<parallel>], iteration_bounds = array<i64: 2>, scalar_prefetch = 0 : i64, scratch_operands = 0 : i64, tpu.core_type = #tpu.core_type<tc>, window_params = [{transform_indices = @transform_0, window_bounds = array<i64: 256, 32>}, {pipeline_mode = #tpu.pipeline_mode<synchronous>, transform_indices = @transform_1, window_bounds = array<i64: 32, 64>}, {pipeline_mode = #tpu.pipeline_mode<synchronous>, transform_indices = @transform_2, window_bounds = array<i64: 64, 8>}, {pipeline_mode = #tpu.pipeline_mode<synchronous>, transform_indices = @transform_3, window_bounds = array<i64: 8, 8>}, {transform_indices = @transform_4, window_bounds = array<i64: 256, 8>}, {transform_indices = @transform_5, window_bounds = array<i64: 256, 8>}, {transform_indices = @transform_6, window_bounds = array<i64: 256, 2>}, {transform_indices = @transform_7, window_bounds = array<i64: 256, 2>}]} {
    %c0 = arith.constant 0 : index
    %c0_0 = arith.constant 0 : index
    %0 = vector.load %arg1[%c0, %c0_0] : memref<256x32xf32, #tpu.memory_space<vmem>>, vector<256x32xf32>
    %c0_1 = arith.constant 0 : index
    %c0_2 = arith.constant 0 : index
    %1 = vector.load %arg2[%c0_1, %c0_2] : memref<32x64xf32, #tpu.memory_space<vmem>>, vector<32x64xf32>
    %cst = arith.constant dense<0.000000e+00> : vector<256x64xf32>
    %2 = tpu.matmul %0, %1, %cst {dimension_numbers = #tpu.dot_dimension_numbers<[1], [0], [0], [1], [0, 0, 1, 1], [], []>} : vector<256x32xf32>, vector<32x64xf32>, vector<256x64xf32> -> vector<256x64xf32>
    %3 = math.tanh %2 : vector<256x64xf32>
    %c0_3 = arith.constant 0 : index
    %c0_4 = arith.constant 0 : index
    %4 = vector.load %arg3[%c0_3, %c0_4] : memref<64x8xf32, #tpu.memory_space<vmem>>, vector<64x8xf32>
    %cst_5 = arith.constant dense<0.000000e+00> : vector<256x8xf32>
    %5 = tpu.matmul %3, %4, %cst_5 {dimension_numbers = #tpu.dot_dimension_numbers<[1], [0], [0], [1], [0, 0, 1, 1], [], []>} : vector<256x64xf32>, vector<64x8xf32>, vector<256x8xf32> -> vector<256x8xf32>
    %c0_6 = arith.constant 0 : index
    %c0_7 = arith.constant 0 : index
    %6 = vector.load %arg5[%c0_6, %c0_7] : memref<256x8xf32, #tpu.memory_space<vmem>>, vector<256x8xf32>
    %c0_8 = arith.constant 0 : index
    %c0_9 = arith.constant 0 : index
    %7 = vector.load %arg4[%c0_8, %c0_9] : memref<8x8xf32, #tpu.memory_space<vmem>>, vector<8x8xf32>
    %cst_10 = arith.constant dense<0.000000e+00> : vector<256x8xf32>
    %8 = tpu.matmul %6, %7, %cst_10 {dimension_numbers = #tpu.dot_dimension_numbers<[1], [0], [0], [1], [0, 0, 1, 1], [], []>} : vector<256x8xf32>, vector<8x8xf32>, vector<256x8xf32> -> vector<256x8xf32>
    %9 = arith.addf %5, %8 : vector<256x8xf32>
    %c0_11 = arith.constant 0 : index
    %c0_12 = arith.constant 0 : index
    %10 = vector.load %arg6[%c0_11, %c0_12] : memref<256x8xf32, #tpu.memory_space<vmem>>, vector<256x8xf32>
    tpu.vector_store %arg6[%c0_11, %c0_12], %9 {strides = array<i32>} : memref<256x8xf32, #tpu.memory_space<vmem>>, vector<256x8xf32>,
    %11 = tpu.iota {dimensions = array<i32: 1>} : vector<256x8xi32>
    %cst_13 = arith.constant dense<0xFF800000> : vector<256xf32>
    %12 = vector.multi_reduction <maximumf>, %9, %cst_13 [1] : vector<256x8xf32> to vector<256xf32>
    %13 = vector.shape_cast %12 : vector<256xf32> to vector<256x1xf32>
    %14 = vector.broadcast %13 : vector<256x1xf32> to vector<256x8xf32>
    %15 = arith.cmpf oeq, %9, %14 : vector<256x8xf32>
    %c8_i32 = arith.constant 8 : i32
    %16 = vector.broadcast %c8_i32 : i32 to vector<256x8xi32>
    %17 = arith.select %15, %11, %16 : vector<256x8xi1>, vector<256x8xi32>
    %cst_14 = arith.constant dense<2147483647> : vector<256xi32>
    %18 = vector.multi_reduction <minsi>, %17, %cst_14 [1] : vector<256x8xi32> to vector<256xi32>
    %19 = vector.shape_cast %18 : vector<256xi32> to vector<256x1xi32>
    %20 = vector.broadcast %19 : vector<256x1xi32> to vector<256x8xi32>
    %21 = arith.cmpi eq, %11, %20 : vector<256x8xi32>
    %cst_15 = arith.constant 0xFF800000 : f32
    %22 = vector.broadcast %cst_15 : f32 to vector<256x8xf32>
    %23 = arith.select %21, %22, %9 : vector<256x8xi1>, vector<256x8xf32>
    %cst_16 = arith.constant dense<0xFF800000> : vector<256xf32>
    %24 = vector.multi_reduction <maximumf>, %23, %cst_16 [1] : vector<256x8xf32> to vector<256xf32>
    %25 = vector.shape_cast %24 : vector<256xf32> to vector<256x1xf32>
    %26 = vector.broadcast %25 : vector<256x1xf32> to vector<256x8xf32>
    %27 = arith.cmpf oeq, %23, %26 : vector<256x8xf32>
    %c8_i32_17 = arith.constant 8 : i32
    %28 = vector.broadcast %c8_i32_17 : i32 to vector<256x8xi32>
    %29 = arith.select %27, %11, %28 : vector<256x8xi1>, vector<256x8xi32>
    %cst_18 = arith.constant dense<2147483647> : vector<256xi32>
    %30 = vector.multi_reduction <minsi>, %29, %cst_18 [1] : vector<256x8xi32> to vector<256xi32>
    %31 = vector.shape_cast %30 : vector<256xi32> to vector<256x1xi32>
    %c7_i32 = arith.constant 7 : i32
    %32 = vector.broadcast %c7_i32 : i32 to vector<256x1xi32>
    %33 = arith.cmpi eq, %19, %32 : vector<256x1xi32>
    %cst_19 = arith.constant 0.000000e+00 : f32
    %cst_20 = arith.constant 1.000000e+00 : f32
    %34 = vector.broadcast %cst_19 : f32 to vector<256x1xf32>
    %35 = vector.broadcast %cst_20 : f32 to vector<256x1xf32>
    %36 = arith.select %33, %34, %35 : vector<256x1xi1>, vector<256x1xf32>
    %c7_i32_21 = arith.constant 7 : i32
    %37 = vector.broadcast %c7_i32_21 : i32 to vector<256x1xi32>
    %38 = arith.cmpi eq, %31, %37 : vector<256x1xi32>
    %39 = arith.subf %25, %13 : vector<256x1xf32>
    %40 = math.exp %39 : vector<256x1xf32>
    %cst_22 = arith.constant 0.000000e+00 : f32
    %41 = vector.broadcast %cst_22 : f32 to vector<256x1xf32>
    %42 = arith.select %38, %41, %40 : vector<256x1xi1>, vector<256x1xf32>
    %43 = arith.addf %36, %42 : vector<256x1xf32>
    %cst_23 = arith.constant 1.000000e+00 : f32
    %44 = vector.broadcast %cst_23 : f32 to vector<256x1xf32>
    %45 = arith.divf %44, %43 : vector<256x1xf32>
    %46 = arith.mulf %36, %45 : vector<256x1xf32>
    %47 = arith.mulf %42, %45 : vector<256x1xf32>
    %48 = tpu.iota {dimensions = array<i32: 1>} : vector<256x2xi32>
    %c0_i32 = arith.constant 0 : i32
    %49 = vector.broadcast %c0_i32 : i32 to vector<256x2xi32>
    %50 = arith.cmpi eq, %48, %49 : vector<256x2xi32>
    %51 = vector.shape_cast %46 : vector<256x1xf32> to vector<256x1xf32>
    %52 = vector.broadcast %51 : vector<256x1xf32> to vector<256x2xf32>
    %53 = vector.shape_cast %47 : vector<256x1xf32> to vector<256x1xf32>
    %54 = vector.broadcast %53 : vector<256x1xf32> to vector<256x2xf32>
    %55 = arith.select %50, %52, %54 : vector<256x2xi1>, vector<256x2xf32>
    %c0_24 = arith.constant 0 : index
    %c0_25 = arith.constant 0 : index
    %56 = vector.load %arg7[%c0_24, %c0_25] : memref<256x2xf32, #tpu.memory_space<vmem>>, vector<256x2xf32>
    tpu.vector_store %arg7[%c0_24, %c0_25], %55 {strides = array<i32>} : memref<256x2xf32, #tpu.memory_space<vmem>>, vector<256x2xf32>,
    %c0_i32_26 = arith.constant 0 : i32
    %57 = vector.broadcast %c0_i32_26 : i32 to vector<256x2xi32>
    %58 = arith.cmpi eq, %48, %57 : vector<256x2xi32>
    %59 = vector.shape_cast %19 : vector<256x1xi32> to vector<256x1xi32>
    %60 = vector.broadcast %59 : vector<256x1xi32> to vector<256x2xi32>
    %61 = vector.shape_cast %31 : vector<256x1xi32> to vector<256x1xi32>
    %62 = vector.broadcast %61 : vector<256x1xi32> to vector<256x2xi32>
    %63 = arith.select %58, %60, %62 : vector<256x2xi1>, vector<256x2xi32>
    %c0_27 = arith.constant 0 : index
    %c0_28 = arith.constant 0 : index
    %64 = vector.load %arg8[%c0_27, %c0_28] : memref<256x2xi32, #tpu.memory_space<vmem>>, vector<256x2xi32>
    tpu.vector_store %arg8[%c0_27, %c0_28], %63 {strides = array<i32>} : memref<256x2xi32, #tpu.memory_space<vmem>>, vector<256x2xi32>,
    return
  }
  func.func @transform_0(%arg0: i32) -> (i32, i32) {
    %c0_i32 = arith.constant 0 : i32
    %c0_i32_0 = arith.constant 0 : i32
    return %arg0, %c0_i32 : i32, i32
  }
  func.func @transform_1(%arg0: i32) -> (i32, i32) {
    %c0_i32 = arith.constant 0 : i32
    %c0_i32_0 = arith.constant 0 : i32
    %c0_i32_1 = arith.constant 0 : i32
    return %c0_i32, %c0_i32_0 : i32, i32
  }
  func.func @transform_2(%arg0: i32) -> (i32, i32) {
    %c0_i32 = arith.constant 0 : i32
    %c0_i32_0 = arith.constant 0 : i32
    %c0_i32_1 = arith.constant 0 : i32
    return %c0_i32, %c0_i32_0 : i32, i32
  }
  func.func @transform_3(%arg0: i32) -> (i32, i32) {
    %c0_i32 = arith.constant 0 : i32
    %c0_i32_0 = arith.constant 0 : i32
    %c0_i32_1 = arith.constant 0 : i32
    return %c0_i32, %c0_i32_0 : i32, i32
  }
  func.func @transform_4(%arg0: i32) -> (i32, i32) {
    %c0_i32 = arith.constant 0 : i32
    %c0_i32_0 = arith.constant 0 : i32
    return %arg0, %c0_i32 : i32, i32
  }
  func.func @transform_5(%arg0: i32) -> (i32, i32) {
    %c0_i32 = arith.constant 0 : i32
    %c0_i32_0 = arith.constant 0 : i32
    return %arg0, %c0_i32 : i32, i32
  }
  func.func @transform_6(%arg0: i32) -> (i32, i32) {
    %c0_i32 = arith.constant 0 : i32
    %c0_i32_0 = arith.constant 0 : i32
    return %arg0, %c0_i32 : i32, i32
  }
  func.func @transform_7(%arg0: i32) -> (i32, i32) {
    %c0_i32 = arith.constant 0 : i32
    %c0_i32_0 = arith.constant 0 : i32
    return %arg0, %c0_i32 : i32, i32
  }
}

</mosaic_0001>

<bundles_post_ra>
// kernel: tpu_custom_call.1
= control target key start
LH: loop header
LB: loop body
LE: loop exit
PB: predicated region body
PF: predicated region fallthrough
CT: control target
= control target key end

     0   :  { %s4134_s24 = smov 0   ;;  %s6912_s0 = inlined_call_operand.vmem [shape: f32[512,32], index: 0, kind: input, shape index: {}]   ;;  %s6913_s1 = inlined_call_operand.vmem [shape: f32[32,64], index: 1, kind: input, shape index: {}]   ;;  %s6914_s2 = inlined_call_operand.vmem [shape: f32[64,8], index: 2, kind: input, shape index: {}]   ;;  %s6915_s3 = inlined_call_operand.vmem [shape: f32[8,8], index: 3, kind: input, shape index: {}]   ;;  %s6916_s4 = inlined_call_operand.vmem [shape: f32[512,8], index: 4, kind: input, shape index: {}]   ;;  %s6917_s5 = inlined_call_operand.vmem [shape: f32[512,8], index: 5, kind: output, shape index: {0}]   ;;  %s6918_s6 = inlined_call_operand.vmem [shape: f32[512,2], index: 6, kind: output, shape index: {1}]   ;;  %s6919_s7 = inlined_call_operand.vmem [shape: s32[512,2], index: 7, kind: output, shape index: {2}]  }
   0x1 LB: > { %s3434_s25 = sadd.s32 4294967295, %s4091_s24   ;;  %p3438_p0 = scmp.ge.s32.totalorder %s4091_s24, 1  ;;  %s4091_s24 = sphi %s4134_s24, %s18_s24  }
   0x2   : > { %p254_p1 = scmp.lt.s32.totalorder %s4091_s24, 3 }
   0x4   : > { %p255_p2 = pnand %p3438_p0, %p254_p1 }
   0x6   : > { %258 = sbr.rel (%p255_p2) target bundleno = 1447 (0x5a7), region = 40 }
   0xd   : > { %v363_v0 = vld [vmem:[%s6913_s1] sm:$0xff]  ;;  %v364_v1 = vld [vmem:[%s6913_s1 + $0x8] sm:$0xff]  ;;  %v365_v2 = vld [vmem:[%s6913_s1 + $0x10] sm:$0xff]  ;;  %s3439_s9 = sshll.u32 %s3434_s25, 5  ;;  %vm367_vm0 = vcmask 261120   ;;  %vm762_vm1 = vcmask 64512  }
   0xe   : > { %v3826_v3 = vpack.c.bf16 %v364_v1, %v363_v0  ;;  %v366_v4 = vld [vmem:[%s6913_s1 + $0x18] sm:$0xff]  ;;  %p302_p3 = scmp.lt.s32.totalorder %s3439_s9, 63  ;;  %v761_v5 = vld [vmem:[%s6915_s3] sm:$0xff]  ;;  %v722_v8 = vld [vmem:[%s6914_s2 + $0x8] sm:$0xff]  ;;  %vm1084_vm2 = vcmask 523264  }
   0xf   : > { %v721_v6 = vld [vmem:[%s6914_s2] sm:$0xff]  ;;  %v3830_v7 = vpack.c.bf16 %v366_v4, %v365_v2  ;;  %3850 = vmatprep.subr.mxu1 %v761_v5  ;;  %v723_v15 = vld [vmem:[%s6914_s2 + $0x10] sm:$0xff]  ;;  %v724_v16 = vld [vmem:[%s6914_s2 + $0x18] sm:$0xff] }
  0x10   : > { %3827 = vmatprep.subr.bf16.mxu0 %v3826_v3  ;;  %s7565_s9 = smov (!%p302_p3, %s3439_s9), 63  ;;  %3851 = vmatpush3.msra.mxu1 %v761_v5  ;;  %v3834_v9 = vpack.c.bf16 %v722_v8, %v721_v6  ;;  %v3838_v20 = vpack.c.bf16 %v724_v16, %v723_v15  ;;  %v725_v23 = vld [vmem:[%s6914_s2 + $0x20] sm:$0xff]  ;;  %v726_v24 = vld [vmem:[%s6914_s2 + $0x28] sm:$0xff]  ;;  %v727_v63 = vld [vmem:[%s6914_s2 + $0x30] sm:$0xff] }
  0x11   : > { %3829 = vmatpush3.bf16.msra.mxu0 %v3826_v3  ;;  %s4163_s18 = sshll.u32 %s7565_s9, 3  ;;  %v3842_v29 = vpack.c.bf16 %v726_v24, %v725_v23  ;;  %v728_v0 = vld [vmem:[%s6914_s2 + $0x38] sm:$0xff] }
  0x12   : > { %3831 = vmatprep.subr.bf16.mxu0 %v3830_v7  ;;  %3835 = vmatprep.subr.bf16.mxu1 %v3834_v9  ;;  %s4169_s21 = scalar_lea.vmem %s6912_s0, %s4163_s18  ;;  %s4183_s25 = scalar_lea.vmem %s6916_s4, %s4163_s18  ;;  %v3846_v2 = vpack.c.bf16 %v728_v0, %v727_v63 }
  0x13   : > { %v331_v10 = vld [vmem:[%s4169_s21] sm:$0xff]  ;;  %v332_v11 = vld [vmem:[%s4169_s21 + $0x8] sm:$0xff]  ;;  %v333_v12 = vld [vmem:[%s4169_s21 + $0x10] sm:$0xff]  ;;  %s4361_s17 = scalar_lea.vmem %s6917_s5, %s4163_s18 }
  0x14   : > { %3664 = vmatprep.mubr.msk.f32.mxu0 %vm367_vm0, %v331_v10  ;;  %v334_v13 = vld [vmem:[%s4169_s21 + $0x18] sm:$0xff]  ;;  %v335_v14 = vld [vmem:[%s4169_s21 + $0x20] sm:$0xff]  ;;  %v336_v17 = vld [vmem:[%s4169_s21 + $0x28] sm:$0xff] }
  0x15   : > { %3833 = vmatpush3.bf16.msra.mxu0 %v3830_v7  ;;  %v337_v18 = vld [vmem:[%s4169_s21 + $0x30] sm:$0xff]  ;;  %v744_v21 = vld [vmem:[%s4183_s25 + $0x78] sm:$0xff]  ;;  %v745_v22 = vld [vmem:[%s4183_s25 + $0x80] sm:$0xff] }
  0x16   : > { %3712 = vmatprep.subr.mxu0 %v761_v5  ;;  %v743_v19 = vld [vmem:[%s4183_s25 + $0x70] sm:$0xff]  ;;  %v338_v25 = vld [vmem:[%s4169_s21 + $0x38] sm:$0xff]  ;;  %v746_v26 = vld [vmem:[%s4183_s25 + $0x88] sm:$0xff] }
  0x17   : > { %3735 = vmatprep.mubr.msk.f32.mxu1 %vm762_vm1, %v743_v19  ;;  %v339_v27 = vld [vmem:[%s4169_s21 + $0x40] sm:$0xff]  ;;  %v747_v28 = vld [vmem:[%s4183_s25 + $0x90] sm:$0xff]  ;;  %v340_v30 = vld [vmem:[%s4169_s21 + $0x48] sm:$0xff] }
  0x18   : > { %3665 = vmatmul.mubr.msk.f32.vlgmr.msra.gmra.mrb[0].mxu0 %vm367_vm0, %v332_v11  ;;  %3736 = vmatmul.mubr.msk.f32.vlgmr.msra.gmra.mrb[0].mxu1 %vm762_vm1, %v744_v21  ;;  %v748_v31 = vld [vmem:[%s4183_s25 + $0x98] sm:$0xff]  ;;  %v341_v32 = vld [vmem:[%s4169_s21 + $0x50] sm:$0xff]  ;;  %v749_v33 = vld [vmem:[%s4183_s25 + $0xa0] sm:$0xff] }
  0x19   : > { %3667 = vmatprep.mubr.msk.f32.mxu0 %vm367_vm0, %v333_v12  ;;  %3713 = vmatpush3.msra.mxu0 %v761_v5  ;;  %v342_v34 = vld [vmem:[%s4169_s21 + $0x58] sm:$0xff]  ;;  %v750_v35 = vld [vmem:[%s4183_s25 + $0xa8] sm:$0xff]  ;;  %v343_v36 = vld [vmem:[%s4169_s21 + $0x60] sm:$0xff] }
  0x1a   : > { %3837 = vmatpush3.bf16.msra.mxu1 %v3834_v9  ;;  %3738 = vmatprep.mubr.msk.f32.mxu1 %vm762_vm1, %v745_v22  ;;  %v751_v37 = vld [vmem:[%s4183_s25 + $0xb0] sm:$0xff]  ;;  %v344_v38 = vld [vmem:[%s4169_s21 + $0x68] sm:$0xff]  ;;  %v752_v39 = vld [vmem:[%s4183_s25 + $0xb8] sm:$0xff] }
  0x1b   : > { %3839 = vmatprep.subr.bf16.mxu1 %v3838_v20  ;;  %v345_v40 = vld [vmem:[%s4169_s21 + $0x70] sm:$0xff]  ;;  %v753_v41 = vld [vmem:[%s4183_s25 + $0xc0] sm:$0xff]  ;;  %v346_v42 = vld [vmem:[%s4169_s21 + $0x78] sm:$0xff] }
  0x1c   : > { %3668 = vmatmul.mubr.msk.f32.gmra.mrb[2].mxu0 %vm367_vm0, %v334_v13  ;;  %3739 = vmatmul.mubr.msk.f32.gmra.mrb[2].mxu1 %vm762_vm1, %v746_v26  ;;  %v754_v43 = vld [vmem:[%s4183_s25 + $0xc8] sm:$0xff]  ;;  %v347_v44 = vld [vmem:[%s4169_s21 + $0x80] sm:$0xff]  ;;  %v349_v46 = vld [vmem:[%s4169_s21 + $0x90] sm:$0xff] }
  0x1d   : > { %3670 = vmatprep.mubr.msk.f32.mxu0 %vm367_vm0, %v335_v14  ;;  %3741 = vmatprep.mubr.msk.f32.mxu1 %vm762_vm1, %v747_v28  ;;  %v348_v45 = vld [vmem:[%s4169_s21 + $0x88] sm:$0xff]  ;;  %v350_v47 = vld [vmem:[%s4169_s21 + $0x98] sm:$0xff]  ;;  %v351_v48 = vld [vmem:[%s4169_s21 + $0xa0] sm:$0xff] }
  0x1e   : > { %3841 = vmatpush3.bf16.msra.mxu1 %v3838_v20  ;;  %v352_v49 = vld [vmem:[%s4169_s21 + $0xa8] sm:$0xff]  ;;  %v353_v50 = vld [vmem:[%s4169_s21 + $0xb0] sm:$0xff]  ;;  %v354_v51 = vld [vmem:[%s4169_s21 + $0xb8] sm:$0xff] }
  0x1f   : > { %3843 = vmatprep.subr.bf16.mxu1 %v3842_v29  ;;  %v355_v52 = vld [vmem:[%s4169_s21 + $0xc0] sm:$0xff]  ;;  %v356_v53 = vld [vmem:[%s4169_s21 + $0xc8] sm:$0xff]  ;;  %v357_v54 = vld [vmem:[%s4169_s21 + $0xd0] sm:$0xff] }
  0x20   : > { %3671 = vmatmul.mubr.msk.f32.gmra.mrb[4].mxu0 %vm367_vm0, %v336_v17  ;;  %3742 = vmatmul.mubr.msk.f32.gmra.mrb[4].mxu1 %vm762_vm1, %v748_v31  ;;  %v358_v55 = vld [vmem:[%s4169_s21 + $0xd8] sm:$0xff]  ;;  %v359_v56 = vld [vmem:[%s4169_s21 + $0xe0] sm:$0xff]  ;;  %v360_v57 = vld [vmem:[%s4169_s21 + $0xe8] sm:$0xff] }
  0x21   : > { %3673 = vmatprep.mubr.msk.f32.mxu0 %vm367_vm0, %v337_v18  ;;  %3744 = vmatprep.mubr.msk.f32.mxu1 %vm762_vm1, %v749_v33  ;;  %v361_v58 = vld [vmem:[%s4169_s21 + $0xf0] sm:$0xff]  ;;  %v362_v59 = vld [vmem:[%s4169_s21 + $0xf8] sm:$0xff]  ;;  %v757_v62 = vld [vmem:[%s4183_s25 + $0xe0] sm:$0xff]  ;;  %s6305_s21 = scalar_lea.vmem %s6919_s7, %s4163_s18 }
  0x22   : > { %3845 = vmatpush3.bf16.msra.mxu1 %v3842_v29  ;;  %v755_v60 = vld [vmem:[%s4183_s25 + $0xd0] sm:$0xff]  ;;  %v756_v61 = vld [vmem:[%s4183_s25 + $0xd8] sm:$0xff]  ;;  %v758_v1 = vld [vmem:[%s4183_s25 + $0xe8] sm:$0xff] }
  0x23   : > { %3847 = vmatprep.subr.bf16.mxu1 %v3846_v2  ;;  %v759_v3 = vld [vmem:[%s4183_s25 + $0xf0] sm:$0xff]  ;;  %v760_v4 = vld [vmem:[%s4183_s25 + $0xf8] sm:$0xff]  ;;  %v729_v5 = vld [vmem:[%s4183_s25] sm:$0xff] }
  0x24   : > { %3674 = vmatmul.mubr.msk.f32.gmra.mrb[6].mxu0 %vm367_vm0, %v338_v25  ;;  %3745 = vmatmul.mubr.msk.f32.gmra.mrb[6].mxu1 %vm762_vm1, %v750_v35  ;;  %v730_v6 = vld [vmem:[%s4183_s25 + $0x8] sm:$0xff]  ;;  %v731_v7 = vld [vmem:[%s4183_s25 + $0x10] sm:$0xff]  ;;  %v732_v8 = vld [vmem:[%s4183_s25 + $0x18] sm:$0xff] }
  0x25   : > { %3676 = vmatprep.mubr.msk.f32.mxu0 %vm367_vm0, %v339_v27  ;;  %3747 = vmatprep.mubr.msk.f32.mxu1 %vm762_vm1, %v751_v37  ;;  %v733_v9 = vld [vmem:[%s4183_s25 + $0x20] sm:$0xff]  ;;  %v734_v10 = vld [vmem:[%s4183_s25 + $0x28] sm:$0xff]  ;;  %v735_v11 = vld [vmem:[%s4183_s25 + $0x30] sm:$0xff] }
  0x26   : > { %3849 = vmatpush3.bf16.msra.mxu1 %v3846_v2  ;;  %v736_v12 = vld [vmem:[%s4183_s25 + $0x38] sm:$0xff]  ;;  %v737_v13 = vld [vmem:[%s4183_s25 + $0x40] sm:$0xff]  ;;  %v738_v14 = vld [vmem:[%s4183_s25 + $0x48] sm:$0xff] }
  0x27   : > { %v739_v15 = vld [vmem:[%s4183_s25 + $0x50] sm:$0xff]  ;;  %v740_v16 = vld [vmem:[%s4183_s25 + $0x58] sm:$0xff]  ;;  %v741_v17 = vld [vmem:[%s4183_s25 + $0x60] sm:$0xff] }
  0x28   : > { %3677 = vmatmul.mubr.msk.f32.gmra.mrb[8].mxu0 %vm367_vm0, %v340_v30  ;;  %3748 = vmatmul.mubr.msk.f32.gmra.mrb[8].mxu1 %vm762_vm1, %v752_v39  ;;  %v742_v18 = vld [vmem:[%s4183_s25 + $0x68] sm:$0xff]  ;;  %s6413_s25 = scalar_lea.vmem %s6918_s6, %s4163_s18 }
  0x29   : > { %3679 = vmatprep.mubr.msk.f32.mxu0 %vm367_vm0, %v341_v32  ;;  %3750 = vmatprep.mubr.msk.f32.mxu1 %vm762_vm1, %v753_v41 }
  0x2c   : > { %3680 = vmatmul.mubr.msk.f32.gmra.mrb[10].mxu0 %vm367_vm0, %v342_v34  ;;  %3751 = vmatmul.mubr.msk.f32.gmra.mrb[10].mxu1 %vm762_vm1, %v754_v43 }
  0x2d   : > { %3682 = vmatprep.mubr.msk.f32.mxu0 %vm367_vm0, %v343_v36  ;;  %3753 = vmatprep.mubr.msk.f32.mxu1 %vm762_vm1, %v755_v60 }
  0x30   : > { %3683 = vmatmul.mubr.msk.f32.gmra.mrb[12].mxu0 %vm367_vm0, %v344_v38  ;;  %3754 = vmatmul.mubr.msk.f32.gmra.mrb[12].mxu1 %vm762_vm1, %v756_v61 }
  0x31   : > { %3685 = vmatprep.mubr.msk.f32.mxu0 %vm367_vm0, %v345_v40  ;;  %3756 = vmatprep.mubr.msk.f32.mxu1 %vm762_vm1, %v757_v62 }
  0x34   : > { %3686 = vmatmul.mubr.msk.f32.gmra.mrb[14].mxu0 %vm367_vm0, %v346_v42  ;;  %3757 = vmatmul.mubr.msk.f32.gmra.mrb[14].mxu1 %vm762_vm1, %v758_v1 }
  0x35   : > { %3688 = vmatprep.mubr.msk.f32.mxu0 %vm367_vm0, %v347_v44  ;;  %3759 = vmatprep.mubr.msk.f32.mxu1 %vm762_vm1, %v759_v3 }
  0x38   : > { %3689 = vmatmul.mubr.msk.f32.gmra.mrb[16].mxu0 %vm367_vm0, %v348_v45  ;;  %3760 = vmatmul.mubr.msk.f32.gmra.mrb[16].mxu1 %vm762_vm1, %v760_v4 }
  0x39   : > { %3691 = vmatprep.mubr.msk.f32.mxu0 %vm367_vm0, %v349_v46 }
  0x3c   : > { %3692 = vmatmul.mubr.msk.f32.gmra.mrb[18].mxu0 %vm367_vm0, %v350_v47 }
  0x3d   : > { %3694 = vmatprep.mubr.msk.f32.mxu0 %vm367_vm0, %v351_v48 }
  0x40   : > { %3695 = vmatmul.mubr.msk.f32.gmra.mrb[20].mxu0 %vm367_vm0, %v352_v49 }
  0x41   : > { %3697 = vmatprep.mubr.msk.f32.mxu0 %vm367_vm0, %v353_v50 }
  0x44   : > { %3698 = vmatmul.mubr.msk.f32.gmra.mrb[22].mxu0 %vm367_vm0, %v354_v51 }
  0x45   : > { %3700 = vmatprep.mubr.msk.f32.mxu0 %vm367_vm0, %v355_v52 }
  0x48   : > { %3701 = vmatmul.mubr.msk.f32.gmra.mrb[24].mxu0 %vm367_vm0, %v356_v53 }
  0x49   : > { %3703 = vmatprep.mubr.msk.f32.mxu0 %vm367_vm0, %v357_v54 }
  0x4c   : > { %3704 = vmatmul.mubr.msk.f32.gmra.mrb[26].mxu0 %vm367_vm0, %v358_v55 }
  0x4d   : > { %3706 = vmatprep.mubr.msk.f32.mxu0 %vm367_vm0, %v359_v56 }
  0x50   : > { %3707 = vmatmul.mubr.msk.f32.gmra.mrb[28].mxu0 %vm367_vm0, %v360_v57 }
  0x51   : > { %3709 = vmatprep.mubr.msk.f32.mxu0 %vm367_vm0, %v361_v58 }
  0x54   : > { %3710 = vmatmul.mubr.msk.f32.gmra.mrb[30].mxu0 %vm367_vm0, %v362_v59 }
  0x55   : > { %3714 = vmatprep.mubr.msk.f32.mxu0 %vm762_vm1, %v729_v5 }
  0x58   : > { %3715 = vmatmul.mubr.msk.f32.vlgmr.msra.gmra.mrb[32].mxu0 %vm762_vm1, %v730_v6 }
  0x59   : > { %3717 = vmatprep.mubr.msk.f32.mxu0 %vm762_vm1, %v731_v7 }
  0x5c   : > { %3718 = vmatmul.mubr.msk.f32.gmra.mrb[34].mxu0 %vm762_vm1, %v732_v8 }
  0x5d   : > { %3720 = vmatprep.mubr.msk.f32.mxu0 %vm762_vm1, %v733_v9 }
  0x60   : > { %3721 = vmatmul.mubr.msk.f32.gmra.mrb[36].mxu0 %vm762_vm1, %v734_v10 }
  0x61   : > { %3723 = vmatprep.mubr.msk.f32.mxu0 %vm762_vm1, %v735_v11 }
  0x64   : > { %3724 = vmatmul.mubr.msk.f32.gmra.mrb[38].mxu0 %vm762_vm1, %v736_v12 }
  0x65   : > { %3726 = vmatprep.mubr.msk.f32.mxu0 %vm762_vm1, %v737_v13 }
  0x68   : > { %3727 = vmatmul.mubr.msk.f32.gmra.mrb[40].mxu0 %vm762_vm1, %v738_v14 }
  0x69   : > { %3729 = vmatprep.mubr.msk.f32.mxu0 %vm762_vm1, %v739_v15 }
  0x6c   : > { %3730 = vmatmul.mubr.msk.f32.gmra.mrb[42].mxu0 %vm762_vm1, %v740_v16 }
  0x6d   : > { %3732 = vmatprep.mubr.msk.f32.mxu0 %vm762_vm1, %v741_v17 }
  0x70   : > { %3733 = vmatmul.mubr.msk.f32.gmra.mrb[44].mxu0 %vm762_vm1, %v742_v18 }
  0xeb   : > { %v3666_v19 = vpop.f32.mrb[0].mxu0 }
  0xec   : > { %v530_v20 = vpop.f32.mrb[1].mxu0 }
  0xed   : > { %3893 = vtanh.f32 %v530_v20 }
  0xee   : > { %3895 = vtanh.f32 %v3666_v19 }
  0xef   : > { %v3669_v21 = vpop.f32.mrb[2].mxu0 }
  0xf0   : > { %v540_v22 = vpop.f32.mrb[3].mxu0 }
  0xf1   : > { %3897 = vtanh.f32 %v540_v22 }
  0xf2   : > { %3899 = vtanh.f32 %v3669_v21 }
  0xf3   : > { %v3672_v23 = vpop.f32.mrb[4].mxu0 }
  0xf4   : > { %3901 = vtanh.f32 %v3672_v23  ;;  %v550_v24 = vpop.f32.mrb[5].mxu0 }
  0xf5   : > { %3903 = vtanh.f32 %v550_v24 }
  0xf7   : > { %v3894_v25 = vpop.eup %3893  ;;  %v3675_v26 = vpop.f32.mrb[6].mxu0 }
  0xf8   : > { %v3896_v27 = vpop.eup %3895  ;;  %3905 = vtanh.f32 %v3675_v26  ;;  %v560_v28 = vpop.f32.mrb[7].mxu0  ;;  %3778 = vmatprep.mubr.msk.f32.mxu1 %vm1084_vm2, %v3894_v25 }
  0xf9   : > { %3907 = vtanh.f32 %v560_v28  ;;  %3779 = vmatmul.mubr.msk.f32.vlgmr.msra.gmra.mrb[18].mxu1 %vm1084_vm2, %v3896_v27 }
  0xfb   : > { %v3898_v29 = vpop.eup %3897  ;;  %v3678_v30 = vpop.f32.mrb[8].mxu0 }
  0xfc   : > { %v3900_v31 = vpop.eup %3899  ;;  %3909 = vtanh.f32 %v3678_v30  ;;  %v570_v32 = vpop.f32.mrb[9].mxu0  ;;  %3781 = vmatprep.mubr.msk.f32.mxu1 %vm1084_vm2, %v3898_v29 }
  0xfd   : > { %3911 = vtanh.f32 %v570_v32  ;;  %3782 = vmatmul.mubr.msk.f32.gmra.mrb[20].mxu1 %vm1084_vm2, %v3900_v31 }
  0xfe   : > { %v3902_v33 = vpop.eup %3901 }
  0xff   : > { %v3904_v34 = vpop.eup %3903  ;;  %v3681_v35 = vpop.f32.mrb[10].mxu0 }
 0x100   : > { %3913 = vtanh.f32 %v3681_v35  ;;  %v580_v36 = vpop.f32.mrb[11].mxu0  ;;  %3784 = vmatprep.mubr.msk.f32.mxu1 %vm1084_vm2, %v3904_v34 }
 0x101   : > { %3915 = vtanh.f32 %v580_v36  ;;  %3785 = vmatmul.mubr.msk.f32.gmra.mrb[22].mxu1 %vm1084_vm2, %v3902_v33 }
 0x102   : > { %v3906_v37 = vpop.eup %3905 }
 0x103   : > { %v3908_v38 = vpop.eup %3907  ;;  %v3684_v39 = vpop.f32.mrb[12].mxu0 }
 0x104   : > { %3917 = vtanh.f32 %v3684_v39  ;;  %v590_v40 = vpop.f32.mrb[13].mxu0  ;;  %3787 = vmatprep.mubr.msk.f32.mxu1 %vm1084_vm2, %v3908_v38 }
 0x105   : > { %3919 = vtanh.f32 %v590_v40  ;;  %3788 = vmatmul.mubr.msk.f32.gmra.mrb[24].mxu1 %vm1084_vm2, %v3906_v37 }
 0x106   : > { %v3910_v41 = vpop.eup %3909 }
 0x107   : > { %v3912_v42 = vpop.eup %3911  ;;  %v3687_v43 = vpop.f32.mrb[14].mxu0 }
 0x108   : > { %3921 = vtanh.f32 %v3687_v43  ;;  %v600_v44 = vpop.f32.mrb[15].mxu0  ;;  %3790 = vmatprep.mubr.msk.f32.mxu1 %vm1084_vm2, %v3912_v42 }
 0x109   : > { %3923 = vtanh.f32 %v600_v44  ;;  %3791 = vmatmul.mubr.msk.f32.gmra.mrb[26].mxu1 %vm1084_vm2, %v3910_v41 }
 0x10a   : > { %v3914_v45 = vpop.eup %3913 }
 0x10b   : > { %v3916_v46 = vpop.eup %3915  ;;  %v3690_v47 = vpop.f32.mrb[16].mxu0 }
 0x10c   : > { %3925 = vtanh.f32 %v3690_v47  ;;  %v610_v48 = vpop.f32.mrb[17].mxu0  ;;  %3793 = vmatprep.mubr.msk.f32.mxu1 %vm1084_vm2, %v3916_v46 }
 0x10d   : > { %3927 = vtanh.f32 %v610_v48  ;;  %3794 = vmatmul.mubr.msk.f32.gmra.mrb[28].mxu1 %vm1084_vm2, %v3914_v45 }
 0x10e   : > { %v3918_v49 = vpop.eup %3917 }
 0x10f   : > { %v3920_v50 = vpop.eup %3919  ;;  %v3693_v51 = vpop.f32.mrb[18].mxu0 }
 0x110   : > { %3929 = vtanh.f32 %v3693_v51  ;;  %v620_v52 = vpop.f32.mrb[19].mxu0  ;;  %3796 = vmatprep.mubr.msk.f32.mxu1 %vm1084_vm2, %v3920_v50 }
 0x111   : > { %3931 = vtanh.f32 %v620_v52  ;;  %3797 = vmatmul.mubr.msk.f32.gmra.mrb[30].mxu1 %vm1084_vm2, %v3918_v49 }
 0x112   : > { %v3922_v53 = vpop.eup %3921 }
 0x113   : > { %v3924_v54 = vpop.eup %3923  ;;  %v3696_v55 = vpop.f32.mrb[20].mxu0 }
 0x114   : > { %3933 = vtanh.f32 %v3696_v55  ;;  %v630_v56 = vpop.f32.mrb[21].mxu0  ;;  %3799 = vmatprep.mubr.msk.f32.mxu1 %vm1084_vm2, %v3924_v54 }
 0x115   : > { %3935 = vtanh.f32 %v630_v56  ;;  %3800 = vmatmul.mubr.msk.f32.gmra.mrb[0].mxu1 %vm1084_vm2, %v3922_v53 }
 0x116   : > { %v3926_v57 = vpop.eup %3925 }
 0x117   : > { %v3928_v58 = vpop.eup %3927  ;;  %v3699_v59 = vpop.f32.mrb[22].mxu0 }
 0x118   : > { %3937 = vtanh.f32 %v3699_v59  ;;  %v640_v60 = vpop.f32.mrb[23].mxu0  ;;  %3802 = vmatprep.mubr.msk.f32.mxu1 %vm1084_vm2, %v3928_v58 }
 0x119   : > { %3939 = vtanh.f32 %v640_v60  ;;  %3803 = vmatmul.mubr.msk.f32.gmra.mrb[2].mxu1 %vm1084_vm2, %v3926_v57 }
 0x11a   : > { %v3930_v61 = vpop.eup %3929 }
 0x11b   : > { %v3932_v62 = vpop.eup %3931  ;;  %v3702_v63 = vpop.f32.mrb[24].mxu0 }
 0x11c   : > { %3941 = vtanh.f32 %v3702_v63  ;;  %v650_v0 = vpop.f32.mrb[25].mxu0  ;;  %3805 = vmatprep.mubr.msk.f32.mxu1 %vm1084_vm2, %v3932_v62 }
 0x11d   : > { %3943 = vtanh.f32 %v650_v0  ;;  %3806 = vmatmul.mubr.msk.f32.gmra.mrb[4].mxu1 %vm1084_vm2, %v3930_v61 }
 0x11e   : > { %v3934_v1 = vpop.eup %3933 }
 0x11f   : > { %v3936_v2 = vpop.eup %3935  ;;  %v3705_v3 = vpop.f32.mrb[26].mxu0 }
 0x120   : > { %3945 = vtanh.f32 %v3705_v3  ;;  %v660_v4 = vpop.f32.mrb[27].mxu0  ;;  %3808 = vmatprep.mubr.msk.f32.mxu1 %vm1084_vm2, %v3936_v2 }
 0x121   : > { %3947 = vtanh.f32 %v660_v4  ;;  %3809 = vmatmul.mubr.msk.f32.gmra.mrb[6].mxu1 %vm1084_vm2, %v3934_v1 }
 0x122   : > { %v3938_v5 = vpop.eup %3937 }
 0x123   : > { %v3940_v6 = vpop.eup %3939  ;;  %v3708_v7 = vpop.f32.mrb[28].mxu0 }
 0x124   : > { %3949 = vtanh.f32 %v3708_v7  ;;  %v670_v8 = vpop.f32.mrb[29].mxu0  ;;  %3811 = vmatprep.mubr.msk.f32.mxu1 %vm1084_vm2, %v3940_v6 }
 0x125   : > { %3951 = vtanh.f32 %v670_v8  ;;  %3812 = vmatmul.mubr.msk.f32.gmra.mrb[8].mxu1 %vm1084_vm2, %v3938_v5 }
 0x126   : > { %v3942_v9 = vpop.eup %3941 }
 0x127   : > { %v3944_v10 = vpop.eup %3943  ;;  %v3711_v11 = vpop.f32.mrb[30].mxu0 }
 0x128   : > { %3953 = vtanh.f32 %v3711_v11  ;;  %v680_v12 = vpop.f32.mrb[31].mxu0  ;;  %3814 = vmatprep.mubr.msk.f32.mxu1 %vm1084_vm2, %v3944_v10 }
 0x129   : > { %3955 = vtanh.f32 %v680_v12  ;;  %3815 = vmatmul.mubr.msk.f32.gmra.mrb[10].mxu1 %vm1084_vm2, %v3942_v9 }
 0x12a   : > { %v3946_v13 = vpop.eup %3945 }
 0x12b   : > { %v3948_v14 = vpop.eup %3947  ;;  %v3716_v19 = vpop.f32.mrb[32].mxu0 }
 0x12c   : > { %3817 = vmatprep.mubr.msk.f32.mxu1 %vm1084_vm2, %v3948_v14  ;;  %v925_v20 = vpop.f32.mrb[33].mxu0 }
 0x12d   : > { %3818 = vmatmul.mubr.msk.f32.gmra.mrb[12].mxu1 %vm1084_vm2, %v3946_v13 }
 0x12e   : > { %v3950_v15 = vpop.eup %3949 }
 0x12f   : > { %v3952_v16 = vpop.eup %3951  ;;  %v3719_v21 = vpop.f32.mrb[34].mxu0 }
 0x130   : > { %3820 = vmatprep.mubr.msk.f32.mxu1 %vm1084_vm2, %v3952_v16  ;;  %v935_v22 = vpop.f32.mrb[35].mxu0 }
 0x131   : > { %3821 = vmatmul.mubr.msk.f32.gmra.mrb[14].mxu1 %vm1084_vm2, %v3950_v15 }
 0x132   : > { %v3954_v17 = vpop.eup %3953 }
 0x133   : > { %v3956_v18 = vpop.eup %3955  ;;  %v3722_v23 = vpop.f32.mrb[36].mxu0 }
 0x134   : > { %3823 = vmatprep.mubr.msk.f32.mxu1 %vm1084_vm2, %v3956_v18  ;;  %v945_v24 = vpop.f32.mrb[37].mxu0 }
 0x135   : > { %3824 = vmatmul.mubr.msk.f32.gmra.mrb[16].mxu1 %vm1084_vm2, %v3954_v17 }
 0x137   : > { %v3725_v25 = vpop.f32.mrb[38].mxu0 }
 0x138   : > { %v955_v26 = vpop.f32.mrb[39].mxu0 }
 0x13b   : > { %v3728_v27 = vpop.f32.mrb[40].mxu0 }
 0x13c   : > { %v965_v28 = vpop.f32.mrb[41].mxu0 }
 0x13f   : > { %v3731_v29 = vpop.f32.mrb[42].mxu0 }
 0x140   : > { %v975_v30 = vpop.f32.mrb[43].mxu0 }
 0x143   : > { %v3734_v31 = vpop.f32.mrb[44].mxu0 }
 0x144   : > { %v4355_v32 = vpop.f32.mrb[45].mxu0 }
 0x1cc   : > { %v3780_v33 = vpop.f32.mrb[18].mxu1 }
 0x1cd   : > { %v4363_v34 = vadd.f32 %v3780_v33, %v3716_v19  ;;  %v1247_v35 = vpop.f32.mrb[19].mxu1 }
 0x1ce   : > { %v4365_v36 = vadd.f32 %v1247_v35, %v925_v20 }
 0x1cf   : > { %7148 = vst [vmem:[#allocation2_spill] sm:$0xff] %v4363_v34  ;;  %1407 = vst.msk [vmem:[%s4361_s17 + $0x8] sm:$0xff] %vm762_vm1, %v4363_v34  ;;  %v1443_v37 = vsel %vm762_vm1, %v4363_v34, -inf }
 0x1d0   : > { %7149 = vst [vmem:[#allocation3_spill] sm:$0xff] %v4365_v36  ;;  %1406 = vst.msk [vmem:[%s4361_s17] sm:$0xff] %vm762_vm1, %v4365_v36  ;;  %v3783_v38 = vpop.f32.mrb[20].mxu1  ;;  %1444 = vmax.xlane.f32.xlu0 %v1443_v37  ;;  %v1440_v42 = vsel %vm762_vm1, %v4365_v36, -inf }
 0x1d1   : > { %v4375_v39 = vadd.f32 %v3783_v38, %v3719_v21  ;;  %v1257_v40 = vpop.f32.mrb[21].mxu1 }
 0x1d2   : > { %v4377_v41 = vadd.f32 %v1257_v40, %v935_v22 }
 0x1d3   : > { %7150 = vst [vmem:[#allocation4_spill] sm:$0xff] %v4375_v39  ;;  %1409 = vst.msk [vmem:[%s4361_s17 + $0x18] sm:$0xff] %vm762_vm1, %v4375_v39  ;;  %v1449_v43 = vsel %vm762_vm1, %v4375_v39, -inf }
 0x1d4   : > { %7151 = vst [vmem:[#allocation5_spill] sm:$0xff] %v4377_v41  ;;  %1408 = vst.msk [vmem:[%s4361_s17 + $0x10] sm:$0xff] %vm762_vm1, %v4377_v41  ;;  %v3786_v44 = vpop.f32.mrb[22].mxu1  ;;  %1441 = vmax.xlane.f32.xlu0 %v1440_v42  ;;  %1450 = vmax.xlane.f32.xlu1 %v1449_v43  ;;  %v1446_v48 = vsel %vm762_vm1, %v4377_v41, -inf }
 0x1d5   : > { %v4389_v45 = vadd.f32 %v3786_v44, %v3722_v23  ;;  %v1267_v46 = vpop.f32.mrb[23].mxu1 }
 0x1d6   : > { %v4391_v47 = vadd.f32 %v1267_v46, %v945_v24 }
 0x1d7   : > { %7152 = vst [vmem:[#allocation6_spill] sm:$0xff] %v4389_v45  ;;  %1411 = vst.msk [vmem:[%s4361_s17 + $0x28] sm:$0xff] %vm762_vm1, %v4389_v45  ;;  %v1455_v54 = vsel %vm762_vm1, %v4389_v45, -inf }
 0x1d8   : > { %7153 = vst [vmem:[#allocation7_spill] sm:$0xff] %v4391_v47  ;;  %1410 = vst.msk [vmem:[%s4361_s17 + $0x20] sm:$0xff] %vm762_vm1, %v4391_v47  ;;  %v3789_v49 = vpop.f32.mrb[24].mxu1  ;;  %1447 = vmax.xlane.f32.xlu1 %v1446_v48  ;;  %v1452_v50 = vsel %vm762_vm1, %v4391_v47, -inf }
 0x1d9   : > { %v4403_v51 = vadd.f32 %v3789_v49, %v3725_v25  ;;  %v1277_v52 = vpop.f32.mrb[25].mxu1  ;;  %1453 = vmax.xlane.f32.xlu0 %v1452_v50 }
 0x1da   : > { %v4405_v53 = vadd.f32 %v1277_v52, %v955_v26 }
 0x1db   : > { %7154 = vst [vmem:[#allocation8_spill] sm:$0xff] %v4403_v51  ;;  %1413 = vst.msk [vmem:[%s4361_s17 + $0x38] sm:$0xff] %vm762_vm1, %v4403_v51  ;;  %v1461_v60 = vsel %vm762_vm1, %v4403_v51, -inf }
 0x1dc   : > { %7155 = vst [vmem:[#allocation9_spill] sm:$0xff] %v4405_v53  ;;  %1412 = vst.msk [vmem:[%s4361_s17 + $0x30] sm:$0xff] %vm762_vm1, %v4405_v53  ;;  %v3792_v55 = vpop.f32.mrb[26].mxu1  ;;  %1456 = vmax.xlane.f32.xlu1 %v1455_v54  ;;  %v1458_v56 = vsel %vm762_vm1, %v4405_v53, -inf }
 0x1dd   : > { %v4417_v57 = vadd.f32 %v3792_v55, %v3728_v27  ;;  %v1287_v58 = vpop.f32.mrb[27].mxu1  ;;  %1459 = vmax.xlane.f32.xlu0 %v1458_v56  ;;  %v1438_v55 = vlaneseq }
 0x1de   : > { %v4419_v59 = vadd.f32 %v1287_v58, %v965_v28 }
 0x1df   : > { %7156 = vst [vmem:[#allocation10_spill] sm:$0xff] %v4417_v57  ;;  %1415 = vst.msk [vmem:[%s4361_s17 + $0x48] sm:$0xff] %vm762_vm1, %v4417_v57  ;;  %v1467_v2 = vsel %vm762_vm1, %v4417_v57, -inf  ;;  %v4588_v56 = vand.u32 127, %v1438_v55 }
 0x1e0   : > { %7157 = vst [vmem:[#allocation11_spill] sm:$0xff] %v4419_v59  ;;  %1414 = vst.msk [vmem:[%s4361_s17 + $0x40] sm:$0xff] %vm762_vm1, %v4419_v59  ;;  %v3795_v61 = vpop.f32.mrb[28].mxu1  ;;  %1462 = vmax.xlane.f32.xlu1 %v1461_v60  ;;  %v1464_v62 = vsel %vm762_vm1, %v4419_v59, -inf }
 0x1e1   : > { %v4431_v63 = vadd.f32 %v3795_v61, %v3731_v29  ;;  %v1297_v0 = vpop.f32.mrb[29].mxu1  ;;  %1465 = vmax.xlane.f32.xlu0 %v1464_v62  ;;  %7180 = vst [vmem:[#allocation34_spill] sm:$0xff] %v4588_v56 }
 0x1e2   : > { %v4433_v1 = vadd.f32 %v1297_v0, %v975_v30 }
 0x1e3   : > { %7158 = vst [vmem:[#allocation12_spill] sm:$0xff] %v4431_v63  ;;  %1417 = vst.msk [vmem:[%s4361_s17 + $0x58] sm:$0xff] %vm762_vm1, %v4431_v63  ;;  %v1473_v8 = vsel %vm762_vm1, %v4431_v63, -inf }
 0x1e4   : > { %7159 = vst [vmem:[#allocation13_spill] sm:$0xff] %v4433_v1  ;;  %1416 = vst.msk [vmem:[%s4361_s17 + $0x50] sm:$0xff] %vm762_vm1, %v4433_v1  ;;  %v3798_v3 = vpop.f32.mrb[30].mxu1  ;;  %1468 = vmax.xlane.f32.xlu1 %v1467_v2  ;;  %v1470_v4 = vsel %vm762_vm1, %v4433_v1, -inf }
 0x1e5   : > { %v4445_v5 = vadd.f32 %v3798_v3, %v3734_v31  ;;  %v1307_v6 = vpop.f32.mrb[31].mxu1  ;;  %1471 = vmax.xlane.f32.xlu0 %v1470_v4 }
 0x1e6   : > { %v4448_v7 = vadd.f32 %v1307_v6, %v4355_v32 }
 0x1e7   : > { %7160 = vst [vmem:[#allocation14_spill] sm:$0xff] %v4445_v5  ;;  %1419 = vst.msk [vmem:[%s4361_s17 + $0x68] sm:$0xff] %vm762_vm1, %v4445_v5  ;;  %v1479_v12 = vsel %vm762_vm1, %v4445_v5, -inf }
 0x1e8   : > { %7161 = vst [vmem:[#allocation15_spill] sm:$0xff] %v4448_v7  ;;  %1418 = vst.msk [vmem:[%s4361_s17 + $0x60] sm:$0xff] %vm762_vm1, %v4448_v7  ;;  %v4458_v9 = vpop.f32.mrb[0].mxu1  ;;  %1474 = vmax.xlane.f32.xlu1 %v1473_v8  ;;  %v1476_v10 = vsel %vm762_vm1, %v4448_v7, -inf }
 0x1e9   : > { %7162 = vst [vmem:[#allocation16_spill] sm:$0xff] %v4458_v9  ;;  %1421 = vst.msk [vmem:[%s4361_s17 + $0x78] sm:$0xff] %vm762_vm1, %v4458_v9  ;;  %v4465_v11 = vpop.f32.mrb[1].mxu1  ;;  %1477 = vmax.xlane.f32.xlu0 %v1476_v10  ;;  %v1485_v16 = vsel %vm762_vm1, %v4458_v9, -inf }
 0x1ea   : > { %7163 = vst [vmem:[#allocation17_spill] sm:$0xff] %v4465_v11  ;;  %1420 = vst.msk [vmem:[%s4361_s17 + $0x70] sm:$0xff] %vm762_vm1, %v4465_v11  ;;  %v1482_v14 = vsel %vm762_vm1, %v4465_v11, -inf }
 0x1ec   : > { %v4472_v13 = vpop.f32.mrb[2].mxu1  ;;  %1480 = vmax.xlane.f32.xlu1 %v1479_v12 }
 0x1ed   : > { %7164 = vst [vmem:[#allocation18_spill] sm:$0xff] %v4472_v13  ;;  %1423 = vst.msk [vmem:[%s4361_s17 + $0x88] sm:$0xff] %vm762_vm1, %v4472_v13  ;;  %v4479_v15 = vpop.f32.mrb[3].mxu1  ;;  %1483 = vmax.xlane.f32.xlu0 %v1482_v14  ;;  %v1491_v20 = vsel %vm762_vm1, %v4472_v13, -inf }
 0x1ee   : > { %7165 = vst [vmem:[#allocation19_spill] sm:$0xff] %v4479_v15  ;;  %1422 = vst.msk [vmem:[%s4361_s17 + $0x80] sm:$0xff] %vm762_vm1, %v4479_v15  ;;  %v1488_v18 = vsel %vm762_vm1, %v4479_v15, -inf }
 0x1f0   : > { %v4486_v17 = vpop.f32.mrb[4].mxu1  ;;  %1486 = vmax.xlane.f32.xlu1 %v1485_v16 }
 0x1f1   : > { %7166 = vst [vmem:[#allocation20_spill] sm:$0xff] %v4486_v17  ;;  %1425 = vst.msk [vmem:[%s4361_s17 + $0x98] sm:$0xff] %vm762_vm1, %v4486_v17  ;;  %v4493_v19 = vpop.f32.mrb[5].mxu1  ;;  %1489 = vmax.xlane.f32.xlu0 %v1488_v18  ;;  %v1497_v24 = vsel %vm762_vm1, %v4486_v17, -inf }
 0x1f2   : > { %7167 = vst [vmem:[#allocation21_spill] sm:$0xff] %v4493_v19  ;;  %1424 = vst.msk [vmem:[%s4361_s17 + $0x90] sm:$0xff] %vm762_vm1, %v4493_v19  ;;  %v1494_v22 = vsel %vm762_vm1, %v4493_v19, -inf }
 0x1f4   : > { %v4500_v21 = vpop.f32.mrb[6].mxu1  ;;  %1492 = vmax.xlane.f32.xlu1 %v1491_v20 }
 0x1f5   : > { %7168 = vst [vmem:[#allocation22_spill] sm:$0xff] %v4500_v21  ;;  %1427 = vst.msk [vmem:[%s4361_s17 + $0xa8] sm:$0xff] %vm762_vm1, %v4500_v21  ;;  %v4507_v23 = vpop.f32.mrb[7].mxu1  ;;  %1495 = vmax.xlane.f32.xlu0 %v1494_v22  ;;  %v1503_v28 = vsel %vm762_vm1, %v4500_v21, -inf }
 0x1f6   : > { %7169 = vst [vmem:[#allocation23_spill] sm:$0xff] %v4507_v23  ;;  %1426 = vst.msk [vmem:[%s4361_s17 + $0xa0] sm:$0xff] %vm762_vm1, %v4507_v23  ;;  %v1500_v26 = vsel %vm762_vm1, %v4507_v23, -inf }
 0x1f8   : > { %v4514_v25 = vpop.f32.mrb[8].mxu1  ;;  %1498 = vmax.xlane.f32.xlu1 %v1497_v24 }
 0x1f9   : > { %7170 = vst [vmem:[#allocation24_spill] sm:$0xff] %v4514_v25  ;;  %1429 = vst.msk [vmem:[%s4361_s17 + $0xb8] sm:$0xff] %vm762_vm1, %v4514_v25  ;;  %v4521_v27 = vpop.f32.mrb[9].mxu1  ;;  %1501 = vmax.xlane.f32.xlu0 %v1500_v26  ;;  %v1509_v32 = vsel %vm762_vm1, %v4514_v25, -inf }
 0x1fa   : > { %7171 = vst [vmem:[#allocation25_spill] sm:$0xff] %v4521_v27  ;;  %1428 = vst.msk [vmem:[%s4361_s17 + $0xb0] sm:$0xff] %vm762_vm1, %v4521_v27  ;;  %v1506_v30 = vsel %vm762_vm1, %v4521_v27, -inf }
 0x1fc   : > { %v4528_v29 = vpop.f32.mrb[10].mxu1  ;;  %1504 = vmax.xlane.f32.xlu1 %v1503_v28 }
 0x1fd   : > { %7172 = vst [vmem:[#allocation26_spill] sm:$0xff] %v4528_v29  ;;  %1431 = vst.msk [vmem:[%s4361_s17 + $0xc8] sm:$0xff] %vm762_vm1, %v4528_v29  ;;  %v4535_v31 = vpop.f32.mrb[11].mxu1  ;;  %1507 = vmax.xlane.f32.xlu0 %v1506_v30  ;;  %v1515_v38 = vsel %vm762_vm1, %v4528_v29, -inf }
 0x1fe   : > { %7173 = vst [vmem:[#allocation27_spill] sm:$0xff] %v4535_v31  ;;  %1430 = vst.msk [vmem:[%s4361_s17 + $0xc0] sm:$0xff] %vm762_vm1, %v4535_v31  ;;  %v1512_v35 = vsel %vm762_vm1, %v4535_v31, -inf }
 0x200   : > { %v4542_v33 = vpop.f32.mrb[12].mxu1  ;;  %1510 = vmax.xlane.f32.xlu1 %v1509_v32 }
 0x201   : > { %7174 = vst [vmem:[#allocation28_spill] sm:$0xff] %v4542_v33  ;;  %1433 = vst.msk [vmem:[%s4361_s17 + $0xd8] sm:$0xff] %vm762_vm1, %v4542_v33  ;;  %v4549_v37 = vpop.f32.mrb[13].mxu1  ;;  %1513 = vmax.xlane.f32.xlu0 %v1512_v35  ;;  %v1521_v44 = vsel %vm762_vm1, %v4542_v33, -inf }
 0x202   : > { %7175 = vst [vmem:[#allocation29_spill] sm:$0xff] %v4549_v37  ;;  %1432 = vst.msk [vmem:[%s4361_s17 + $0xd0] sm:$0xff] %vm762_vm1, %v4549_v37  ;;  %v1518_v42 = vsel %vm762_vm1, %v4549_v37, -inf }
 0x204   : > { %v4556_v40 = vpop.f32.mrb[14].mxu1  ;;  %1516 = vmax.xlane.f32.xlu1 %v1515_v38 }
 0x205   : > { %7176 = vst [vmem:[#allocation30_spill] sm:$0xff] %v4556_v40  ;;  %1435 = vst.msk [vmem:[%s4361_s17 + $0xe8] sm:$0xff] %vm762_vm1, %v4556_v40  ;;  %v4563_v43 = vpop.f32.mrb[15].mxu1  ;;  %1519 = vmax.xlane.f32.xlu0 %v1518_v42  ;;  %v1527_v50 = vsel %vm762_vm1, %v4556_v40, -inf }
 0x206   : > { %7177 = vst [vmem:[#allocation31_spill] sm:$0xff] %v4563_v43  ;;  %1434 = vst.msk [vmem:[%s4361_s17 + $0xe0] sm:$0xff] %vm762_vm1, %v4563_v43  ;;  %v1524_v48 = vsel %vm762_vm1, %v4563_v43, -inf }
 0x208   : > { %1522 = vmax.xlane.f32.xlu1 %v1521_v44  ;;  %v4570_v46 = vpop.f32.mrb[16].mxu1 }
 0x209   : > { %7178 = vst [vmem:[#allocation32_spill] sm:$0xff] %v4570_v46  ;;  %1437 = vst.msk [vmem:[%s4361_s17 + $0xf8] sm:$0xff] %vm762_vm1, %v4570_v46  ;;  %1525 = vmax.xlane.f32.xlu0 %v1524_v48  ;;  %v4577_v49 = vpop.f32.mrb[17].mxu1  ;;  %v1533_v54 = vsel %vm762_vm1, %v4570_v46, -inf }
 0x20a   : > { %7179 = vst [vmem:[#allocation33_spill] sm:$0xff] %v4577_v49  ;;  %1436 = vst.msk [vmem:[%s4361_s17 + $0xf0] sm:$0xff] %vm762_vm1, %v4577_v49  ;;  %v1530_v52 = vsel %vm762_vm1, %v4577_v49, -inf }
 0x20c   : > { %1528 = vmax.xlane.f32.xlu1 %v1527_v50 }
 0x20d   : > { %1531 = vmax.xlane.f32.xlu0 %v1530_v52 }
 0x210   : > { %1534 = vmax.xlane.f32.xlu1 %v1533_v54 }
 0x25d   : > { %v4590_v58 = vpop.xlane.xlu0 %1444 }
 0x25e   : > { %7181 = vst [vmem:[#allocation35_spill] sm:$0xff] %v4590_v58  ;;  %vm1537_vm3 = vcmp.eq.f32.partialorder %v4363_v34, %v4590_v58 }
 0x25f   : > { %v1569_v60 = vsel %vm1537_vm3, %v4588_v56, 8 }
 0x260   : > { %v4596_v61 = vsel %vm762_vm1, %v1569_v60, 2147483647 }
 0x261   : > { %v4598_v62 = vpop.xlane.xlu0 %1441  ;;  %v4600_v0 = vpop.xlane.xlu1 %1450  ;;  %v1617_v2 = vshra.s32 %v4596_v61, 16 }
 0x262   : > { %7182 = vst [vmem:[#allocation36_spill] sm:$0xff] %v4598_v62  ;;  %7183 = vst [vmem:[#allocation37_spill] sm:$0xff] %v4600_v0  ;;  %vm1536_vm4 = vcmp.eq.f32.partialorder %v4365_v36, %v4598_v62  ;;  %vm1539_vm5 = vcmp.eq.f32.partialorder %v4375_v39, %v4600_v0 }
 0x263   : > { %v4607_v3 = vcvt.s32.f32 %v1617_v2  ;;  %v1571_v4 = vsel %vm1539_vm5, %v4588_v56, 8  ;;  %v1568_v6 = vsel %vm1536_vm4, %v4588_v56, 8 }
 0x264   : > { %v4612_v8 = vsel %vm762_vm1, %v1571_v4, 2147483647  ;;  %v4615_v10 = vsel %vm762_vm1, %v1568_v6, 2147483647 }
 0x265   : > { %v4617_v12 = vpop.xlane.xlu1 %1447  ;;  %1620 = vmin.xlane.f32.xlu1 %v4607_v3  ;;  %v1647_v14 = vshra.s32 %v4612_v8, 16  ;;  %v1602_v16 = vshra.s32 %v4615_v10, 16 }
 0x266   : > { %7184 = vst [vmem:[#allocation38_spill] sm:$0xff] %v4617_v12  ;;  %vm1538_vm6 = vcmp.eq.f32.partialorder %v4377_v41, %v4617_v12  ;;  %v4624_v18 = vpop.xlane.xlu0 %1453 }
 0x267   : > { %7185 = vst [vmem:[#allocation39_spill] sm:$0xff] %v4624_v18  ;;  %vm1540_vm7 = vcmp.eq.f32.partialorder %v4391_v47, %v4624_v18  ;;  %v4628_v20 = vcvt.s32.f32 %v1647_v14  ;;  %v4630_v22 = vcvt.s32.f32 %v1602_v16  ;;  %v1570_v24 = vsel %vm1538_vm6, %v4588_v56, 8 }
 0x268   : > { %v4634_v26 = vsel %vm762_vm1, %v1570_v24, 2147483647  ;;  %v1572_v28 = vsel %vm1540_vm7, %v4588_v56, 8 }
 0x269   : > { %v4637_v30 = vpop.xlane.xlu1 %1456  ;;  %1650 = vmin.xlane.f32.xlu1 %v4628_v20  ;;  %1605 = vmin.xlane.f32.xlu0 %v4630_v22  ;;  %v1632_v32 = vshra.s32 %v4634_v26, 16  ;;  %v4643_v35 = vsel %vm762_vm1, %v1572_v28, 2147483647 }
 0x26a   : > { %7186 = vst [vmem:[#allocation40_spill] sm:$0xff] %v4637_v30  ;;  %vm1541_vm8 = vcmp.eq.f32.partialorder %v4389_v45, %v4637_v30  ;;  %v4647_v38 = vpop.xlane.xlu0 %1459  ;;  %v1662_v48 = vshra.s32 %v4643_v35, 16 }
 0x26b   : > { %7187 = vst [vmem:[#allocation41_spill] sm:$0xff] %v4647_v38  ;;  %vm1542_vm9 = vcmp.eq.f32.partialorder %v4405_v53, %v4647_v38  ;;  %v4651_v42 = vcvt.s32.f32 %v1632_v32  ;;  %v1573_v44 = vsel %vm1541_vm8, %v4588_v56, 8 }
 0x26c   : > { %v4656_v50 = vsel %vm762_vm1, %v1573_v44, 2147483647  ;;  %v1574_v52 = vsel %vm1542_vm9, %v4588_v56, 8  ;;  %v4675_v14 = vcvt.s32.f32 %v1662_v48 }
 0x26d   : > { %v4659_v54 = vpop.xlane.xlu1 %1462  ;;  %1635 = vmin.xlane.f32.xlu0 %v4651_v42  ;;  %v1677_v55 = vshra.s32 %v4656_v50, 16  ;;  %v4664_v60 = vsel %vm762_vm1, %v1574_v52, 2147483647 }
 0x26e   : > { %7188 = vst [vmem:[#allocation42_spill] sm:$0xff] %v4659_v54  ;;  %vm1543_vm10 = vcmp.eq.f32.partialorder %v4403_v51, %v4659_v54  ;;  %v4668_v2 = vpop.xlane.xlu0 %1465  ;;  %v1692_v4 = vshra.s32 %v4664_v60, 16 }
 0x26f   : > { %7189 = vst [vmem:[#allocation43_spill] sm:$0xff] %v4668_v2  ;;  %vm1544_vm11 = vcmp.eq.f32.partialorder %v4419_v59, %v4668_v2  ;;  %v4673_v6 = vcvt.s32.f32 %v1677_v55  ;;  %v1575_v16 = vsel %vm1543_vm10, %v4588_v56, 8 }
 0x270   : > { %v4679_v24 = vsel %vm762_vm1, %v1575_v16, 2147483647  ;;  %v1576_v28 = vsel %vm1544_vm11, %v4588_v56, 8  ;;  %v4694_v55 = vcvt.s32.f32 %v1692_v4 }
 0x271   : > { %v4682_v32 = vpop.xlane.xlu1 %1468  ;;  %1680 = vmin.xlane.f32.xlu1 %v4673_v6  ;;  %1665 = vmin.xlane.f32.xlu0 %v4675_v14  ;;  %v1707_v44 = vshra.s32 %v4679_v24, 16  ;;  %v4688_v52 = vsel %vm762_vm1, %v1576_v28, 2147483647 }
 0x272   : > { %7190 = vst [vmem:[#allocation44_spill] sm:$0xff] %v4682_v32  ;;  %vm1545_vm12 = vcmp.eq.f32.partialorder %v4417_v57, %v4682_v32  ;;  %v4692_v48 = vpop.xlane.xlu0 %1471  ;;  %v1722_v38 = vshra.s32 %v4688_v52, 16 }
 0x273   : > { %7191 = vst [vmem:[#allocation45_spill] sm:$0xff] %v4692_v48  ;;  %vm1546_vm13 = vcmp.eq.f32.partialorder %v4433_v1, %v4692_v48  ;;  %v4698_v16 = vcvt.s32.f32 %v1707_v44  ;;  %v1577_v2 = vsel %vm1545_vm12, %v4588_v56, 8 }
 0x274   : > { %v4703_v54 = vsel %vm762_vm1, %v1577_v2, 2147483647  ;;  %v1578_v28 = vsel %vm1546_vm13, %v4588_v56, 8  ;;  %v4723_v30 = vcvt.s32.f32 %v1722_v38 }
 0x275   : > { %v4706_v18 = vpop.xlane.xlu1 %1474  ;;  %1710 = vmin.xlane.f32.xlu1 %v4698_v16  ;;  %1695 = vmin.xlane.f32.xlu0 %v4694_v55  ;;  %v1737_v4 = vshra.s32 %v4703_v54, 16  ;;  %v4712_v44 = vsel %vm762_vm1, %v1578_v28, 2147483647 }
 0x276   : > { %7192 = vst [vmem:[#allocation46_spill] sm:$0xff] %v4706_v18  ;;  %vm1547_vm14 = vcmp.eq.f32.partialorder %v4431_v63, %v4706_v18  ;;  %v4716_v48 = vpop.xlane.xlu0 %1477  ;;  %v1752_v2 = vshra.s32 %v4712_v44, 16 }
 0x277   : > { %7193 = vst [vmem:[#allocation47_spill] sm:$0xff] %v4716_v48  ;;  %vm1548_vm15 = vcmp.eq.f32.partialorder %v4448_v7, %v4716_v48  ;;  %v4721_v32 = vcvt.s32.f32 %v1737_v4  ;;  %v1579_v12 = vsel %vm1547_vm14, %v4588_v56, 8 }
 0x278   : > { %v4727_v62 = vsel %vm762_vm1, %v1579_v12, 2147483647  ;;  %v1580_v28 = vsel %vm1548_vm15, %v4588_v56, 8  ;;  %v4742_v12 = vcvt.s32.f32 %v1752_v2 }
 0x279   : > { %v4730_v0 = vpop.xlane.xlu1 %1480  ;;  %1740 = vmin.xlane.f32.xlu1 %v4721_v32  ;;  %1725 = vmin.xlane.f32.xlu0 %v4723_v30  ;;  %v1767_v18 = vshra.s32 %v4727_v62, 16  ;;  %v4736_v4 = vsel %vm762_vm1, %v1580_v28, 2147483647 }
 0x27a   : > { %7194 = vst [vmem:[#allocation48_spill] sm:$0xff] %v4730_v0  ;;  %vm1549_vm0 = vcmp.eq.f32.partialorder %v4445_v5, %v4730_v0  ;;  %v4740_v38 = vpop.xlane.xlu0 %1483  ;;  %v1782_v7 = vshra.s32 %v4736_v4, 16 }
 0x27b   : > { %7195 = vst [vmem:[#allocation49_spill] sm:$0xff] %v4740_v38  ;;  %vm1550_vm2 = vcmp.eq.f32.partialorder %v4465_v11, %v4740_v38  ;;  %v4746_v48 = vcvt.s32.f32 %v1767_v18  ;;  %v1581_v58 = vsel %vm1549_vm0, %v4588_v56, 8 }
 0x27c   : > { %v4751_v1 = vsel %vm762_vm1, %v1581_v58, 2147483647  ;;  %v1582_v28 = vsel %vm1550_vm2, %v4588_v56, 8  ;;  %v4771_v11 = vcvt.s32.f32 %v1782_v7 }
 0x27d   : > { %v4754_v63 = vpop.xlane.xlu1 %1486  ;;  %1770 = vmin.xlane.f32.xlu1 %v4746_v48  ;;  %1755 = vmin.xlane.f32.xlu0 %v4742_v12  ;;  %v1797_v2 = vshra.s32 %v4751_v1, 16  ;;  %v4760_v18 = vsel %vm762_vm1, %v1582_v28, 2147483647 }
 0x27e   : > { %7196 = vst [vmem:[#allocation50_spill] sm:$0xff] %v4754_v63  ;;  %vm1551_vm3 = vcmp.eq.f32.partialorder %v4458_v9, %v4754_v63  ;;  %v4764_v38 = vpop.xlane.xlu0 %1489  ;;  %v1812_v58 = vshra.s32 %v4760_v18, 16 }
 0x27f   : > { %7197 = vst [vmem:[#allocation51_spill] sm:$0xff] %v4764_v38  ;;  %vm1552_vm4 = vcmp.eq.f32.partialorder %v4479_v15, %v4764_v38  ;;  %v4769_v0 = vcvt.s32.f32 %v1797_v2  ;;  %v1583_v5 = vsel %vm1551_vm3, %v4588_v56, 8 }
 0x280   : > { %v4775_v59 = vsel %vm762_vm1, %v1583_v5, 2147483647  ;;  %v1584_v28 = vsel %vm1552_vm4, %v4588_v56, 8  ;;  %v4790_v5 = vcvt.s32.f32 %v1812_v58 }
 0x281   : > { %v4778_v57 = vpop.xlane.xlu1 %1492  ;;  %1800 = vmin.xlane.f32.xlu1 %v4769_v0  ;;  %1785 = vmin.xlane.f32.xlu0 %v4771_v11  ;;  %v1827_v63 = vshra.s32 %v4775_v59, 16  ;;  %v4784_v2 = vsel %vm762_vm1, %v1584_v28, 2147483647 }
 0x282   : > { %7198 = vst [vmem:[#allocation52_spill] sm:$0xff] %v4778_v57  ;;  %vm1553_vm5 = vcmp.eq.f32.partialorder %v4472_v13, %v4778_v57  ;;  %v4788_v7 = vpop.xlane.xlu0 %1495  ;;  %v1842_v9 = vshra.s32 %v4784_v2, 16 }
 0x283   : > { %7199 = vst [vmem:[#allocation53_spill] sm:$0xff] %v4788_v7  ;;  %vm1554_vm6 = vcmp.eq.f32.partialorder %v4493_v19, %v4788_v7  ;;  %v4794_v38 = vcvt.s32.f32 %v1827_v63  ;;  %v1585_v15 = vsel %vm1553_vm5, %v4588_v56, 8 }
 0x284   : > { %v4799_v53 = vsel %vm762_vm1, %v1585_v15, 2147483647  ;;  %v1586_v28 = vsel %vm1554_vm6, %v4588_v56, 8  ;;  %v4819_v19 = vcvt.s32.f32 %v1842_v9 }
 0x285   : > { %v4802_v51 = vpop.xlane.xlu1 %1498  ;;  %1830 = vmin.xlane.f32.xlu1 %v4794_v38  ;;  %1815 = vmin.xlane.f32.xlu0 %v4790_v5  ;;  %v1857_v58 = vshra.s32 %v4799_v53, 16  ;;  %v4808_v63 = vsel %vm762_vm1, %v1586_v28, 2147483647 }
 0x286   : > { %7200 = vst [vmem:[#allocation54_spill] sm:$0xff] %v4802_v51  ;;  %vm1555_vm7 = vcmp.eq.f32.partialorder %v4486_v17, %v4802_v51  ;;  %v4812_v7 = vpop.xlane.xlu0 %1501  ;;  %v1872_v15 = vshra.s32 %v4808_v63, 16 }
 0x287   : > { %7201 = vst [vmem:[#allocation55_spill] sm:$0xff] %v4812_v7  ;;  %vm1556_vm8 = vcmp.eq.f32.partialorder %v4507_v23, %v4812_v7  ;;  %v4817_v57 = vcvt.s32.f32 %v1857_v58  ;;  %v1587_v13 = vsel %vm1555_vm7, %v4588_v56, 8 }
 0x288   : > { %v4823_v47 = vsel %vm762_vm1, %v1587_v13, 2147483647  ;;  %v1588_v28 = vsel %vm1556_vm8, %v4588_v56, 8  ;;  %v4838_v13 = vcvt.s32.f32 %v1872_v15 }
 0x289   : > { %v4826_v45 = vpop.xlane.xlu1 %1504  ;;  %1860 = vmin.xlane.f32.xlu1 %v4817_v57  ;;  %1845 = vmin.xlane.f32.xlu0 %v4819_v19  ;;  %v1887_v51 = vshra.s32 %v4823_v47, 16  ;;  %v4832_v58 = vsel %vm762_vm1, %v1588_v28, 2147483647 }
 0x28a   : > { %7202 = vst [vmem:[#allocation56_spill] sm:$0xff] %v4826_v45  ;;  %vm1557_vm9 = vcmp.eq.f32.partialorder %v4500_v21, %v4826_v45  ;;  %v4836_v9 = vpop.xlane.xlu0 %1507  ;;  %v1902_v17 = vshra.s32 %v4832_v58, 16 }
 0x28b   : > { %7203 = vst [vmem:[#allocation57_spill] sm:$0xff] %v4836_v9  ;;  %vm1558_vm10 = vcmp.eq.f32.partialorder %v4521_v27, %v4836_v9  ;;  %v4842_v7 = vcvt.s32.f32 %v1887_v51  ;;  %v1589_v23 = vsel %vm1557_vm9, %v4588_v56, 8 }
 0x28c   : > { %v4847_v41 = vsel %vm762_vm1, %v1589_v23, 2147483647  ;;  %v1590_v28 = vsel %vm1558_vm10, %v4588_v56, 8  ;;  %v4867_v27 = vcvt.s32.f32 %v1902_v17 }
 0x28d   : > { %v4850_v36 = vpop.xlane.xlu1 %1510  ;;  %1890 = vmin.xlane.f32.xlu1 %v4842_v7  ;;  %1875 = vmin.xlane.f32.xlu0 %v4838_v13  ;;  %v1917_v15 = vshra.s32 %v4847_v41, 16  ;;  %v4856_v51 = vsel %vm762_vm1, %v1590_v28, 2147483647 }
 0x28e   : > { %7204 = vst [vmem:[#allocation58_spill] sm:$0xff] %v4850_v36  ;;  %vm1559_vm11 = vcmp.eq.f32.partialorder %v4514_v25, %v4850_v36  ;;  %v4860_v9 = vpop.xlane.xlu0 %1513  ;;  %v1932_v23 = vshra.s32 %v4856_v51, 16  ;;  %7207 = vst [vmem:[#allocation61_spill] sm:$0xff] %v4867_v27 }
 0x28f   : > { %7205 = vst [vmem:[#allocation59_spill] sm:$0xff] %v4860_v9  ;;  %vm1560_vm12 = vcmp.eq.f32.partialorder %v4535_v31, %v4860_v9  ;;  %v4865_v45 = vcvt.s32.f32 %v1917_v15  ;;  %v1591_v21 = vsel %vm1559_vm11, %v4588_v56, 8 }
 0x290   : > { %v4871_v39 = vsel %vm762_vm1, %v1591_v21, 2147483647  ;;  %v1592_v28 = vsel %vm1560_vm12, %v4588_v56, 8  ;;  %v4886_v21 = vcvt.s32.f32 %v1932_v23 }
 0x291   : > { %7206 = vst [vmem:[#allocation60_spill] sm:$0xff] %v4865_v45  ;;  %v4874_v34 = vpop.xlane.xlu1 %1516  ;;  %1920 = vmin.xlane.f32.xlu1 %v4865_v45  ;;  %1905 = vmin.xlane.f32.xlu0 %v4867_v27  ;;  %v1947_v36 = vshra.s32 %v4871_v39, 16  ;;  %v4880_v15 = vsel %vm762_vm1, %v1592_v28, 2147483647 }
 0x292   : > { %7208 = vst [vmem:[#allocation62_spill] sm:$0xff] %v4874_v34  ;;  %vm1561_vm13 = vcmp.eq.f32.partialorder %v4528_v29, %v4874_v34  ;;  %v4884_v17 = vpop.xlane.xlu0 %1519  ;;  %7210 = vst [vmem:[#allocation64_spill] sm:$0xff] %v4886_v21  ;;  %v1962_v25 = vshra.s32 %v4880_v15, 16 }
 0x293   : > { %7209 = vst [vmem:[#allocation63_spill] sm:$0xff] %v4884_v17  ;;  %vm1562_vm14 = vcmp.eq.f32.partialorder %v4549_v37, %v4884_v17  ;;  %v4890_v9 = vcvt.s32.f32 %v1947_v36  ;;  %v1593_v31 = vsel %vm1561_vm13, %v4588_v56, 8 }
 0x294   : > { %v4895_v27 = vsel %vm762_vm1, %v1593_v31, 2147483647  ;;  %v1594_v28 = vsel %vm1562_vm14, %v4588_v56, 8  ;;  %v4915_v37 = vcvt.s32.f32 %v1962_v25 }
 0x295   : > { %7211 = vst [vmem:[#allocation65_spill] sm:$0xff] %v4890_v9  ;;  %v4898_v45 = vpop.xlane.xlu1 %1522  ;;  %1950 = vmin.xlane.f32.xlu1 %v4890_v9  ;;  %1935 = vmin.xlane.f32.xlu0 %v4886_v21  ;;  %v1977_v23 = vshra.s32 %v4895_v27, 16  ;;  %v4904_v36 = vsel %vm762_vm1, %v1594_v28, 2147483647 }
 0x296   : > { %7212 = vst [vmem:[#allocation66_spill] sm:$0xff] %v4898_v45  ;;  %vm1563_vm15 = vcmp.eq.f32.partialorder %v4542_v33, %v4898_v45  ;;  %v4908_v17 = vpop.xlane.xlu0 %1525  ;;  %v1992_v31 = vshra.s32 %v4904_v36, 16  ;;  %7214 = vst [vmem:[#allocation68_spill] sm:$0xff] %v4915_v37 }
 0x297   : > { %7213 = vst [vmem:[#allocation67_spill] sm:$0xff] %v4908_v17  ;;  %vm1564_vm0 = vcmp.eq.f32.partialorder %v4563_v43, %v4908_v17  ;;  %v4913_v34 = vcvt.s32.f32 %v1977_v23  ;;  %v1595_v29 = vsel %vm1563_vm15, %v4588_v56, 8 }
 0x298   : > { %v4919_v21 = vsel %vm762_vm1, %v1595_v29, 2147483647  ;;  %v1596_v28 = vsel %vm1564_vm0, %v4588_v56, 8  ;;  %v4934_v29 = vcvt.s32.f32 %v1992_v31 }
 0x299   : > { %v4922_v9 = vpop.xlane.xlu1 %1528  ;;  %1980 = vmin.xlane.f32.xlu1 %v4913_v34  ;;  %1965 = vmin.xlane.f32.xlu0 %v4915_v37  ;;  %v2007_v45 = vshra.s32 %v4919_v21, 16  ;;  %v4928_v23 = vsel %vm762_vm1, %v1596_v28, 2147483647 }
 0x29a   : > { %7215 = vst [vmem:[#allocation69_spill] sm:$0xff] %v4922_v9  ;;  %vm1565_vm2 = vcmp.eq.f32.partialorder %v4556_v40, %v4922_v9  ;;  %v4932_v25 = vpop.xlane.xlu0 %1531  ;;  %7217 = vst [vmem:[#allocation71_spill] sm:$0xff] %v4934_v29  ;;  %v2022_v33 = vshra.s32 %v4928_v23, 16 }
 0x29b   : > { %7216 = vst [vmem:[#allocation70_spill] sm:$0xff] %v4932_v25  ;;  %vm1566_vm3 = vcmp.eq.f32.partialorder %v4577_v49, %v4932_v25  ;;  %v4938_v17 = vcvt.s32.f32 %v2007_v45  ;;  %v1597_v43 = vsel %vm1565_vm2, %v4588_v56, 8 }
 0x29c   : > { %v4943_v37 = vsel %vm762_vm1, %v1597_v43, 2147483647  ;;  %v1598_v28 = vsel %vm1566_vm3, %v4588_v56, 8  ;;  %v4958_v43 = vcvt.s32.f32 %v2022_v33  ;;  %v1616_v33 = vand.u32 65535, %v4596_v61 }
 0x29d   : > { %7218 = vst [vmem:[#allocation72_spill] sm:$0xff] %v4938_v17  ;;  %2010 = vmin.xlane.f32.xlu1 %v4938_v17  ;;  %v4947_v9 = vpop.xlane.xlu1 %1534  ;;  %1995 = vmin.xlane.f32.xlu0 %v4934_v29  ;;  %v2037_v31 = vshra.s32 %v4943_v37, 16  ;;  %v4952_v45 = vsel %vm762_vm1, %v1598_v28, 2147483647  ;;  %v1631_v61 = vand.u32 65535, %v4634_v26 }
 0x29e   : > { %7219 = vst [vmem:[#allocation73_spill] sm:$0xff] %v4947_v9  ;;  %vm1567_vm4 = vcmp.eq.f32.partialorder %v4570_v46, %v4947_v9  ;;  %7220 = vst [vmem:[#allocation74_spill] sm:$0xff] %v4958_v43  ;;  %v2052_v40 = vshra.s32 %v4952_v45, 16  ;;  %v1646_v46 = vand.u32 65535, %v4612_v8 }
 0x29f   : > { %v4956_v25 = vcvt.s32.f32 %v2037_v31  ;;  %v1599_v49 = vsel %vm1567_vm4, %v4588_v56, 8  ;;  %v1601_v56 = vand.u32 65535, %v4615_v10 }
 0x2a0   : > { %v4963_v17 = vsel %vm762_vm1, %v1599_v49, 2147483647  ;;  %v4970_v9 = vcvt.s32.f32 %v2052_v40  ;;  %v1618_v49 = vcvt.s32.f32 %v1616_v33  ;;  %v1633_v33 = vcvt.s32.f32 %v1631_v61 }
 0x2a1   : > { %2040 = vmin.xlane.f32.xlu1 %v4956_v25  ;;  %2025 = vmin.xlane.f32.xlu0 %v4958_v43  ;;  %v2067_v28 = vshra.s32 %v4963_v17, 16 }
 0x2a2   : > { %7222 = vst [vmem:[#allocation76_spill] sm:$0xff] %v4970_v9 }
 0x2a3   : > { %v4968_v29 = vcvt.s32.f32 %v2067_v28 }
 0x2a5   : > { %7221 = vst [vmem:[#allocation75_spill] sm:$0xff] %v4968_v29  ;;  %2070 = vmin.xlane.f32.xlu1 %v4968_v29  ;;  %2055 = vmin.xlane.f32.xlu0 %v4970_v9  ;;  %v1648_v29 = vcvt.s32.f32 %v1646_v46  ;;  %v1603_v9 = vcvt.s32.f32 %v1601_v56  ;;  %v1661_v46 = vand.u32 65535, %v4643_v35 }
 0x2f2   : > { %v4975_v31 = vpop.xlane.xlu1 %1620 }
 0x2f3   : > { %vm1622_vm5 = vcmp.eq.f32.partialorder %v4607_v3, %v4975_v31 }
 0x2f4   : > { %v1623_v28 = vsel %vm1622_vm5, %v1618_v49, inf  ;;  %v1676_v49 = vand.u32 65535, %v4656_v50 }
 0x2f5   : > { %1624 = vmin.xlane.f32.xlu1 %v1623_v28  ;;  %v1691_v28 = vand.u32 65535, %v4664_v60  ;;  %v1721_v60 = vand.u32 65535, %v4688_v52  ;;  %v1751_v52 = vand.u32 65535, %v4712_v44  ;;  %v1781_v44 = vand.u32 65535, %v4736_v4 }
 0x2f6   : > { %v4981_v40 = vpop.xlane.xlu1 %1650  ;;  %v4983_v43 = vpop.xlane.xlu0 %1605  ;;  %v1811_v4 = vand.u32 65535, %v4760_v18  ;;  %v1841_v18 = vand.u32 65535, %v4784_v2  ;;  %v1871_v2 = vand.u32 65535, %v4808_v63  ;;  %v1901_v63 = vand.u32 65535, %v4832_v58 }
 0x2f7   : > { %vm1652_vm6 = vcmp.eq.f32.partialorder %v4628_v20, %v4981_v40  ;;  %vm1607_vm7 = vcmp.eq.f32.partialorder %v4630_v22, %v4983_v43  ;;  %v1678_v22 = vcvt.s32.f32 %v1676_v49  ;;  %v1931_v58 = vand.u32 65535, %v4856_v51 }
 0x2f8   : > { %v1653_v8 = vsel %vm1652_vm6, %v1648_v29, inf  ;;  %v1608_v10 = vsel %vm1607_vm7, %v1603_v9, inf  ;;  %v1663_v9 = vcvt.s32.f32 %v1661_v46  ;;  %v1706_v29 = vand.u32 65535, %v4679_v24 }
 0x2f9   : > { %1654 = vmin.xlane.f32.xlu1 %v1653_v8  ;;  %1609 = vmin.xlane.f32.xlu0 %v1608_v10  ;;  %v1693_v10 = vcvt.s32.f32 %v1691_v28  ;;  %v1736_v24 = vand.u32 65535, %v4703_v54  ;;  %v1766_v54 = vand.u32 65535, %v4727_v62  ;;  %v1753_v28 = vcvt.s32.f32 %v1751_v52 }
 0x2fa   : > { %v4990_v3 = vpop.xlane.xlu0 %1635  ;;  %v1708_v8 = vcvt.s32.f32 %v1706_v29  ;;  %v1796_v62 = vand.u32 65535, %v4751_v1  ;;  %v1826_v1 = vand.u32 65535, %v4775_v59  ;;  %v1856_v59 = vand.u32 65535, %v4799_v53 }
 0x2fb   : > { %vm1637_vm8 = vcmp.eq.f32.partialorder %v4651_v42, %v4990_v3  ;;  %v1738_v46 = vcvt.s32.f32 %v1736_v24  ;;  %v1768_v29 = vcvt.s32.f32 %v1766_v54  ;;  %v1843_v52 = vcvt.s32.f32 %v1841_v18 }
 0x2fc   : > { %v1638_v56 = vsel %vm1637_vm8, %v1633_v33, inf  ;;  %v1858_v54 = vcvt.s32.f32 %v1856_v59  ;;  %v1886_v53 = vand.u32 65535, %v4823_v47  ;;  %v1916_v47 = vand.u32 65535, %v4847_v41 }
 0x2fd   : > { %1639 = vmin.xlane.f32.xlu0 %v1638_v56  ;;  %v1723_v56 = vcvt.s32.f32 %v1721_v60  ;;  %v1946_v41 = vand.u32 65535, %v4871_v39  ;;  %v1976_v39 = vand.u32 65535, %v4895_v27  ;;  %v1961_v51 = vand.u32 65535, %v4880_v15 }
 0x2fe   : > { %v4996_v20 = vpop.xlane.xlu1 %1680  ;;  %v4998_v26 = vpop.xlane.xlu0 %1665  ;;  %v2006_v27 = vand.u32 65535, %v4919_v21  ;;  %v1991_v15 = vand.u32 65535, %v4904_v36  ;;  %v2036_v21 = vand.u32 65535, %v4943_v37  ;;  %v2021_v36 = vand.u32 65535, %v4928_v23 }
 0x2ff   : > { %vm1682_vm9 = vcmp.eq.f32.partialorder %v4673_v6, %v4996_v20  ;;  %vm1667_vm10 = vcmp.eq.f32.partialorder %v4675_v14, %v4998_v26  ;;  %v2066_v37 = vand.u32 65535, %v4963_v17  ;;  %v2051_v23 = vand.u32 65535, %v4952_v45  ;;  %v7231_v17 = vld [vmem:[#allocation75_spill] sm:$0xff]  ;;  %v7232_v45 = vld [vmem:[#allocation76_spill] sm:$0xff] }
 0x300   : > { %v1683_v35 = vsel %vm1682_vm9, %v1678_v22, inf  ;;  %v1668_v42 = vsel %vm1667_vm10, %v1663_v9, inf }
 0x301   : > { %1684 = vmin.xlane.f32.xlu1 %v1683_v35  ;;  %1669 = vmin.xlane.f32.xlu0 %v1668_v42 }
 0x302   : > { %v5006_v50 = vpop.xlane.xlu1 %1710  ;;  %v5008_v61 = vpop.xlane.xlu0 %1695 }
 0x303   : > { %vm1712_vm11 = vcmp.eq.f32.partialorder %v4698_v16, %v5006_v50  ;;  %vm1697_vm12 = vcmp.eq.f32.partialorder %v4694_v55, %v5008_v61 }
 0x304   : > { %v1713_v6 = vsel %vm1712_vm11, %v1708_v8, inf  ;;  %v1698_v14 = vsel %vm1697_vm12, %v1693_v10, inf  ;;  %v1798_v8 = vcvt.s32.f32 %v1796_v62  ;;  %v1783_v10 = vcvt.s32.f32 %v1781_v44 }
 0x305   : > { %1714 = vmin.xlane.f32.xlu1 %v1713_v6  ;;  %1699 = vmin.xlane.f32.xlu0 %v1698_v14  ;;  %v1828_v6 = vcvt.s32.f32 %v1826_v1  ;;  %v1813_v14 = vcvt.s32.f32 %v1811_v4 }
 0x306   : > { %v5016_v33 = vpop.xlane.xlu1 %1740  ;;  %v5018_v49 = vpop.xlane.xlu0 %1725 }
 0x307   : > { %vm1742_vm13 = vcmp.eq.f32.partialorder %v4721_v32, %v5016_v33  ;;  %vm1727_vm14 = vcmp.eq.f32.partialorder %v4723_v30, %v5018_v49 }
 0x308   : > { %v1743_v55 = vsel %vm1742_vm13, %v1738_v46, inf  ;;  %v1728_v16 = vsel %vm1727_vm14, %v1723_v56, inf }
 0x309   : > { %1744 = vmin.xlane.f32.xlu1 %v1743_v55  ;;  %1729 = vmin.xlane.f32.xlu0 %v1728_v16 }
 0x30a   : > { %v5026_v22 = vpop.xlane.xlu1 %1770  ;;  %v5028_v9 = vpop.xlane.xlu0 %1755 }
 0x30b   : > { %vm1772_vm15 = vcmp.eq.f32.partialorder %v4746_v48, %v5026_v22  ;;  %vm1757_vm0 = vcmp.eq.f32.partialorder %v4742_v12, %v5028_v9 }
 0x30c   : > { %v1773_v30 = vsel %vm1772_vm15, %v1768_v29, inf  ;;  %v1758_v32 = vsel %vm1757_vm0, %v1753_v28, inf  ;;  %v1888_v29 = vcvt.s32.f32 %v1886_v53  ;;  %v1873_v28 = vcvt.s32.f32 %v1871_v2  ;;  %v7227_v53 = vld [vmem:[#allocation68_spill] sm:$0xff] }
 0x30d   : > { %1774 = vmin.xlane.f32.xlu1 %v1773_v30  ;;  %1759 = vmin.xlane.f32.xlu0 %v1758_v32  ;;  %v1918_v30 = vcvt.s32.f32 %v1916_v47  ;;  %v1903_v32 = vcvt.s32.f32 %v1901_v63  ;;  %v1993_v47 = vcvt.s32.f32 %v1991_v15  ;;  %v7228_v63 = vld [vmem:[#allocation72_spill] sm:$0xff] }
 0x30e   : > { %v5036_v35 = vpop.xlane.xlu1 %1800  ;;  %v5038_v42 = vpop.xlane.xlu0 %1785 }
 0x30f   : > { %vm1802_vm2 = vcmp.eq.f32.partialorder %v4769_v0, %v5036_v35  ;;  %vm1787_vm3 = vcmp.eq.f32.partialorder %v4771_v11, %v5038_v42 }
 0x310   : > { %v1803_v48 = vsel %vm1802_vm2, %v1798_v8, inf  ;;  %v1788_v12 = vsel %vm1787_vm3, %v1783_v10, inf  ;;  %v7223_v8 = vld [vmem:[#allocation60_spill] sm:$0xff] }
 0x311   : > { %1804 = vmin.xlane.f32.xlu1 %v1803_v48  ;;  %1789 = vmin.xlane.f32.xlu0 %v1788_v12  ;;  %v1948_v48 = vcvt.s32.f32 %v1946_v41  ;;  %v1933_v12 = vcvt.s32.f32 %v1931_v58  ;;  %v2038_v41 = vcvt.s32.f32 %v2036_v21  ;;  %v2023_v58 = vcvt.s32.f32 %v2021_v36  ;;  %v7234_v36 = vld [vmem:[#allocation34_spill] sm:$0xff] }
 0x312   : > { %v5046_v24 = vpop.xlane.xlu1 %1830  ;;  %v5048_v60 = vpop.xlane.xlu0 %1815 }
 0x313   : > { %vm1832_vm4 = vcmp.eq.f32.partialorder %v4794_v38, %v5046_v24  ;;  %vm1817_vm5 = vcmp.eq.f32.partialorder %v4790_v5, %v5048_v60 }
 0x314   : > { %v1833_v11 = vsel %vm1832_vm4, %v1828_v6, inf  ;;  %v1818_v0 = vsel %vm1817_vm5, %v1813_v14, inf  ;;  %v7225_v6 = vld [vmem:[#allocation65_spill] sm:$0xff]  ;;  %v7226_v14 = vld [vmem:[#allocation64_spill] sm:$0xff] }
 0x315   : > { %1834 = vmin.xlane.f32.xlu1 %v1833_v11  ;;  %1819 = vmin.xlane.f32.xlu0 %v1818_v0 }
 0x316   : > { %v5056_v46 = vpop.xlane.xlu1 %1860  ;;  %v5058_v56 = vpop.xlane.xlu0 %1845 }
 0x317   : > { %vm1862_vm6 = vcmp.eq.f32.partialorder %v4817_v57, %v5056_v46  ;;  %vm1847_vm7 = vcmp.eq.f32.partialorder %v4819_v19, %v5058_v56 }
 0x318   : > { %v1863_v38 = vsel %vm1862_vm6, %v1858_v54, inf  ;;  %v1848_v5 = vsel %vm1847_vm7, %v1843_v52, inf  ;;  %v1978_v54 = vcvt.s32.f32 %v1976_v39  ;;  %v1963_v52 = vcvt.s32.f32 %v1961_v51 }
 0x319   : > { %1864 = vmin.xlane.f32.xlu1 %v1863_v38  ;;  %1849 = vmin.xlane.f32.xlu0 %v1848_v5  ;;  %v2053_v39 = vcvt.s32.f32 %v2051_v23 }
 0x31a   : > { %v5066_v55 = vpop.xlane.xlu1 %1890  ;;  %v5068_v16 = vpop.xlane.xlu0 %1875 }
 0x31b   : > { %vm1892_vm8 = vcmp.eq.f32.partialorder %v4842_v7, %v5066_v55  ;;  %vm1877_vm9 = vcmp.eq.f32.partialorder %v4838_v13, %v5068_v16  ;;  %v7224_v7 = vld [vmem:[#allocation61_spill] sm:$0xff] }
 0x31c   : > { %v1893_v57 = vsel %vm1892_vm8, %v1888_v29, inf  ;;  %v1878_v19 = vsel %vm1877_vm9, %v1873_v28, inf  ;;  %v2008_v28 = vcvt.s32.f32 %v2006_v27 }
 0x31d   : > { %1894 = vmin.xlane.f32.xlu1 %v1893_v57  ;;  %1879 = vmin.xlane.f32.xlu0 %v1878_v19 }
 0x31e   : > { %v5076_v62 = vpop.xlane.xlu1 %1920  ;;  %v5078_v44 = vpop.xlane.xlu0 %1905 }
 0x31f   : > { %vm1922_vm10 = vcmp.eq.f32.partialorder %v7223_v8, %v5076_v62  ;;  %vm1907_vm11 = vcmp.eq.f32.partialorder %v7224_v7, %v5078_v44  ;;  %v7230_v8 = vld [vmem:[#allocation74_spill] sm:$0xff] }
 0x320   : > { %v1923_v13 = vsel %vm1922_vm10, %v1918_v30, inf  ;;  %v1908_v10 = vsel %vm1907_vm11, %v1903_v32, inf }
 0x321   : > { %1924 = vmin.xlane.f32.xlu1 %v1923_v13  ;;  %1909 = vmin.xlane.f32.xlu0 %v1908_v10 }
 0x322   : > { %v5086_v1 = vpop.xlane.xlu1 %1950  ;;  %v5088_v4 = vpop.xlane.xlu0 %1935 }
 0x323   : > { %vm1952_vm12 = vcmp.eq.f32.partialorder %v7225_v6, %v5086_v1  ;;  %vm1937_vm13 = vcmp.eq.f32.partialorder %v7226_v14, %v5088_v4  ;;  %v1627_v6 = vcvt.f32.s32 %v4975_v31  ;;  %v1657_v14 = vcvt.f32.s32 %v4981_v40  ;;  %v7235_v31 = vld [vmem:[#allocation2_spill] sm:$0xff] }
 0x324   : > { %v1953_v59 = vsel %vm1952_vm12, %v1948_v48, inf  ;;  %v1938_v18 = vsel %vm1937_vm13, %v1933_v12, inf  ;;  %v2068_v12 = vcvt.s32.f32 %v2066_v37  ;;  %v7238_v37 = vld [vmem:[#allocation4_spill] sm:$0xff] }
 0x325   : > { %1954 = vmin.xlane.f32.xlu1 %v1953_v59  ;;  %1939 = vmin.xlane.f32.xlu0 %v1938_v18  ;;  %v1612_v59 = vcvt.f32.s32 %v4983_v43  ;;  %v1658_v15 = vshll.u32 %v1657_v14, 16 }
 0x326   : > { %v5096_v11 = vpop.xlane.xlu1 %1980  ;;  %v5098_v0 = vpop.xlane.xlu0 %1965 }
 0x327   : > { %vm1982_vm14 = vcmp.eq.f32.partialorder %v4913_v34, %v5096_v11  ;;  %vm1967_vm15 = vcmp.eq.f32.partialorder %v7227_v53, %v5098_v0  ;;  %v7229_v34 = vld [vmem:[#allocation71_spill] sm:$0xff]  ;;  %v1613_v53 = vshll.u32 %v1612_v59, 16  ;;  %v7241_v59 = vld [vmem:[#allocation5_spill] sm:$0xff] }
 0x328   : > { %v1983_v2 = vsel %vm1982_vm14, %v1978_v54, inf  ;;  %v1968_v38 = vsel %vm1967_vm15, %v1963_v52, inf  ;;  %v1628_v54 = vshll.u32 %v1627_v6, 16 }
 0x329   : > { %1984 = vmin.xlane.f32.xlu1 %v1983_v2  ;;  %1969 = vmin.xlane.f32.xlu0 %v1968_v38 }
 0x32a   : > { %v5106_v5 = vpop.xlane.xlu1 %2010  ;;  %v5108_v29 = vpop.xlane.xlu0 %1995 }
 0x32b   : > { %vm2012_vm0 = vcmp.eq.f32.partialorder %v7228_v63, %v5106_v5  ;;  %vm1997_vm2 = vcmp.eq.f32.partialorder %v7229_v34, %v5108_v29 }
 0x32c   : > { %v2013_v57 = vsel %vm2012_vm0, %v2008_v28, inf  ;;  %v1998_v19 = vsel %vm1997_vm2, %v1993_v47, inf  ;;  %v1642_v28 = vcvt.f32.s32 %v4990_v3 }
 0x32d   : > { %2014 = vmin.xlane.f32.xlu1 %v2013_v57  ;;  %1999 = vmin.xlane.f32.xlu0 %v1998_v19  ;;  %v1687_v57 = vcvt.f32.s32 %v4996_v20  ;;  %v1672_v19 = vcvt.f32.s32 %v4998_v26 }
 0x32e   : > { %v5116_v30 = vpop.xlane.xlu1 %2040  ;;  %v5118_v32 = vpop.xlane.xlu0 %2025 }
 0x32f   : > { %vm2042_vm3 = vcmp.eq.f32.partialorder %v4956_v25, %v5116_v30  ;;  %vm2027_vm4 = vcmp.eq.f32.partialorder %v7230_v8, %v5118_v32 }
 0x330   : > { %v2043_v7 = vsel %vm2042_vm3, %v2038_v41, inf  ;;  %v2028_v13 = vsel %vm2027_vm4, %v2023_v58, inf  ;;  %v1643_v41 = vshll.u32 %v1642_v28, 16 }
 0x331   : > { %2044 = vmin.xlane.f32.xlu1 %v2043_v7  ;;  %2029 = vmin.xlane.f32.xlu0 %v2028_v13  ;;  %v7240_v7 = vld [vmem:[#allocation3_spill] sm:$0xff]  ;;  %v1688_v13 = vshll.u32 %v1687_v57, 16 }
 0x332   : > { %v5126_v10 = vpop.xlane.xlu1 %2070  ;;  %v5128_v48 = vpop.xlane.xlu0 %2055 }
 0x333   : > { %vm2072_vm5 = vcmp.eq.f32.partialorder %v7231_v17, %v5126_v10  ;;  %vm2057_vm6 = vcmp.eq.f32.partialorder %v7232_v45, %v5128_v48 }
 0x334   : > { %v2073_v25 = vsel %vm2072_vm5, %v2068_v12, inf  ;;  %v2058_v51 = vsel %vm2057_vm6, %v2053_v39, inf  ;;  %v1673_v12 = vshll.u32 %v1672_v19, 16  ;;  %v1717_v39 = vcvt.f32.s32 %v5006_v50 }
 0x335   : > { %2074 = vmin.xlane.f32.xlu1 %v2073_v25  ;;  %2059 = vmin.xlane.f32.xlu0 %v2058_v51  ;;  %v1702_v51 = vcvt.f32.s32 %v5008_v61  ;;  %v1732_v61 = vcvt.f32.s32 %v5018_v49  ;;  %v7247_v49 = vld [vmem:[#allocation7_spill] sm:$0xff] }
 0x337   : > { %v1703_v28 = vshll.u32 %v1702_v51, 16  ;;  %v7250_v51 = vld [vmem:[#allocation8_spill] sm:$0xff] }
 0x382   : > { %v1625_v18 = vpop.xlane.xlu1 %1624 }
 0x383   : > { %v1626_v52 = vcvt.f32.s32 %v1625_v18 }
 0x385   : > { %v5137_v27 = vadd.s32 %v1628_v54, %v1626_v52 }
 0x386   : > { %v1655_v2 = vpop.xlane.xlu1 %1654  ;;  %v1610_v38 = vpop.xlane.xlu0 %1609 }
 0x387   : > { %7233 = vst [vmem:[#allocation60_spill] sm:$0xff] %v5137_v27  ;;  %v1656_v47 = vcvt.f32.s32 %v1655_v2  ;;  %v1611_v21 = vcvt.f32.s32 %v1610_v38  ;;  %vm2081_vm7 = vcmp.eq.s32.totalorder %v7234_v36, %v5137_v27  ;;  %v1718_v38 = vshll.u32 %v1717_v39, 16 }
 0x388   : > { %v5143_v40 = vsel %vm2081_vm7, -inf, %v7235_v31 }
 0x389   : > { %v5145_v43 = vadd.s32 %v1658_v15, %v1656_v47  ;;  %v5147_v63 = vadd.s32 %v1613_v53, %v1611_v21  ;;  %v2147_v34 = vsel %vm762_vm1, %v5143_v40, -inf  ;;  %v1747_v15 = vcvt.f32.s32 %v5016_v33  ;;  %v7246_v33 = vld [vmem:[#allocation6_spill] sm:$0xff] }
 0x38a   : > { %2148 = vmax.xlane.f32.xlu1 %v2147_v34  ;;  %v1640_v3 = vpop.xlane.xlu0 %1639 }
 0x38b   : > { %7236 = vst [vmem:[#allocation61_spill] sm:$0xff] %v5145_v43  ;;  %7237 = vst [vmem:[#allocation65_spill] sm:$0xff] %v5147_v63  ;;  %v1641_v58 = vcvt.f32.s32 %v1640_v3  ;;  %vm2083_vm8 = vcmp.eq.s32.totalorder %v7234_v36, %v5145_v43  ;;  %vm2080_vm9 = vcmp.eq.s32.totalorder %v7234_v36, %v5147_v63  ;;  %v1748_v3 = vshll.u32 %v1747_v15, 16 }
 0x38c   : > { %v5156_v23 = vsel %vm2083_vm8, -inf, %v7238_v37  ;;  %v5165_v26 = vsel %vm2080_vm9, -inf, %v7240_v7 }
 0x38d   : > { %v5160_v8 = vadd.s32 %v1643_v41, %v1641_v58  ;;  %v2153_v20 = vsel %vm762_vm1, %v5156_v23, -inf  ;;  %v2144_v45 = vsel %vm762_vm1, %v5165_v26, -inf  ;;  %v1733_v41 = vshll.u32 %v1732_v61, 16 }
 0x38e   : > { %2154 = vmax.xlane.f32.xlu1 %v2153_v20  ;;  %v1685_v17 = vpop.xlane.xlu1 %1684  ;;  %v1670_v25 = vpop.xlane.xlu0 %1669  ;;  %2145 = vmax.xlane.f32.xlu0 %v2144_v45 }
 0x38f   : > { %7239 = vst [vmem:[#allocation64_spill] sm:$0xff] %v5160_v8  ;;  %v1686_v6 = vcvt.f32.s32 %v1685_v17  ;;  %v1671_v14 = vcvt.f32.s32 %v1670_v25  ;;  %vm2082_vm10 = vcmp.eq.s32.totalorder %v7234_v36, %v5160_v8 }
 0x390   : > { %v5174_v18 = vsel %vm2082_vm10, -inf, %v7241_v59  ;;  %v1792_v59 = vcvt.f32.s32 %v5038_v42 }
 0x391   : > { %v5176_v54 = vadd.s32 %v1688_v13, %v1686_v6  ;;  %v5178_v50 = vadd.s32 %v1673_v12, %v1671_v14  ;;  %v2150_v52 = vsel %vm762_vm1, %v5174_v18, -inf  ;;  %v1777_v13 = vcvt.f32.s32 %v5026_v22  ;;  %v7251_v22 = vld [vmem:[#allocation9_spill] sm:$0xff] }
 0x392   : > { %v1715_v53 = vpop.xlane.xlu1 %1714  ;;  %v1700_v2 = vpop.xlane.xlu0 %1699  ;;  %2151 = vmax.xlane.f32.xlu0 %v2150_v52  ;;  %v1762_v12 = vcvt.f32.s32 %v5028_v9  ;;  %v1807_v9 = vcvt.f32.s32 %v5036_v35 }
 0x393   : > { %7242 = vst [vmem:[#allocation68_spill] sm:$0xff] %v5176_v54  ;;  %7243 = vst [vmem:[#allocation72_spill] sm:$0xff] %v5178_v50  ;;  %v1716_v47 = vcvt.f32.s32 %v1715_v53  ;;  %v1701_v21 = vcvt.f32.s32 %v1700_v2  ;;  %vm2085_vm11 = vcmp.eq.s32.totalorder %v7234_v36, %v5176_v54  ;;  %vm2084_vm12 = vcmp.eq.s32.totalorder %v7234_v36, %v5178_v50 }
 0x394   : > { %v5193_v57 = vsel %vm2085_vm11, -inf, %v7246_v33  ;;  %v5196_v19 = vsel %vm2084_vm12, -inf, %v7247_v49  ;;  %v1778_v2 = vshll.u32 %v1777_v13, 16  ;;  %v7255_v49 = vld [vmem:[#allocation11_spill] sm:$0xff] }
 0x395   : > { %v5188_v31 = vadd.s32 %v1718_v38, %v1716_v47  ;;  %v5190_v34 = vadd.s32 %v1703_v28, %v1701_v21  ;;  %v2159_v58 = vsel %vm762_vm1, %v5193_v57, -inf  ;;  %v2156_v20 = vsel %vm762_vm1, %v5196_v19, -inf  ;;  %v7254_v21 = vld [vmem:[#allocation10_spill] sm:$0xff] }
 0x396   : > { %v1745_v37 = vpop.xlane.xlu1 %1744  ;;  %v1730_v7 = vpop.xlane.xlu0 %1729  ;;  %2160 = vmax.xlane.f32.xlu1 %v2159_v58  ;;  %2157 = vmax.xlane.f32.xlu0 %v2156_v20  ;;  %v1763_v38 = vshll.u32 %v1762_v12, 16  ;;  %v1793_v58 = vshll.u32 %v1792_v59, 16  ;;  %v1837_v12 = vcvt.f32.s32 %v5046_v24  ;;  %v7258_v59 = vld [vmem:[#allocation12_spill] sm:$0xff]  ;;  %v7259_v24 = vld [vmem:[#allocation13_spill] sm:$0xff] }
 0x397   : > { %7244 = vst [vmem:[#allocation71_spill] sm:$0xff] %v5188_v31  ;;  %7245 = vst [vmem:[#allocation74_spill] sm:$0xff] %v5190_v34  ;;  %v1746_v39 = vcvt.f32.s32 %v1745_v37  ;;  %v1731_v17 = vcvt.f32.s32 %v1730_v7  ;;  %vm2087_vm13 = vcmp.eq.s32.totalorder %v7234_v36, %v5188_v31  ;;  %vm2086_vm14 = vcmp.eq.s32.totalorder %v7234_v36, %v5190_v34 }
 0x398   : > { %v5213_v6 = vsel %vm2087_vm13, -inf, %v7250_v51  ;;  %v5216_v14 = vsel %vm2086_vm14, -inf, %v7251_v22 }
 0x399   : > { %v5208_v45 = vadd.s32 %v1748_v3, %v1746_v39  ;;  %v5210_v25 = vadd.s32 %v1733_v41, %v1731_v17  ;;  %v2165_v52 = vsel %vm762_vm1, %v5213_v6, -inf  ;;  %v2162_v61 = vsel %vm762_vm1, %v5216_v14, -inf }
 0x39a   : > { %v1775_v15 = vpop.xlane.xlu1 %1774  ;;  %v1760_v53 = vpop.xlane.xlu0 %1759  ;;  %2166 = vmax.xlane.f32.xlu1 %v2165_v52  ;;  %2163 = vmax.xlane.f32.xlu0 %v2162_v61  ;;  %v1808_v41 = vshll.u32 %v1807_v9, 16  ;;  %v1822_v39 = vcvt.f32.s32 %v5048_v60  ;;  %v1867_v60 = vcvt.f32.s32 %v5056_v46  ;;  %v1852_v61 = vcvt.f32.s32 %v5058_v56 }
 0x39b   : > { %7248 = vst [vmem:[#allocation75_spill] sm:$0xff] %v5208_v45  ;;  %7249 = vst [vmem:[#allocation76_spill] sm:$0xff] %v5210_v25  ;;  %v1776_v28 = vcvt.f32.s32 %v1775_v15  ;;  %v1761_v47 = vcvt.f32.s32 %v1760_v53  ;;  %vm2089_vm15 = vcmp.eq.s32.totalorder %v7234_v36, %v5208_v45  ;;  %vm2088_vm0 = vcmp.eq.s32.totalorder %v7234_v36, %v5210_v25 }
 0x39c   : > { %v5233_v33 = vsel %vm2089_vm15, -inf, %v7254_v21  ;;  %v5236_v3 = vsel %vm2088_vm0, -inf, %v7255_v49  ;;  %v1823_v21 = vshll.u32 %v1822_v39, 16 }
 0x39d   : > { %v5228_v35 = vadd.s32 %v1778_v2, %v1776_v28  ;;  %v5230_v42 = vadd.s32 %v1763_v38, %v1761_v47  ;;  %v2171_v37 = vsel %vm762_vm1, %v5233_v33, -inf  ;;  %v2168_v7 = vsel %vm762_vm1, %v5236_v3, -inf }
 0x39e   : > { %v1805_v20 = vpop.xlane.xlu1 %1804  ;;  %v1790_v13 = vpop.xlane.xlu0 %1789  ;;  %2172 = vmax.xlane.f32.xlu1 %v2171_v37  ;;  %2169 = vmax.xlane.f32.xlu0 %v2168_v7  ;;  %v1838_v47 = vshll.u32 %v1837_v12, 16  ;;  %v1853_v12 = vshll.u32 %v1852_v61, 16 }
 0x39f   : > { %7252 = vst [vmem:[#allocation2_spill] sm:$0xff] %v5228_v35  ;;  %7253 = vst [vmem:[#allocation4_spill] sm:$0xff] %v5230_v42  ;;  %v1806_v17 = vcvt.f32.s32 %v1805_v20  ;;  %v1791_v51 = vcvt.f32.s32 %v1790_v13  ;;  %vm2091_vm2 = vcmp.eq.s32.totalorder %v7234_v36, %v5228_v35  ;;  %vm2090_vm3 = vcmp.eq.s32.totalorder %v7234_v36, %v5230_v42  ;;  %v7263_v20 = vld [vmem:[#allocation15_spill] sm:$0xff] }
 0x3a0   : > { %v5253_v52 = vsel %vm2091_vm2, -inf, %v7258_v59  ;;  %v5256_v15 = vsel %vm2090_vm3, -inf, %v7259_v24  ;;  %v1868_v13 = vshll.u32 %v1867_v60, 16  ;;  %v1897_v24 = vcvt.f32.s32 %v5066_v55  ;;  %v7267_v55 = vld [vmem:[#allocation17_spill] sm:$0xff] }
 0x3a1   : > { %v5248_v22 = vadd.s32 %v1808_v41, %v1806_v17  ;;  %v5250_v9 = vadd.s32 %v1793_v58, %v1791_v51  ;;  %v2177_v53 = vsel %vm762_vm1, %v5253_v52, -inf  ;;  %v2174_v38 = vsel %vm762_vm1, %v5256_v15, -inf  ;;  %v7262_v58 = vld [vmem:[#allocation14_spill] sm:$0xff] }
 0x3a2   : > { %v1835_v2 = vpop.xlane.xlu1 %1834  ;;  %v1820_v28 = vpop.xlane.xlu0 %1819  ;;  %2178 = vmax.xlane.f32.xlu1 %v2177_v53  ;;  %2175 = vmax.xlane.f32.xlu0 %v2174_v38  ;;  %v1882_v53 = vcvt.f32.s32 %v5068_v16  ;;  %v1927_v16 = vcvt.f32.s32 %v5076_v62 }
 0x3a3   : > { %7256 = vst [vmem:[#allocation3_spill] sm:$0xff] %v5248_v22  ;;  %7257 = vst [vmem:[#allocation5_spill] sm:$0xff] %v5250_v9  ;;  %v1836_v49 = vcvt.f32.s32 %v1835_v2  ;;  %v1821_v41 = vcvt.f32.s32 %v1820_v28  ;;  %vm2093_vm4 = vcmp.eq.s32.totalorder %v7234_v36, %v5248_v22  ;;  %vm2092_vm5 = vcmp.eq.s32.totalorder %v7234_v36, %v5250_v9  ;;  %v7266_v28 = vld [vmem:[#allocation16_spill] sm:$0xff] }
 0x3a4   : > { %v5273_v37 = vsel %vm2093_vm4, -inf, %v7262_v58  ;;  %v5276_v7 = vsel %vm2092_vm5, -inf, %v7263_v20 }
 0x3a5   : > { %v5268_v46 = vadd.s32 %v1838_v47, %v1836_v49  ;;  %v5270_v56 = vadd.s32 %v1823_v21, %v1821_v41  ;;  %v2183_v39 = vsel %vm762_vm1, %v5273_v37, -inf  ;;  %v2180_v51 = vsel %vm762_vm1, %v5276_v7, -inf }
 0x3a6   : > { %v1865_v17 = vpop.xlane.xlu1 %1864  ;;  %v1850_v59 = vpop.xlane.xlu0 %1849  ;;  %2184 = vmax.xlane.f32.xlu1 %v2183_v39  ;;  %2181 = vmax.xlane.f32.xlu0 %v2180_v51  ;;  %v1912_v49 = vcvt.f32.s32 %v5078_v44  ;;  %v1883_v39 = vshll.u32 %v1882_v53, 16  ;;  %v1928_v53 = vshll.u32 %v1927_v16, 16 }
 0x3a7   : > { %7260 = vst [vmem:[#allocation6_spill] sm:$0xff] %v5268_v46  ;;  %7261 = vst [vmem:[#allocation7_spill] sm:$0xff] %v5270_v56  ;;  %v1866_v2 = vcvt.f32.s32 %v1865_v17  ;;  %v1851_v38 = vcvt.f32.s32 %v1850_v59  ;;  %vm2095_vm6 = vcmp.eq.s32.totalorder %v7234_v36, %v5268_v46  ;;  %vm2094_vm7 = vcmp.eq.s32.totalorder %v7234_v36, %v5270_v56  ;;  %v7270_v59 = vld [vmem:[#allocation18_spill] sm:$0xff] }
 0x3a8   : > { %v5293_v47 = vsel %vm2095_vm6, -inf, %v7266_v28  ;;  %v5296_v21 = vsel %vm2094_vm7, -inf, %v7267_v55  ;;  %v1913_v28 = vshll.u32 %v1912_v49, 16 }
 0x3a9   : > { %v5288_v60 = vadd.s32 %v1868_v13, %v1866_v2  ;;  %v5290_v61 = vadd.s32 %v1853_v12, %v1851_v38  ;;  %v2189_v41 = vsel %vm762_vm1, %v5293_v47, -inf  ;;  %v2186_v20 = vsel %vm762_vm1, %v5296_v21, -inf  ;;  %v7271_v38 = vld [vmem:[#allocation19_spill] sm:$0xff] }
 0x3aa   : > { %v1895_v58 = vpop.xlane.xlu1 %1894  ;;  %v1880_v13 = vpop.xlane.xlu0 %1879  ;;  %v1898_v12 = vshll.u32 %v1897_v24, 16  ;;  %2190 = vmax.xlane.f32.xlu1 %v2189_v41  ;;  %2187 = vmax.xlane.f32.xlu0 %v2186_v20 }
 0x3ab   : > { %7264 = vst [vmem:[#allocation8_spill] sm:$0xff] %v5288_v60  ;;  %7265 = vst [vmem:[#allocation9_spill] sm:$0xff] %v5290_v61  ;;  %v1896_v17 = vcvt.f32.s32 %v1895_v58  ;;  %v1881_v51 = vcvt.f32.s32 %v1880_v13  ;;  %vm2097_vm8 = vcmp.eq.s32.totalorder %v7234_v36, %v5288_v60  ;;  %vm2096_vm9 = vcmp.eq.s32.totalorder %v7234_v36, %v5290_v61 }
 0x3ac   : > { %v5313_v2 = vsel %vm2097_vm8, -inf, %v7270_v59  ;;  %v5316_v24 = vsel %vm2096_vm9, -inf, %v7271_v38  ;;  %v1957_v13 = vcvt.f32.s32 %v5086_v1  ;;  %v7275_v1 = vld [vmem:[#allocation21_spill] sm:$0xff] }
 0x3ad   : > { %v5308_v62 = vadd.s32 %v1898_v12, %v1896_v17  ;;  %v5310_v44 = vadd.s32 %v1883_v39, %v1881_v51  ;;  %v2195_v55 = vsel %vm762_vm1, %v5313_v2, -inf  ;;  %v2192_v58 = vsel %vm762_vm1, %v5316_v24, -inf  ;;  %v7274_v51 = vld [vmem:[#allocation20_spill] sm:$0xff] }
 0x3ae   : > { %v1925_v41 = vpop.xlane.xlu1 %1924  ;;  %v1910_v20 = vpop.xlane.xlu0 %1909  ;;  %v1942_v12 = vcvt.f32.s32 %v5088_v4  ;;  %2196 = vmax.xlane.f32.xlu1 %v2195_v55  ;;  %2193 = vmax.xlane.f32.xlu0 %v2192_v58  ;;  %v1987_v4 = vcvt.f32.s32 %v5096_v11  ;;  %v1972_v55 = vcvt.f32.s32 %v5098_v0 }
 0x3af   : > { %7268 = vst [vmem:[#allocation10_spill] sm:$0xff] %v5308_v62  ;;  %7269 = vst [vmem:[#allocation11_spill] sm:$0xff] %v5310_v44  ;;  %v1926_v39 = vcvt.f32.s32 %v1925_v41  ;;  %v1911_v17 = vcvt.f32.s32 %v1910_v20  ;;  %vm2099_vm10 = vcmp.eq.s32.totalorder %v7234_v36, %v5308_v62  ;;  %vm2098_vm11 = vcmp.eq.s32.totalorder %v7234_v36, %v5310_v44  ;;  %v7279_v62 = vld [vmem:[#allocation23_spill] sm:$0xff] }
 0x3b0   : > { %v5333_v59 = vsel %vm2099_vm10, -inf, %v7274_v51  ;;  %v5336_v38 = vsel %vm2098_vm11, -inf, %v7275_v1  ;;  %v7278_v1 = vld [vmem:[#allocation22_spill] sm:$0xff] }
 0x3b1   : > { %v5328_v16 = vadd.s32 %v1928_v53, %v1926_v39  ;;  %v5330_v49 = vadd.s32 %v1913_v28, %v1911_v17  ;;  %v2201_v41 = vsel %vm762_vm1, %v5333_v59, -inf  ;;  %v2198_v53 = vsel %vm762_vm1, %v5336_v38, -inf }
 0x3b2   : > { %v1955_v58 = vpop.xlane.xlu1 %1954  ;;  %v1940_v20 = vpop.xlane.xlu0 %1939  ;;  %v1958_v28 = vshll.u32 %v1957_v13, 16  ;;  %v1943_v39 = vshll.u32 %v1942_v12, 16  ;;  %2202 = vmax.xlane.f32.xlu1 %v2201_v41  ;;  %2199 = vmax.xlane.f32.xlu0 %v2198_v53  ;;  %v1988_v12 = vshll.u32 %v1987_v4, 16  ;;  %v1973_v41 = vshll.u32 %v1972_v55, 16  ;;  %v7282_v55 = vld [vmem:[#allocation24_spill] sm:$0xff] }
 0x3b3   : > { %7272 = vst [vmem:[#allocation12_spill] sm:$0xff] %v5328_v16  ;;  %7273 = vst [vmem:[#allocation13_spill] sm:$0xff] %v5330_v49  ;;  %v1956_v17 = vcvt.f32.s32 %v1955_v58  ;;  %v1941_v51 = vcvt.f32.s32 %v1940_v20  ;;  %vm2101_vm12 = vcmp.eq.s32.totalorder %v7234_v36, %v5328_v16  ;;  %vm2100_vm13 = vcmp.eq.s32.totalorder %v7234_v36, %v5330_v49 }
 0x3b4   : > { %v5353_v44 = vsel %vm2101_vm12, -inf, %v7278_v1  ;;  %v5356_v13 = vsel %vm2100_vm13, -inf, %v7279_v62 }
 0x3b5   : > { %v5348_v11 = vadd.s32 %v1958_v28, %v1956_v17  ;;  %v5350_v0 = vadd.s32 %v1943_v39, %v1941_v51  ;;  %v2207_v58 = vsel %vm762_vm1, %v5353_v44, -inf  ;;  %v2204_v20 = vsel %vm762_vm1, %v5356_v13, -inf }
 0x3b6   : > { %v1985_v53 = vpop.xlane.xlu1 %1984  ;;  %v1970_v49 = vpop.xlane.xlu0 %1969  ;;  %v2017_v28 = vcvt.f32.s32 %v5106_v5  ;;  %v2002_v39 = vcvt.f32.s32 %v5108_v29  ;;  %2208 = vmax.xlane.f32.xlu1 %v2207_v58  ;;  %2205 = vmax.xlane.f32.xlu0 %v2204_v20  ;;  %v7283_v5 = vld [vmem:[#allocation25_spill] sm:$0xff]  ;;  %v2047_v29 = vcvt.f32.s32 %v5116_v30 }
 0x3b7   : > { %7276 = vst [vmem:[#allocation14_spill] sm:$0xff] %v5348_v11  ;;  %7277 = vst [vmem:[#allocation15_spill] sm:$0xff] %v5350_v0  ;;  %v1986_v17 = vcvt.f32.s32 %v1985_v53  ;;  %v1971_v51 = vcvt.f32.s32 %v1970_v49  ;;  %vm2103_vm14 = vcmp.eq.s32.totalorder %v7234_v36, %v5348_v11  ;;  %vm2102_vm15 = vcmp.eq.s32.totalorder %v7234_v36, %v5350_v0  ;;  %v7287_v11 = vld [vmem:[#allocation27_spill] sm:$0xff] }
 0x3b8   : > { %v5373_v1 = vsel %vm2103_vm14, -inf, %v7282_v55  ;;  %v5376_v16 = vsel %vm2102_vm15, -inf, %v7283_v5  ;;  %v2032_v49 = vcvt.f32.s32 %v5118_v32  ;;  %v7286_v5 = vld [vmem:[#allocation26_spill] sm:$0xff] }
 0x3b9   : > { %v5368_v62 = vadd.s32 %v1988_v12, %v1986_v17  ;;  %v5370_v4 = vadd.s32 %v1973_v41, %v1971_v51  ;;  %v2213_v58 = vsel %vm762_vm1, %v5373_v1, -inf  ;;  %v2210_v12 = vsel %vm762_vm1, %v5376_v16, -inf }
 0x3ba   : > { %v2015_v53 = vpop.xlane.xlu1 %2014  ;;  %v2000_v20 = vpop.xlane.xlu0 %1999  ;;  %v2018_v41 = vshll.u32 %v2017_v28, 16  ;;  %v2003_v17 = vshll.u32 %v2002_v39, 16  ;;  %2214 = vmax.xlane.f32.xlu1 %v2213_v58  ;;  %2211 = vmax.xlane.f32.xlu0 %v2210_v12  ;;  %v2048_v39 = vshll.u32 %v2047_v29, 16  ;;  %v2033_v58 = vshll.u32 %v2032_v49, 16  ;;  %v7290_v49 = vld [vmem:[#allocation28_spill] sm:$0xff] }
 0x3bb   : > { %7280 = vst [vmem:[#allocation16_spill] sm:$0xff] %v5368_v62  ;;  %7281 = vst [vmem:[#allocation17_spill] sm:$0xff] %v5370_v4  ;;  %v2016_v51 = vcvt.f32.s32 %v2015_v53  ;;  %v2001_v55 = vcvt.f32.s32 %v2000_v20  ;;  %vm2105_vm0 = vcmp.eq.s32.totalorder %v7234_v36, %v5368_v62  ;;  %vm2104_vm2 = vcmp.eq.s32.totalorder %v7234_v36, %v5370_v4 }
 0x3bc   : > { %v5393_v0 = vsel %vm2105_vm0, -inf, %v7286_v5  ;;  %v5396_v28 = vsel %vm2104_vm2, -inf, %v7287_v11 }
 0x3bd   : > { %v5388_v30 = vadd.s32 %v2018_v41, %v2016_v51  ;;  %v5390_v32 = vadd.s32 %v2003_v17, %v2001_v55  ;;  %v2219_v53 = vsel %vm762_vm1, %v5393_v0, -inf  ;;  %v2216_v20 = vsel %vm762_vm1, %v5396_v28, -inf }
 0x3be   : > { %v2045_v12 = vpop.xlane.xlu1 %2044  ;;  %v2030_v4 = vpop.xlane.xlu0 %2029  ;;  %v2077_v41 = vcvt.f32.s32 %v5126_v10  ;;  %v2062_v17 = vcvt.f32.s32 %v5128_v48  ;;  %2220 = vmax.xlane.f32.xlu1 %v2219_v53  ;;  %2217 = vmax.xlane.f32.xlu0 %v2216_v20  ;;  %v7291_v10 = vld [vmem:[#allocation29_spill] sm:$0xff] }
 0x3bf   : > { %7284 = vst [vmem:[#allocation18_spill] sm:$0xff] %v5388_v30  ;;  %7285 = vst [vmem:[#allocation19_spill] sm:$0xff] %v5390_v32  ;;  %v2046_v51 = vcvt.f32.s32 %v2045_v12  ;;  %v2031_v55 = vcvt.f32.s32 %v2030_v4  ;;  %vm2107_vm3 = vcmp.eq.s32.totalorder %v7234_v36, %v5388_v30  ;;  %vm2106_vm4 = vcmp.eq.s32.totalorder %v7234_v36, %v5390_v32  ;;  %v7295_v30 = vld [vmem:[#allocation31_spill] sm:$0xff] }
 0x3c0   : > { %v5413_v5 = vsel %vm2107_vm3, -inf, %v7290_v49  ;;  %v5416_v62 = vsel %vm2106_vm4, -inf, %v7291_v10  ;;  %v2078_v20 = vshll.u32 %v2077_v41, 16  ;;  %v2063_v32 = vshll.u32 %v2062_v17, 16  ;;  %v7294_v49 = vld [vmem:[#allocation30_spill] sm:$0xff] }
 0x3c1   : > { %v5408_v11 = vadd.s32 %v2048_v39, %v2046_v51  ;;  %v5410_v29 = vadd.s32 %v2033_v58, %v2031_v55  ;;  %v2225_v48 = vsel %vm762_vm1, %v5413_v5, -inf  ;;  %v2222_v53 = vsel %vm762_vm1, %v5416_v62, -inf }
 0x3c2   : > { %v2075_v4 = vpop.xlane.xlu1 %2074  ;;  %v2060_v12 = vpop.xlane.xlu0 %2059  ;;  %2226 = vmax.xlane.f32.xlu1 %v2225_v48  ;;  %2223 = vmax.xlane.f32.xlu0 %v2222_v53  ;;  %v7297_v53 = vld [vmem:[#allocation33_spill] sm:$0xff] }
 0x3c3   : > { %7288 = vst [vmem:[#allocation20_spill] sm:$0xff] %v5408_v11  ;;  %7289 = vst [vmem:[#allocation21_spill] sm:$0xff] %v5410_v29  ;;  %v2076_v39 = vcvt.f32.s32 %v2075_v4  ;;  %v2061_v58 = vcvt.f32.s32 %v2060_v12  ;;  %vm2109_vm5 = vcmp.eq.s32.totalorder %v7234_v36, %v5408_v11  ;;  %vm2108_vm6 = vcmp.eq.s32.totalorder %v7234_v36, %v5410_v29 }
 0x3c4   : > { %v5431_v10 = vsel %vm2109_vm5, -inf, %v7294_v49  ;;  %v5434_v41 = vsel %vm2108_vm6, -inf, %v7295_v30 }
 0x3c5   : > { %v5426_v51 = vadd.s32 %v2078_v20, %v2076_v39  ;;  %v5428_v55 = vadd.s32 %v2063_v32, %v2061_v58  ;;  %v2231_v17 = vsel %vm762_vm1, %v5431_v10, -inf  ;;  %v2228_v48 = vsel %vm762_vm1, %v5434_v41, -inf  ;;  %v7296_v32 = vld [vmem:[#allocation32_spill] sm:$0xff] }
 0x3c6   : > { %2232 = vmax.xlane.f32.xlu1 %v2231_v17  ;;  %2229 = vmax.xlane.f32.xlu0 %v2228_v48 }
 0x3c7   : > { %7292 = vst [vmem:[#allocation22_spill] sm:$0xff] %v5426_v51  ;;  %7293 = vst [vmem:[#allocation23_spill] sm:$0xff] %v5428_v55  ;;  %vm2111_vm7 = vcmp.eq.s32.totalorder %v7234_v36, %v5426_v51  ;;  %vm2110_vm8 = vcmp.eq.s32.totalorder %v7234_v36, %v5428_v55 }
 0x3c8   : > { %v5445_v4 = vsel %vm2111_vm7, -inf, %v7296_v32  ;;  %v5448_v30 = vsel %vm2110_vm8, -inf, %v7297_v53 }
 0x3c9   : > { %v2237_v12 = vsel %vm762_vm1, %v5445_v4, -inf  ;;  %v2234_v20 = vsel %vm762_vm1, %v5448_v30, -inf }
 0x3ca   : > { %2238 = vmax.xlane.f32.xlu1 %v2237_v12  ;;  %2235 = vmax.xlane.f32.xlu0 %v2234_v20 }
 0x417   : > { %v5454_v39 = vpop.xlane.xlu1 %2148 }
 0x418   : > { %7298 = vst [vmem:[#allocation24_spill] sm:$0xff] %v5454_v39  ;;  %vm2241_vm9 = vcmp.eq.f32.partialorder %v5143_v40, %v5454_v39 }
 0x419   : > { %v2273_v58 = vsel %vm2241_vm9, %v7234_v36, 8 }
 0x41a   : > { %v5460_v49 = vsel %vm762_vm1, %v2273_v58, 2147483647 }
 0x41b   : > { %v5462_v17 = vpop.xlane.xlu1 %2154  ;;  %v2321_v48 = vshra.s32 %v5460_v49, 16  ;;  %v5467_v32 = vpop.xlane.xlu0 %2145 }
 0x41c   : > { %7299 = vst [vmem:[#allocation25_spill] sm:$0xff] %v5462_v17  ;;  %vm2243_vm10 = vcmp.eq.f32.partialorder %v5156_v23, %v5462_v17  ;;  %7300 = vst [vmem:[#allocation26_spill] sm:$0xff] %v5467_v32  ;;  %vm2240_vm11 = vcmp.eq.f32.partialorder %v5165_v26, %v5467_v32 }
 0x41d   : > { %v2275_v53 = vsel %vm2243_vm10, %v7234_v36, 8  ;;  %v5472_v40 = vcvt.s32.f32 %v2321_v48  ;;  %v2272_v20 = vsel %vm2240_vm11, %v7234_v36, 8 }
 0x41e   : > { %v5475_v12 = vsel %vm762_vm1, %v2275_v53, 2147483647  ;;  %v5479_v58 = vsel %vm762_vm1, %v2272_v20, 2147483647 }
 0x41f   : > { %2324 = vmin.xlane.f32.xlu1 %v5472_v40  ;;  %v2351_v23 = vshra.s32 %v5475_v12, 16  ;;  %v5483_v55 = vpop.xlane.xlu0 %2151  ;;  %v2306_v51 = vshra.s32 %v5479_v58, 16 }
 0x420   : > { %7301 = vst [vmem:[#allocation27_spill] sm:$0xff] %v5483_v55  ;;  %vm2242_vm12 = vcmp.eq.f32.partialorder %v5174_v18, %v5483_v55 }
 0x421   : > { %v5488_v26 = vcvt.s32.f32 %v2351_v23  ;;  %v2274_v48 = vsel %vm2242_vm12, %v7234_v36, 8  ;;  %v5491_v53 = vcvt.s32.f32 %v2306_v51 }
 0x422   : > { %v5494_v20 = vsel %vm762_vm1, %v2274_v48, 2147483647 }
 0x423   : > { %2354 = vmin.xlane.f32.xlu1 %v5488_v26  ;;  %v5497_v29 = vpop.xlane.xlu1 %2160  ;;  %2309 = vmin.xlane.f32.xlu0 %v5491_v53  ;;  %v5500_v11 = vpop.xlane.xlu0 %2157  ;;  %v2336_v61 = vshra.s32 %v5494_v20, 16 }
 0x424   : > { %7302 = vst [vmem:[#allocation28_spill] sm:$0xff] %v5497_v29  ;;  %7303 = vst [vmem:[#allocation29_spill] sm:$0xff] %v5500_v11  ;;  %vm2245_vm13 = vcmp.eq.f32.partialorder %v5193_v57, %v5497_v29  ;;  %vm2244_vm14 = vcmp.eq.f32.partialorder %v5196_v19, %v5500_v11 }
 0x425   : > { %v2277_v18 = vsel %vm2245_vm13, %v7234_v36, 8  ;;  %v2276_v51 = vsel %vm2244_vm14, %v7234_v36, 8  ;;  %v5509_v23 = vcvt.s32.f32 %v2336_v61 }
 0x426   : > { %v5512_v48 = vsel %vm762_vm1, %v2277_v18, 2147483647  ;;  %v5515_v60 = vsel %vm762_vm1, %v2276_v51, 2147483647 }
 0x427   : > { %v5517_v56 = vpop.xlane.xlu1 %2166  ;;  %2339 = vmin.xlane.f32.xlu0 %v5509_v23  ;;  %v5520_v57 = vpop.xlane.xlu0 %2163  ;;  %v2381_v19 = vshra.s32 %v5512_v48, 16  ;;  %v2366_v46 = vshra.s32 %v5515_v60, 16 }
 0x428   : > { %7304 = vst [vmem:[#allocation30_spill] sm:$0xff] %v5517_v56  ;;  %7305 = vst [vmem:[#allocation31_spill] sm:$0xff] %v5520_v57  ;;  %vm2247_vm15 = vcmp.eq.f32.partialorder %v5213_v6, %v5517_v56  ;;  %vm2246_vm0 = vcmp.eq.f32.partialorder %v5216_v14, %v5520_v57 }
 0x429   : > { %v2279_v61 = vsel %vm2247_vm15, %v7234_v36, 8  ;;  %v2278_v18 = vsel %vm2246_vm0, %v7234_v36, 8  ;;  %v5536_v22 = vcvt.s32.f32 %v2381_v19  ;;  %v5540_v42 = vcvt.s32.f32 %v2366_v46 }
 0x42a   : > { %v5531_v51 = vsel %vm762_vm1, %v2279_v61, 2147483647  ;;  %v5534_v9 = vsel %vm762_vm1, %v2278_v18, 2147483647 }
 0x42b   : > { %v5538_v11 = vpop.xlane.xlu1 %2172  ;;  %v5542_v6 = vpop.xlane.xlu0 %2169  ;;  %v2411_v14 = vshra.s32 %v5531_v51, 16  ;;  %v2396_v57 = vshra.s32 %v5534_v9, 16  ;;  %2384 = vmin.xlane.f32.xlu1 %v5536_v22  ;;  %2369 = vmin.xlane.f32.xlu0 %v5540_v42 }
 0x42c   : > { %7306 = vst [vmem:[#allocation32_spill] sm:$0xff] %v5538_v11  ;;  %7307 = vst [vmem:[#allocation33_spill] sm:$0xff] %v5542_v6  ;;  %vm2249_vm2 = vcmp.eq.f32.partialorder %v5233_v33, %v5538_v11  ;;  %vm2248_vm3 = vcmp.eq.f32.partialorder %v5236_v3, %v5542_v6 }
 0x42d   : > { %v2281_v19 = vsel %vm2249_vm2, %v7234_v36, 8  ;;  %v2280_v46 = vsel %vm2248_vm3, %v7234_v36, 8  ;;  %v5560_v56 = vcvt.s32.f32 %v2411_v14  ;;  %v5564_v33 = vcvt.s32.f32 %v2396_v57 }
 0x42e   : > { %v5555_v61 = vsel %vm762_vm1, %v2281_v19, 2147483647  ;;  %v5558_v18 = vsel %vm762_vm1, %v2280_v46, 2147483647 }
 0x42f   : > { %v5562_v29 = vpop.xlane.xlu1 %2178  ;;  %v5566_v11 = vpop.xlane.xlu0 %2175  ;;  %v2441_v3 = vshra.s32 %v5555_v61, 16  ;;  %v2426_v6 = vshra.s32 %v5558_v18, 16  ;;  %2414 = vmin.xlane.f32.xlu1 %v5560_v56  ;;  %2399 = vmin.xlane.f32.xlu0 %v5564_v33 }
 0x430   : > { %7308 = vst [vmem:[#allocation77_spill] sm:$0xff] %v5562_v29  ;;  %7309 = vst [vmem:[#allocation78_spill] sm:$0xff] %v5566_v11  ;;  %vm2251_vm4 = vcmp.eq.f32.partialorder %v5253_v52, %v5562_v29  ;;  %vm2250_vm5 = vcmp.eq.f32.partialorder %v5256_v15, %v5566_v11 }
 0x431   : > { %v2283_v14 = vsel %vm2251_vm4, %v7234_v36, 8  ;;  %v2282_v57 = vsel %vm2250_vm5, %v7234_v36, 8  ;;  %v5584_v35 = vcvt.s32.f32 %v2441_v3  ;;  %v5588_v52 = vcvt.s32.f32 %v2426_v6 }
 0x432   : > { %v5579_v19 = vsel %vm762_vm1, %v2283_v14, 2147483647  ;;  %v5582_v46 = vsel %vm762_vm1, %v2282_v57, 2147483647 }
 0x433   : > { %v5586_v55 = vpop.xlane.xlu1 %2184  ;;  %v5590_v29 = vpop.xlane.xlu0 %2181  ;;  %v2471_v15 = vshra.s32 %v5579_v19, 16  ;;  %v2456_v11 = vshra.s32 %v5582_v46, 16  ;;  %2444 = vmin.xlane.f32.xlu1 %v5584_v35  ;;  %2429 = vmin.xlane.f32.xlu0 %v5588_v52 }
 0x434   : > { %7310 = vst [vmem:[#allocation79_spill] sm:$0xff] %v5586_v55  ;;  %7311 = vst [vmem:[#allocation80_spill] sm:$0xff] %v5590_v29  ;;  %vm2253_vm6 = vcmp.eq.f32.partialorder %v5273_v37, %v5586_v55  ;;  %vm2252_vm7 = vcmp.eq.f32.partialorder %v5276_v7, %v5590_v29 }
 0x435   : > { %v2285_v3 = vsel %vm2253_vm6, %v7234_v36, 8  ;;  %v2284_v6 = vsel %vm2252_vm7, %v7234_v36, 8  ;;  %v5608_v25 = vcvt.s32.f32 %v2471_v15  ;;  %v5612_v37 = vcvt.s32.f32 %v2456_v11 }
 0x436   : > { %v5603_v14 = vsel %vm762_vm1, %v2285_v3, 2147483647  ;;  %v5606_v57 = vsel %vm762_vm1, %v2284_v6, 2147483647 }
 0x437   : > { %v5610_v45 = vpop.xlane.xlu1 %2190  ;;  %v5614_v55 = vpop.xlane.xlu0 %2187  ;;  %v2501_v7 = vshra.s32 %v5603_v14, 16  ;;  %v2486_v29 = vshra.s32 %v5606_v57, 16  ;;  %2474 = vmin.xlane.f32.xlu1 %v5608_v25  ;;  %2459 = vmin.xlane.f32.xlu0 %v5612_v37 }
 0x438   : > { %7312 = vst [vmem:[#allocation81_spill] sm:$0xff] %v5610_v45  ;;  %7313 = vst [vmem:[#allocation82_spill] sm:$0xff] %v5614_v55  ;;  %vm2255_vm8 = vcmp.eq.f32.partialorder %v5293_v47, %v5610_v45  ;;  %vm2254_vm9 = vcmp.eq.f32.partialorder %v5296_v21, %v5614_v55 }
 0x439   : > { %v2287_v15 = vsel %vm2255_vm8, %v7234_v36, 8  ;;  %v2286_v11 = vsel %vm2254_vm9, %v7234_v36, 8  ;;  %v5632_v32 = vcvt.s32.f32 %v2501_v7  ;;  %v5636_v47 = vcvt.s32.f32 %v2486_v29 }
 0x43a   : > { %v5627_v3 = vsel %vm762_vm1, %v2287_v15, 2147483647  ;;  %v5630_v6 = vsel %vm762_vm1, %v2286_v11, 2147483647 }
 0x43b   : > { %v5634_v34 = vpop.xlane.xlu1 %2196  ;;  %v5638_v45 = vpop.xlane.xlu0 %2193  ;;  %v2531_v21 = vshra.s32 %v5627_v3, 16  ;;  %v2516_v55 = vshra.s32 %v5630_v6, 16  ;;  %2504 = vmin.xlane.f32.xlu1 %v5632_v32  ;;  %2489 = vmin.xlane.f32.xlu0 %v5636_v47 }
 0x43c   : > { %7314 = vst [vmem:[#allocation83_spill] sm:$0xff] %v5634_v34  ;;  %7315 = vst [vmem:[#allocation84_spill] sm:$0xff] %v5638_v45  ;;  %vm2257_vm10 = vcmp.eq.f32.partialorder %v5313_v2, %v5634_v34  ;;  %vm2256_vm11 = vcmp.eq.f32.partialorder %v5316_v24, %v5638_v45 }
 0x43d   : > { %v2289_v7 = vsel %vm2257_vm10, %v7234_v36, 8  ;;  %v2288_v29 = vsel %vm2256_vm11, %v7234_v36, 8  ;;  %v5656_v17 = vcvt.s32.f32 %v2531_v21  ;;  %v5660_v2 = vcvt.s32.f32 %v2516_v55 }
 0x43e   : > { %v5651_v15 = vsel %vm762_vm1, %v2289_v7, 2147483647  ;;  %v5654_v11 = vsel %vm762_vm1, %v2288_v29, 2147483647 }
 0x43f   : > { %v5658_v31 = vpop.xlane.xlu1 %2202  ;;  %v5662_v34 = vpop.xlane.xlu0 %2199  ;;  %v2561_v24 = vshra.s32 %v5651_v15, 16  ;;  %v2546_v45 = vshra.s32 %v5654_v11, 16  ;;  %2534 = vmin.xlane.f32.xlu1 %v5656_v17  ;;  %2519 = vmin.xlane.f32.xlu0 %v5660_v2 }
 0x440   : > { %7316 = vst [vmem:[#allocation85_spill] sm:$0xff] %v5658_v31  ;;  %7317 = vst [vmem:[#allocation86_spill] sm:$0xff] %v5662_v34  ;;  %vm2259_vm12 = vcmp.eq.f32.partialorder %v5333_v59, %v5658_v31  ;;  %vm2258_vm13 = vcmp.eq.f32.partialorder %v5336_v38, %v5662_v34 }
 0x441   : > { %v2291_v21 = vsel %vm2259_vm12, %v7234_v36, 8  ;;  %v2290_v55 = vsel %vm2258_vm13, %v7234_v36, 8  ;;  %v5680_v39 = vcvt.s32.f32 %v2561_v24  ;;  %v5684_v59 = vcvt.s32.f32 %v2546_v45 }
 0x442   : > { %v5675_v7 = vsel %vm762_vm1, %v2291_v21, 2147483647  ;;  %v5678_v29 = vsel %vm762_vm1, %v2290_v55, 2147483647 }
 0x443   : > { %v5682_v50 = vpop.xlane.xlu1 %2208  ;;  %v5686_v31 = vpop.xlane.xlu0 %2205  ;;  %v2591_v38 = vshra.s32 %v5675_v7, 16  ;;  %v2576_v34 = vshra.s32 %v5678_v29, 16  ;;  %2564 = vmin.xlane.f32.xlu1 %v5680_v39  ;;  %2549 = vmin.xlane.f32.xlu0 %v5684_v59 }
 0x444   : > { %7318 = vst [vmem:[#allocation87_spill] sm:$0xff] %v5682_v50  ;;  %7319 = vst [vmem:[#allocation88_spill] sm:$0xff] %v5686_v31  ;;  %vm2261_vm14 = vcmp.eq.f32.partialorder %v5353_v44, %v5682_v50  ;;  %vm2260_vm15 = vcmp.eq.f32.partialorder %v5356_v13, %v5686_v31 }
 0x445   : > { %v2293_v24 = vsel %vm2261_vm14, %v7234_v36, 8  ;;  %v2292_v45 = vsel %vm2260_vm15, %v7234_v36, 8  ;;  %v5704_v54 = vcvt.s32.f32 %v2591_v38  ;;  %v5708_v44 = vcvt.s32.f32 %v2576_v34 }
 0x446   : > { %v5699_v21 = vsel %vm762_vm1, %v2293_v24, 2147483647  ;;  %v5702_v55 = vsel %vm762_vm1, %v2292_v45, 2147483647 }
 0x447   : > { %v5706_v8 = vpop.xlane.xlu1 %2214  ;;  %v5710_v50 = vpop.xlane.xlu0 %2211  ;;  %v2621_v13 = vshra.s32 %v5699_v21, 16  ;;  %v2606_v31 = vshra.s32 %v5702_v55, 16  ;;  %2594 = vmin.xlane.f32.xlu1 %v5704_v54  ;;  %2579 = vmin.xlane.f32.xlu0 %v5708_v44 }
 0x448   : > { %7320 = vst [vmem:[#allocation89_spill] sm:$0xff] %v5706_v8  ;;  %7321 = vst [vmem:[#allocation90_spill] sm:$0xff] %v5710_v50  ;;  %vm2263_vm0 = vcmp.eq.f32.partialorder %v5373_v1, %v5706_v8  ;;  %vm2262_vm2 = vcmp.eq.f32.partialorder %v5376_v16, %v5710_v50 }
 0x449   : > { %v2295_v38 = vsel %vm2263_vm0, %v7234_v36, 8  ;;  %v2294_v34 = vsel %vm2262_vm2, %v7234_v36, 8  ;;  %v5728_v63 = vcvt.s32.f32 %v2621_v13  ;;  %v5732_v1 = vcvt.s32.f32 %v2606_v31 }
 0x44a   : > { %v5723_v24 = vsel %vm762_vm1, %v2295_v38, 2147483647  ;;  %v5726_v45 = vsel %vm762_vm1, %v2294_v34, 2147483647 }
 0x44b   : > { %7322 = vst [vmem:[#allocation91_spill] sm:$0xff] %v5726_v45  ;;  %v5730_v43 = vpop.xlane.xlu1 %2220  ;;  %v5734_v8 = vpop.xlane.xlu0 %2217  ;;  %v2651_v16 = vshra.s32 %v5723_v24, 16  ;;  %v2636_v50 = vshra.s32 %v5726_v45, 16  ;;  %2624 = vmin.xlane.f32.xlu1 %v5728_v63  ;;  %2609 = vmin.xlane.f32.xlu0 %v5732_v1 }
 0x44c   : > { %7323 = vst [vmem:[#allocation92_spill] sm:$0xff] %v5730_v43  ;;  %7324 = vst [vmem:[#allocation93_spill] sm:$0xff] %v5734_v8  ;;  %vm2265_vm3 = vcmp.eq.f32.partialorder %v5393_v0, %v5730_v43  ;;  %vm2264_vm4 = vcmp.eq.f32.partialorder %v5396_v28, %v5734_v8 }
 0x44d   : > { %v2297_v13 = vsel %vm2265_vm3, %v7234_v36, 8  ;;  %v2296_v31 = vsel %vm2264_vm4, %v7234_v36, 8  ;;  %v5752_v27 = vcvt.s32.f32 %v2651_v16  ;;  %v5756_v0 = vcvt.s32.f32 %v2636_v50 }
 0x44e   : > { %v5747_v38 = vsel %vm762_vm1, %v2297_v13, 2147483647  ;;  %v5750_v34 = vsel %vm762_vm1, %v2296_v31, 2147483647 }
 0x44f   : > { %7325 = vst [vmem:[#allocation94_spill] sm:$0xff] %v5750_v34  ;;  %7326 = vst [vmem:[#allocation95_spill] sm:$0xff] %v5752_v27  ;;  %v5754_v45 = vpop.xlane.xlu1 %2226  ;;  %v5758_v43 = vpop.xlane.xlu0 %2223  ;;  %v2681_v28 = vshra.s32 %v5747_v38, 16  ;;  %v2666_v8 = vshra.s32 %v5750_v34, 16  ;;  %2654 = vmin.xlane.f32.xlu1 %v5752_v27  ;;  %2639 = vmin.xlane.f32.xlu0 %v5756_v0 }
 0x450   : > { %7327 = vst [vmem:[#allocation96_spill] sm:$0xff] %v5754_v45  ;;  %7328 = vst [vmem:[#allocation97_spill] sm:$0xff] %v5758_v43  ;;  %vm2267_vm5 = vcmp.eq.f32.partialorder %v5413_v5, %v5754_v45  ;;  %vm2266_vm6 = vcmp.eq.f32.partialorder %v5416_v62, %v5758_v43 }
 0x451   : > { %v2299_v16 = vsel %vm2267_vm5, %v7234_v36, 8  ;;  %v2298_v50 = vsel %vm2266_vm6, %v7234_v36, 8  ;;  %v5776_v34 = vcvt.s32.f32 %v2681_v28  ;;  %v5780_v5 = vcvt.s32.f32 %v2666_v8 }
 0x452   : > { %v5771_v13 = vsel %vm762_vm1, %v2299_v16, 2147483647  ;;  %v5774_v31 = vsel %vm762_vm1, %v2298_v50, 2147483647 }
 0x453   : > { %7329 = vst [vmem:[#allocation98_spill] sm:$0xff] %v5774_v31  ;;  %7330 = vst [vmem:[#allocation99_spill] sm:$0xff] %v5776_v34  ;;  %v5778_v27 = vpop.xlane.xlu1 %2232  ;;  %v5782_v45 = vpop.xlane.xlu0 %2229  ;;  %v2711_v62 = vshra.s32 %v5771_v13, 16  ;;  %v2696_v43 = vshra.s32 %v5774_v31, 16  ;;  %2684 = vmin.xlane.f32.xlu1 %v5776_v34  ;;  %2669 = vmin.xlane.f32.xlu0 %v5780_v5 }
 0x454   : > { %7331 = vst [vmem:[#allocation100_spill] sm:$0xff] %v5778_v27  ;;  %7332 = vst [vmem:[#allocation101_spill] sm:$0xff] %v5782_v45  ;;  %vm2269_vm7 = vcmp.eq.f32.partialorder %v5431_v10, %v5778_v27  ;;  %vm2268_vm8 = vcmp.eq.f32.partialorder %v5434_v41, %v5782_v45 }
 0x455   : > { %v2301_v28 = vsel %vm2269_vm7, %v7234_v36, 8  ;;  %v2300_v8 = vsel %vm2268_vm8, %v7234_v36, 8  ;;  %v5800_v31 = vcvt.s32.f32 %v2711_v62  ;;  %v5804_v10 = vcvt.s32.f32 %v2696_v43 }
 0x456   : > { %v5795_v16 = vsel %vm762_vm1, %v2301_v28, 2147483647  ;;  %v5798_v50 = vsel %vm762_vm1, %v2300_v8, 2147483647 }
 0x457   : > { %7333 = vst [vmem:[#allocation102_spill] sm:$0xff] %v5798_v50  ;;  %7334 = vst [vmem:[#allocation103_spill] sm:$0xff] %v5800_v31  ;;  %v5802_v34 = vpop.xlane.xlu1 %2238  ;;  %v5806_v27 = vpop.xlane.xlu0 %2235  ;;  %v2741_v41 = vshra.s32 %v5795_v16, 16  ;;  %v2726_v45 = vshra.s32 %v5798_v50, 16  ;;  %2714 = vmin.xlane.f32.xlu1 %v5800_v31  ;;  %2699 = vmin.xlane.f32.xlu0 %v5804_v10 }
 0x458   : > { %7335 = vst [vmem:[#allocation104_spill] sm:$0xff] %v5802_v34  ;;  %7336 = vst [vmem:[#allocation105_spill] sm:$0xff] %v5806_v27  ;;  %vm2271_vm9 = vcmp.eq.f32.partialorder %v5445_v4, %v5802_v34  ;;  %vm2270_vm10 = vcmp.eq.f32.partialorder %v5448_v30, %v5806_v27  ;;  %v2305_v34 = vand.u32 65535, %v5479_v58 }
 0x459   : > { %v2303_v62 = vsel %vm2271_vm9, %v7234_v36, 8  ;;  %v2302_v43 = vsel %vm2270_vm10, %v7234_v36, 8  ;;  %v5824_v50 = vcvt.s32.f32 %v2741_v41  ;;  %v5826_v31 = vcvt.s32.f32 %v2726_v45 }
 0x45a   : > { %v5819_v28 = vsel %vm762_vm1, %v2303_v62, 2147483647  ;;  %v5822_v8 = vsel %vm762_vm1, %v2302_v43, 2147483647  ;;  %v2320_v41 = vand.u32 65535, %v5460_v49  ;;  %v2350_v43 = vand.u32 65535, %v5475_v12 }
 0x45b   : > { %7337 = vst [vmem:[#allocation106_spill] sm:$0xff] %v5826_v31  ;;  %v2771_v4 = vshra.s32 %v5819_v28, 16  ;;  %v2756_v30 = vshra.s32 %v5822_v8, 16  ;;  %2744 = vmin.xlane.f32.xlu1 %v5824_v50  ;;  %2729 = vmin.xlane.f32.xlu0 %v5826_v31  ;;  %v2307_v49 = vcvt.s32.f32 %v2305_v34  ;;  %v2365_v34 = vand.u32 65535, %v5515_v60 }
 0x45c   : > { %v2322_v62 = vcvt.s32.f32 %v2320_v41  ;;  %v2352_v31 = vcvt.s32.f32 %v2350_v43  ;;  %v2335_v41 = vand.u32 65535, %v5494_v20 }
 0x45d   : > { %v5832_v27 = vcvt.s32.f32 %v2771_v4  ;;  %v5834_v36 = vcvt.s32.f32 %v2756_v30 }
 0x45f   : > { %7338 = vst [vmem:[#allocation107_spill] sm:$0xff] %v5834_v36  ;;  %2774 = vmin.xlane.f32.xlu1 %v5832_v27  ;;  %2759 = vmin.xlane.f32.xlu0 %v5834_v36 }
 0x4ac   : > { %v5839_v45 = vpop.xlane.xlu1 %2324 }
 0x4ad   : > { %vm2326_vm1 = vcmp.eq.f32.partialorder %v5472_v40, %v5839_v45 }
 0x4ae   : > { %v2327_v4 = vsel %vm2326_vm1, %v2322_v62, inf  ;;  %v2337_v62 = vcvt.s32.f32 %v2335_v41  ;;  %v2395_v41 = vand.u32 65535, %v5534_v9  ;;  %v2425_v9 = vand.u32 65535, %v5558_v18 }
 0x4af   : > { %2328 = vmin.xlane.f32.xlu1 %v2327_v4  ;;  %v2455_v18 = vand.u32 65535, %v5582_v46  ;;  %v2485_v46 = vand.u32 65535, %v5606_v57  ;;  %v2515_v57 = vand.u32 65535, %v5630_v6  ;;  %v2545_v6 = vand.u32 65535, %v5654_v11 }
 0x4b0   : > { %v5845_v30 = vpop.xlane.xlu1 %2354  ;;  %v5849_v36 = vpop.xlane.xlu0 %2309  ;;  %v2575_v11 = vand.u32 65535, %v5678_v29  ;;  %v2605_v29 = vand.u32 65535, %v5702_v55 }
 0x4b1   : > { %vm2356_vm11 = vcmp.eq.f32.partialorder %v5488_v26, %v5845_v30  ;;  %vm2311_vm12 = vcmp.eq.f32.partialorder %v5491_v53, %v5849_v36  ;;  %v2380_v26 = vand.u32 65535, %v5512_v48  ;;  %v2410_v53 = vand.u32 65535, %v5531_v51 }
 0x4b2   : > { %v2357_v12 = vsel %vm2356_vm11, %v2352_v31, inf  ;;  %v2312_v40 = vsel %vm2311_vm12, %v2307_v49, inf  ;;  %v2367_v49 = vcvt.s32.f32 %v2365_v34  ;;  %v2440_v51 = vand.u32 65535, %v5555_v61 }
 0x4b3   : > { %2358 = vmin.xlane.f32.xlu1 %v2357_v12  ;;  %2313 = vmin.xlane.f32.xlu0 %v2312_v40  ;;  %v2382_v4 = vcvt.s32.f32 %v2380_v26  ;;  %v2412_v12 = vcvt.s32.f32 %v2410_v53  ;;  %v2397_v40 = vcvt.s32.f32 %v2395_v41  ;;  %v2470_v61 = vand.u32 65535, %v5579_v19 }
 0x4b4   : > { %v5854_v58 = vpop.xlane.xlu0 %2339  ;;  %v2427_v34 = vcvt.s32.f32 %v2425_v9  ;;  %v2500_v19 = vand.u32 65535, %v5603_v14  ;;  %v2457_v41 = vcvt.s32.f32 %v2455_v18  ;;  %v2530_v14 = vand.u32 65535, %v5627_v3 }
 0x4b5   : > { %vm2341_vm13 = vcmp.eq.f32.partialorder %v5509_v23, %v5854_v58  ;;  %v2560_v3 = vand.u32 65535, %v5651_v15  ;;  %v2590_v15 = vand.u32 65535, %v5675_v7  ;;  %v2547_v18 = vcvt.s32.f32 %v2545_v6 }
 0x4b6   : > { %v2342_v43 = vsel %vm2341_vm13, %v2337_v62, inf  ;;  %v2620_v7 = vand.u32 65535, %v5699_v21  ;;  %v2650_v21 = vand.u32 65535, %v5723_v24  ;;  %v2680_v24 = vand.u32 65535, %v5747_v38 }
 0x4b7   : > { %2343 = vmin.xlane.f32.xlu0 %v2342_v43  ;;  %v2442_v43 = vcvt.s32.f32 %v2440_v51  ;;  %v2487_v51 = vcvt.s32.f32 %v2485_v46  ;;  %v2710_v38 = vand.u32 65535, %v5771_v13  ;;  %v2740_v13 = vand.u32 65535, %v5795_v16 }
 0x4b8   : > { %v5860_v20 = vpop.xlane.xlu1 %2384  ;;  %v5865_v31 = vpop.xlane.xlu0 %2369  ;;  %v2770_v16 = vand.u32 65535, %v5819_v28 }
 0x4b9   : > { %vm2386_vm14 = vcmp.eq.f32.partialorder %v5536_v22, %v5860_v20  ;;  %vm2371_vm15 = vcmp.eq.f32.partialorder %v5540_v42, %v5865_v31 }
 0x4ba   : > { %v2387_v23 = vsel %vm2386_vm14, %v2382_v4, inf  ;;  %v2372_v60 = vsel %vm2371_vm15, %v2367_v49, inf  ;;  %v2472_v49 = vcvt.s32.f32 %v2470_v61 }
 0x4bb   : > { %2388 = vmin.xlane.f32.xlu1 %v2387_v23  ;;  %2373 = vmin.xlane.f32.xlu0 %v2372_v60 }
 0x4bc   : > { %v5870_v48 = vpop.xlane.xlu1 %2414  ;;  %v5875_v22 = vpop.xlane.xlu0 %2399 }
 0x4bd   : > { %vm2416_vm0 = vcmp.eq.f32.partialorder %v5560_v56, %v5870_v48  ;;  %vm2401_vm2 = vcmp.eq.f32.partialorder %v5564_v33, %v5875_v22 }
 0x4be   : > { %v2417_v42 = vsel %vm2416_vm0, %v2412_v12, inf  ;;  %v2402_v62 = vsel %vm2401_vm2, %v2397_v40, inf  ;;  %v2502_v12 = vcvt.s32.f32 %v2500_v19  ;;  %v2577_v19 = vcvt.s32.f32 %v2575_v11 }
 0x4bf   : > { %2418 = vmin.xlane.f32.xlu1 %v2417_v42  ;;  %2403 = vmin.xlane.f32.xlu0 %v2402_v62  ;;  %v2532_v42 = vcvt.s32.f32 %v2530_v14  ;;  %v2517_v62 = vcvt.s32.f32 %v2515_v57  ;;  %v2652_v57 = vcvt.s32.f32 %v2650_v21 }
 0x4c0   : > { %v5880_v26 = vpop.xlane.xlu1 %2444  ;;  %v5885_v56 = vpop.xlane.xlu0 %2429 }
 0x4c1   : > { %vm2446_vm3 = vcmp.eq.f32.partialorder %v5584_v35, %v5880_v26  ;;  %vm2431_vm4 = vcmp.eq.f32.partialorder %v5588_v52, %v5885_v56 }
 0x4c2   : > { %v2447_v33 = vsel %vm2446_vm3, %v2442_v43, inf  ;;  %v2432_v4 = vsel %vm2431_vm4, %v2427_v34, inf  ;;  %v2562_v34 = vcvt.s32.f32 %v2560_v3 }
 0x4c3   : > { %2448 = vmin.xlane.f32.xlu1 %v2447_v33  ;;  %2433 = vmin.xlane.f32.xlu0 %v2432_v4 }
 0x4c4   : > { %v5890_v53 = vpop.xlane.xlu1 %2474  ;;  %v5895_v35 = vpop.xlane.xlu0 %2459 }
 0x4c5   : > { %vm2476_vm5 = vcmp.eq.f32.partialorder %v5608_v25, %v5890_v53  ;;  %vm2461_vm6 = vcmp.eq.f32.partialorder %v5612_v37, %v5895_v35 }
 0x4c6   : > { %v2477_v52 = vsel %vm2476_vm5, %v2472_v49, inf  ;;  %v2462_v23 = vsel %vm2461_vm6, %v2457_v41, inf  ;;  %v2592_v49 = vcvt.s32.f32 %v2590_v15 }
 0x4c7   : > { %2478 = vmin.xlane.f32.xlu1 %v2477_v52  ;;  %2463 = vmin.xlane.f32.xlu0 %v2462_v23  ;;  %v2622_v52 = vcvt.s32.f32 %v2620_v7  ;;  %v2607_v23 = vcvt.s32.f32 %v2605_v29  ;;  %v7344_v7 = vld [vmem:[#allocation103_spill] sm:$0xff] }
 0x4c8   : > { %v5900_v60 = vpop.xlane.xlu1 %2504  ;;  %v5905_v25 = vpop.xlane.xlu0 %2489 }
 0x4c9   : > { %vm2506_vm7 = vcmp.eq.f32.partialorder %v5632_v32, %v5900_v60  ;;  %vm2491_vm8 = vcmp.eq.f32.partialorder %v5636_v47, %v5905_v25 }
 0x4ca   : > { %v2507_v37 = vsel %vm2506_vm7, %v2502_v12, inf  ;;  %v2492_v40 = vsel %vm2491_vm8, %v2487_v51, inf  ;;  %v7339_v12 = vld [vmem:[#allocation91_spill] sm:$0xff] }
 0x4cb   : > { %2508 = vmin.xlane.f32.xlu1 %v2507_v37  ;;  %2493 = vmin.xlane.f32.xlu0 %v2492_v40  ;;  %v2635_v55 = vand.u32 65535, %v7339_v12  ;;  %v7340_v37 = vld [vmem:[#allocation95_spill] sm:$0xff] }
 0x4cc   : > { %v5910_v9 = vpop.xlane.xlu1 %2534  ;;  %v5915_v32 = vpop.xlane.xlu0 %2519 }
 0x4cd   : > { %vm2536_vm9 = vcmp.eq.f32.partialorder %v5656_v17, %v5910_v9  ;;  %vm2521_vm10 = vcmp.eq.f32.partialorder %v5660_v2, %v5915_v32  ;;  %v2637_v40 = vcvt.s32.f32 %v2635_v55 }
 0x4ce   : > { %v2537_v47 = vsel %vm2536_vm9, %v2532_v42, inf  ;;  %v2522_v43 = vsel %vm2521_vm10, %v2517_v62, inf  ;;  %v7341_v42 = vld [vmem:[#allocation94_spill] sm:$0xff] }
 0x4cf   : > { %2538 = vmin.xlane.f32.xlu1 %v2537_v47  ;;  %2523 = vmin.xlane.f32.xlu0 %v2522_v43  ;;  %v2665_v3 = vand.u32 65535, %v7341_v42  ;;  %v2682_v47 = vcvt.s32.f32 %v2680_v24  ;;  %v7342_v43 = vld [vmem:[#allocation99_spill] sm:$0xff] }
 0x4d0   : > { %v5920_v61 = vpop.xlane.xlu1 %2564  ;;  %v5925_v17 = vpop.xlane.xlu0 %2549 }
 0x4d1   : > { %vm2566_vm1 = vcmp.eq.f32.partialorder %v5680_v39, %v5920_v61  ;;  %vm2551_vm11 = vcmp.eq.f32.partialorder %v5684_v59, %v5925_v17  ;;  %v2667_v15 = vcvt.s32.f32 %v2665_v3  ;;  %v7351_v3 = vld [vmem:[#allocation60_spill] sm:$0xff] }
 0x4d2   : > { %v2567_v2 = vsel %vm2566_vm1, %v2562_v34, inf  ;;  %v2552_v33 = vsel %vm2551_vm11, %v2547_v18, inf  ;;  %v7343_v18 = vld [vmem:[#allocation98_spill] sm:$0xff]  ;;  %vm2785_vm1 = vcmp.eq.s32.totalorder %v7351_v3, 7 }
 0x4d3   : > { %2568 = vmin.xlane.f32.xlu1 %v2567_v2  ;;  %2553 = vmin.xlane.f32.xlu0 %v2552_v33  ;;  %v2695_v11 = vand.u32 65535, %v7343_v18 }
 0x4d4   : > { %v5930_v4 = vpop.xlane.xlu1 %2594  ;;  %v5935_v39 = vpop.xlane.xlu0 %2579 }
 0x4d5   : > { %vm2596_vm12 = vcmp.eq.f32.partialorder %v5704_v54, %v5930_v4  ;;  %vm2581_vm13 = vcmp.eq.f32.partialorder %v5708_v44, %v5935_v39  ;;  %v2697_v29 = vcvt.s32.f32 %v2695_v11  ;;  %v7130_v11 = vmov 1.0  }
 0x4d6   : > { %v2597_v59 = vsel %vm2596_vm12, %v2592_v49, inf  ;;  %v2582_v41 = vsel %vm2581_vm13, %v2577_v19, inf  ;;  %v2712_v49 = vcvt.s32.f32 %v2710_v38  ;;  %v7355_v38 = vld [vmem:[#allocation68_spill] sm:$0xff] }
 0x4d7   : > { %2598 = vmin.xlane.f32.xlu1 %v2597_v59  ;;  %2583 = vmin.xlane.f32.xlu0 %v2582_v41  ;;  %v7345_v59 = vld [vmem:[#allocation102_spill] sm:$0xff] }
 0x4d8   : > { %v5940_v46 = vpop.xlane.xlu1 %2624  ;;  %v5945_v54 = vpop.xlane.xlu0 %2609  ;;  %v2725_v41 = vand.u32 65535, %v7345_v59 }
 0x4d9   : > { %vm2626_vm14 = vcmp.eq.f32.partialorder %v5728_v63, %v5940_v46  ;;  %vm2611_vm15 = vcmp.eq.f32.partialorder %v5732_v1, %v5945_v54 }
 0x4da   : > { %v2627_v44 = vsel %vm2626_vm14, %v2622_v52, inf  ;;  %v2612_v14 = vsel %vm2611_vm15, %v2607_v23, inf  ;;  %v2742_v23 = vcvt.s32.f32 %v2740_v13  ;;  %v2727_v55 = vcvt.s32.f32 %v2725_v41  ;;  %v7361_v13 = vld [vmem:[#allocation25_spill] sm:$0xff]  ;;  %v7362_v41 = vld [vmem:[#allocation74_spill] sm:$0xff] }
 0x4db   : > { %2628 = vmin.xlane.f32.xlu1 %v2627_v44  ;;  %2613 = vmin.xlane.f32.xlu0 %v2612_v14  ;;  %v2755_v44 = vand.u32 65535, %v5822_v8  ;;  %v7347_v14 = vld [vmem:[#allocation106_spill] sm:$0xff]  ;;  %vm2789_vm14 = vcmp.eq.s32.totalorder %v7355_v38, 7 }
 0x4dc   : > { %v5950_v51 = vpop.xlane.xlu1 %2654  ;;  %v5955_v63 = vpop.xlane.xlu0 %2639 }
 0x4dd   : > { %vm2656_vm0 = vcmp.eq.f32.partialorder %v7340_v37, %v5950_v51  ;;  %vm2641_vm2 = vcmp.eq.f32.partialorder %v5756_v0, %v5955_v63  ;;  %v2772_v37 = vcvt.s32.f32 %v2770_v16 }
 0x4de   : > { %v2657_v1 = vsel %vm2656_vm0, %v2652_v57, inf  ;;  %v2642_v62 = vsel %vm2641_vm2, %v2637_v40, inf  ;;  %v7350_v40 = vld [vmem:[#allocation107_spill] sm:$0xff]  ;;  %vm2790_vm2 = vcmp.eq.s32.totalorder %v7362_v41, 7  ;;  %v7380_v41 = vld [vmem:[#allocation30_spill] sm:$0xff] }
 0x4df   : > { %2658 = vmin.xlane.f32.xlu1 %v2657_v1  ;;  %2643 = vmin.xlane.f32.xlu0 %v2642_v62  ;;  %v7352_v1 = vld [vmem:[#allocation61_spill] sm:$0xff] }
 0x4e0   : > { %v5960_v6 = vpop.xlane.xlu1 %2684  ;;  %v5965_v34 = vpop.xlane.xlu0 %2669  ;;  %vm2787_vm11 = vcmp.eq.s32.totalorder %v7352_v1, 7  ;;  %v7353_v62 = vld [vmem:[#allocation65_spill] sm:$0xff] }
 0x4e1   : > { %vm2686_vm3 = vcmp.eq.f32.partialorder %v7342_v43, %v5960_v6  ;;  %vm2671_vm4 = vcmp.eq.f32.partialorder %v5780_v5, %v5965_v34  ;;  %vm2784_vm12 = vcmp.eq.s32.totalorder %v7353_v62, 7  ;;  %v7357_v43 = vld [vmem:[#allocation35_spill] sm:$0xff] }
 0x4e2   : > { %v2687_v0 = vsel %vm2686_vm3, %v2682_v47, inf  ;;  %v2672_v2 = vsel %vm2671_vm4, %v2667_v15, inf  ;;  %v7354_v47 = vld [vmem:[#allocation64_spill] sm:$0xff]  ;;  %v6016_v59 = vsel %vm2784_vm12, 0.0, %v7130_v11 }
 0x4e3   : > { %2688 = vmin.xlane.f32.xlu1 %v2687_v0  ;;  %2673 = vmin.xlane.f32.xlu0 %v2672_v2  ;;  %vm2786_vm13 = vcmp.eq.s32.totalorder %v7354_v47, 7  ;;  %v7358_v15 = vld [vmem:[#allocation24_spill] sm:$0xff]  ;;  %v6007_v0 = vsel %vm2785_vm1, 0.0, %v7130_v11  ;;  %v7359_v2 = vld [vmem:[#allocation71_spill] sm:$0xff] }
 0x4e4   : > { %v5970_v33 = vpop.xlane.xlu1 %2714  ;;  %v5975_v19 = vpop.xlane.xlu0 %2699  ;;  %v2881_v18 = vsub.f32 %v7358_v15, %v7357_v43  ;;  %vm2791_vm0 = vcmp.eq.s32.totalorder %v7359_v2, 7  ;;  %v6022_v16 = vsel %vm2786_vm13, 0.0, %v7130_v11  ;;  %v7373_v43 = vld [vmem:[#allocation28_spill] sm:$0xff] }
 0x4e5   : > { %vm2716_vm5 = vcmp.eq.f32.partialorder %v7344_v7, %v5970_v33  ;;  %vm2701_vm6 = vcmp.eq.f32.partialorder %v5804_v10, %v5975_v19 }
 0x4e6   : > { %v2717_v5 = vsel %vm2716_vm5, %v2712_v49, inf  ;;  %v2702_v52 = vsel %vm2701_vm6, %v2697_v29, inf  ;;  %v7360_v49 = vld [vmem:[#allocation37_spill] sm:$0xff]  ;;  %v6013_v29 = vsel %vm2787_vm11, 0.0, %v7130_v11 }
 0x4e7   : > { %2718 = vmin.xlane.f32.xlu1 %v2717_v5  ;;  %2703 = vmin.xlane.f32.xlu0 %v2702_v52  ;;  %v2883_v7 = vsub.f32 %v7361_v13, %v7360_v49  ;;  %v7363_v5 = vld [vmem:[#allocation36_spill] sm:$0xff]  ;;  %v7364_v52 = vld [vmem:[#allocation26_spill] sm:$0xff]  ;;  %v6038_v49 = vsel %vm2791_vm0, 0.0, %v7130_v11 }
 0x4e8   : > { %v5980_v21 = vpop.xlane.xlu1 %2744  ;;  %v5985_v12 = vpop.xlane.xlu0 %2729  ;;  %7374 = vst [vmem:[#allocation103_spill] sm:$0xff] %v6038_v49  ;;  %v7375_v13 = vld [vmem:[#allocation4_spill] sm:$0xff] }
 0x4e9   : > { %vm2746_vm7 = vcmp.eq.f32.partialorder %v5824_v50, %v5980_v21  ;;  %7346 = vst [vmem:[#allocation91_spill] sm:$0xff] %v5985_v12  ;;  %vm2731_vm8 = vcmp.eq.f32.partialorder %v7347_v14, %v5985_v12  ;;  %v2757_v50 = vcvt.s32.f32 %v2755_v44  ;;  %v7366_v44 = vld [vmem:[#allocation75_spill] sm:$0xff]  ;;  %v7367_v14 = vld [vmem:[#allocation76_spill] sm:$0xff]  ;;  %vm2794_vm6 = vcmp.eq.s32.totalorder %v7375_v13, 7 }
 0x4ea   : > { %v2747_v10 = vsel %vm2746_vm7, %v2742_v23, inf  ;;  %v2732_v57 = vsel %vm2731_vm8, %v2727_v55, inf  ;;  %v2880_v23 = vsub.f32 %v7364_v52, %v7363_v5  ;;  %v6025_v55 = vsel %vm2789_vm14, 0.0, %v7130_v11  ;;  %v7376_v52 = vld [vmem:[#allocation39_spill] sm:$0xff]  ;;  %v7434_v12 = vld [vmem:[#allocation12_spill] sm:$0xff] }
 0x4eb   : > { %2748 = vmin.xlane.f32.xlu1 %v2747_v10  ;;  %2733 = vmin.xlane.f32.xlu0 %v2732_v57  ;;  %7365 = vst [vmem:[#allocation99_spill] sm:$0xff] %v6025_v55  ;;  %vm2793_vm3 = vcmp.eq.s32.totalorder %v7366_v44, 7  ;;  %vm2792_vm4 = vcmp.eq.s32.totalorder %v7367_v14, 7  ;;  %v7368_v10 = vld [vmem:[#allocation38_spill] sm:$0xff]  ;;  %v7369_v57 = vld [vmem:[#allocation27_spill] sm:$0xff]  ;;  %vm2805_vm14 = vcmp.eq.s32.totalorder %v7434_v12, 7 }
 0x4ec   : > { %v5990_v24 = vpop.xlane.xlu1 %2774  ;;  %v5994_v28 = vpop.xlane.xlu0 %2759  ;;  %v2918_v5 = vmul.f32 1.442695, %v2883_v7  ;;  %v7379_v44 = vld [vmem:[#allocation42_spill] sm:$0xff]  ;;  %v7384_v7 = vld [vmem:[#allocation41_spill] sm:$0xff]  ;;  %v7426_v55 = vld [vmem:[#allocation11_spill] sm:$0xff] }
 0x4ed   : > { %7348 = vst [vmem:[#allocation95_spill] sm:$0xff] %v5990_v24  ;;  %vm2776_vm9 = vcmp.eq.f32.partialorder %v5832_v27, %v5990_v24  ;;  %7349 = vst [vmem:[#allocation94_spill] sm:$0xff] %v5994_v28  ;;  %vm2761_vm10 = vcmp.eq.f32.partialorder %v7350_v40, %v5994_v28  ;;  %v7356_v27 = vld [vmem:[#allocation72_spill] sm:$0xff]  ;;  %v7371_v40 = vld [vmem:[#allocation2_spill] sm:$0xff]  ;;  %vm2802_vm13 = vcmp.eq.s32.totalorder %v7426_v55, 7 }
 0x4ee   : > { %v2777_v8 = vsel %vm2776_vm9, %v2772_v37, inf  ;;  %v2762_v42 = vsel %vm2761_vm10, %v2757_v50, inf  ;;  %vm2788_vm15 = vcmp.eq.s32.totalorder %v7356_v27, 7  ;;  %v2882_v37 = vsub.f32 %v7369_v57, %v7368_v10  ;;  %v7377_v28 = vld [vmem:[#allocation29_spill] sm:$0xff]  ;;  %v7385_v24 = vld [vmem:[#allocation31_spill] sm:$0xff] }
 0x4ef   : > { %2778 = vmin.xlane.f32.xlu1 %v2777_v8  ;;  %2763 = vmin.xlane.f32.xlu0 %v2762_v42  ;;  %v6032_v50 = vsel %vm2788_vm15, 0.0, %v7130_v11  ;;  %vm2795_vm5 = vcmp.eq.s32.totalorder %v7371_v40, 7  ;;  %v2914_v8 = vmul.f32 1.442695, %v2881_v18  ;;  %v7372_v42 = vld [vmem:[#allocation40_spill] sm:$0xff]  ;;  %v2884_v14 = vsub.f32 %v7377_v28, %v7376_v52  ;;  %v7400_v27 = vld [vmem:[#allocation79_spill] sm:$0xff] }
 0x4f0   : > { %7370 = vst [vmem:[#allocation98_spill] sm:$0xff] %v6032_v50  ;;  %v2885_v15 = vsub.f32 %v7373_v43, %v7372_v42  ;;  %v6044_v10 = vsel %vm2790_vm2, 0.0, %v7130_v11  ;;  %v2912_v57 = vmul.f32 1.442695, %v2880_v23  ;;  %v2887_v40 = vsub.f32 %v7380_v41, %v7379_v44  ;;  %v7383_v43 = vld [vmem:[#allocation3_spill] sm:$0xff]  ;;  %v7387_v52 = vld [vmem:[#allocation44_spill] sm:$0xff] }
 0x4f1   : > { %7378 = vst [vmem:[#allocation102_spill] sm:$0xff] %v6044_v10  ;;  %v6049_v18 = vsel %vm2793_vm3, 0.0, %v7130_v11  ;;  %v6052_v42 = vsel %vm2792_vm4, 0.0, %v7130_v11  ;;  %vm2797_vm7 = vcmp.eq.s32.totalorder %v7383_v43, 7  ;;  %v2916_v13 = vmul.f32 1.442695, %v2882_v37 }
 0x4f2   : > { %7381 = vst [vmem:[#allocation106_spill] sm:$0xff] %v6049_v18  ;;  %7382 = vst [vmem:[#allocation107_spill] sm:$0xff] %v6052_v42  ;;  %v2886_v49 = vsub.f32 %v7385_v24, %v7384_v7  ;;  %v6058_v28 = vsel %vm2795_vm5, 0.0, %v7130_v11  ;;  %3957 = vpow2.f32 %v2914_v8  ;;  %v2922_v23 = vmul.f32 1.442695, %v2885_v15  ;;  %v7388_v10 = vld [vmem:[#allocation32_spill] sm:$0xff] }
 0x4f3   : > { %7386 = vst [vmem:[#allocation60_spill] sm:$0xff] %v6058_v28  ;;  %v2889_v41 = vsub.f32 %v7388_v10, %v7387_v52  ;;  %v6063_v44 = vsel %vm2794_vm6, 0.0, %v7130_v11  ;;  %v7390_v18 = vld [vmem:[#allocation5_spill] sm:$0xff]  ;;  %3959 = vpow2.f32 %v2918_v5  ;;  %v2920_v42 = vmul.f32 1.442695, %v2884_v14  ;;  %v7391_v43 = vld [vmem:[#allocation43_spill] sm:$0xff] }
 0x4f4   : > { %7389 = vst [vmem:[#allocation61_spill] sm:$0xff] %v6063_v44  ;;  %vm2796_vm8 = vcmp.eq.s32.totalorder %v7390_v18, 7  ;;  %v7392_v37 = vld [vmem:[#allocation33_spill] sm:$0xff]  ;;  %3961 = vpow2.f32 %v2912_v57  ;;  %v2926_v24 = vmul.f32 1.442695, %v2887_v40  ;;  %v7393_v7 = vld [vmem:[#allocation46_spill] sm:$0xff] }
 0x4f5   : > { %v2888_v2 = vsub.f32 %v7392_v37, %v7391_v43  ;;  %v7394_v50 = vld [vmem:[#allocation77_spill] sm:$0xff]  ;;  %v6071_v8 = vsel %vm2797_vm7, 0.0, %v7130_v11  ;;  %v7396_v15 = vld [vmem:[#allocation6_spill] sm:$0xff]  ;;  %3963 = vpow2.f32 %v2916_v13  ;;  %v2924_v10 = vmul.f32 1.442695, %v2886_v49  ;;  %v7399_v5 = vld [vmem:[#allocation48_spill] sm:$0xff] }
 0x4f6   : > { %v2891_v28 = vsub.f32 %v7394_v50, %v7393_v7  ;;  %7395 = vst [vmem:[#allocation65_spill] sm:$0xff] %v6071_v8  ;;  %vm2799_vm9 = vcmp.eq.s32.totalorder %v7396_v15, 7  ;;  %v7397_v52 = vld [vmem:[#allocation45_spill] sm:$0xff]  ;;  %v7398_v44 = vld [vmem:[#allocation78_spill] sm:$0xff]  ;;  %3965 = vpow2.f32 %v2922_v23  ;;  %v2930_v14 = vmul.f32 1.442695, %v2889_v41 }
 0x4f7   : > { %v2890_v18 = vsub.f32 %v7398_v44, %v7397_v52  ;;  %v2893_v43 = vsub.f32 %v7400_v27, %v7399_v5  ;;  %v6079_v40 = vsel %vm2796_vm8, 0.0, %v7130_v11  ;;  %v7402_v57 = vld [vmem:[#allocation7_spill] sm:$0xff]  ;;  %3967 = vpow2.f32 %v2920_v42  ;;  %v7404_v7 = vld [vmem:[#allocation80_spill] sm:$0xff]  ;;  %v7405_v13 = vld [vmem:[#allocation50_spill] sm:$0xff] }
 0x4f8   : > { %7401 = vst [vmem:[#allocation64_spill] sm:$0xff] %v6079_v40  ;;  %vm2798_vm10 = vcmp.eq.s32.totalorder %v7402_v57, 7  ;;  %v2928_v50 = vmul.f32 1.442695, %v2888_v2  ;;  %v7403_v37 = vld [vmem:[#allocation47_spill] sm:$0xff]  ;;  %3969 = vpow2.f32 %v2926_v24  ;;  %v7406_v8 = vld [vmem:[#allocation81_spill] sm:$0xff] }
 0x4f9   : > { %v2892_v15 = vsub.f32 %v7404_v7, %v7403_v37  ;;  %v2934_v49 = vmul.f32 1.442695, %v2891_v28  ;;  %v2895_v44 = vsub.f32 %v7406_v8, %v7405_v13  ;;  %v6087_v23 = vsel %vm2799_vm9, 0.0, %v7130_v11  ;;  %v7408_v41 = vld [vmem:[#allocation8_spill] sm:$0xff]  ;;  %v7409_v52 = vld [vmem:[#allocation49_spill] sm:$0xff]  ;;  %v7410_v5 = vld [vmem:[#allocation82_spill] sm:$0xff] }
 0x4fa   : > { %7407 = vst [vmem:[#allocation35_spill] sm:$0xff] %v6087_v23  ;;  %vm2801_vm1 = vcmp.eq.s32.totalorder %v7408_v41, 7  ;;  %3971 = vpow2.f32 %v2924_v10  ;;  %v2932_v27 = vmul.f32 1.442695, %v2890_v18  ;;  %v2894_v57 = vsub.f32 %v7410_v5, %v7409_v52  ;;  %v7411_v42 = vld [vmem:[#allocation52_spill] sm:$0xff]  ;;  %v7412_v40 = vld [vmem:[#allocation83_spill] sm:$0xff] }
 0x4fb   : > { %3973 = vpow2.f32 %v2930_v14  ;;  %v2938_v2 = vmul.f32 1.442695, %v2893_v43  ;;  %v2897_v37 = vsub.f32 %v7412_v40, %v7411_v42  ;;  %v6095_v28 = vsel %vm2798_vm10, 0.0, %v7130_v11  ;;  %v7414_v24 = vld [vmem:[#allocation9_spill] sm:$0xff]  ;;  %v7415_v7 = vld [vmem:[#allocation51_spill] sm:$0xff]  ;;  %v7416_v13 = vld [vmem:[#allocation84_spill] sm:$0xff] }
 0x4fc   : > { %7413 = vst [vmem:[#allocation24_spill] sm:$0xff] %v6095_v28  ;;  %vm2800_vm11 = vcmp.eq.s32.totalorder %v7414_v24, 7  ;;  %3975 = vpow2.f32 %v2928_v50  ;;  %v2936_v8 = vmul.f32 1.442695, %v2892_v15  ;;  %v2896_v23 = vsub.f32 %v7416_v13, %v7415_v7  ;;  %v6100_v10 = vpop.eup %3957  ;;  %v7417_v52 = vld [vmem:[#allocation54_spill] sm:$0xff]  ;;  %v7418_v14 = vld [vmem:[#allocation85_spill] sm:$0xff] }
 0x4fd   : > { %3977 = vpow2.f32 %v2934_v49  ;;  %v2942_v18 = vmul.f32 1.442695, %v2895_v44  ;;  %v2899_v43 = vsub.f32 %v7418_v14, %v7417_v52  ;;  %v6107_v40 = vsel %vm2801_vm1, 0.0, %v7130_v11  ;;  %v6109_v5 = vpop.eup %3959  ;;  %v7420_v42 = vld [vmem:[#allocation10_spill] sm:$0xff]  ;;  %v7421_v50 = vld [vmem:[#allocation53_spill] sm:$0xff]  ;;  %v7423_v44 = vld [vmem:[#allocation56_spill] sm:$0xff] }
 0x4fe   : > { %7419 = vst [vmem:[#allocation37_spill] sm:$0xff] %v6107_v40  ;;  %vm2803_vm12 = vcmp.eq.s32.totalorder %v7420_v42, 7  ;;  %3979 = vpow2.f32 %v2932_v27  ;;  %v2940_v15 = vmul.f32 1.442695, %v2894_v57  ;;  %v7422_v7 = vld [vmem:[#allocation86_spill] sm:$0xff]  ;;  %v6114_v28 = vpop.eup %3961  ;;  %v7424_v52 = vld [vmem:[#allocation87_spill] sm:$0xff] }
 0x4ff   : > { %v2898_v13 = vsub.f32 %v7422_v7, %v7421_v50  ;;  %3981 = vpow2.f32 %v2938_v2  ;;  %v2946_v49 = vmul.f32 1.442695, %v2897_v37  ;;  %v2901_v14 = vsub.f32 %v7424_v52, %v7423_v44  ;;  %v6123_v41 = vpop.eup %3963  ;;  %v7427_v27 = vld [vmem:[#allocation55_spill] sm:$0xff]  ;;  %v7428_v50 = vld [vmem:[#allocation88_spill] sm:$0xff]  ;;  %v7430_v37 = vld [vmem:[#allocation58_spill] sm:$0xff] }
 0x500   : > { %v6121_v40 = vsel %vm2800_vm11, 0.0, %v7130_v11  ;;  %3983 = vpow2.f32 %v2936_v8  ;;  %v2944_v57 = vmul.f32 1.442695, %v2896_v23  ;;  %v2900_v7 = vsub.f32 %v7428_v50, %v7427_v27  ;;  %v6128_v38 = vpop.eup %3965  ;;  %v7431_v44 = vld [vmem:[#allocation89_spill] sm:$0xff]  ;;  %v7436_v27 = vld [vmem:[#allocation90_spill] sm:$0xff] }
 0x501   : > { %7425 = vst [vmem:[#allocation25_spill] sm:$0xff] %v6121_v40  ;;  %7429 = vst [vmem:[#allocation36_spill] sm:$0xff] %v6128_v38  ;;  %3985 = vpow2.f32 %v2942_v18  ;;  %v2950_v2 = vmul.f32 1.442695, %v2899_v43  ;;  %v2903_v52 = vsub.f32 %v7431_v44, %v7430_v37  ;;  %v6135_v40 = vsel %vm2803_vm12, 0.0, %v7130_v11  ;;  %v6137_v24 = vpop.eup %3967  ;;  %v7435_v8 = vld [vmem:[#allocation57_spill] sm:$0xff] }
 0x502   : > { %7432 = vst [vmem:[#allocation26_spill] sm:$0xff] %v6135_v40  ;;  %7433 = vst [vmem:[#allocation38_spill] sm:$0xff] %v6137_v24  ;;  %3987 = vpow2.f32 %v2940_v15  ;;  %v2948_v23 = vmul.f32 1.442695, %v2898_v13  ;;  %v2902_v50 = vsub.f32 %v7436_v27, %v7435_v8  ;;  %v6142_v38 = vpop.eup %3969  ;;  %v2954_v18 = vmul.f32 1.442695, %v2901_v14 }
 0x503   : > { %7437 = vst [vmem:[#allocation27_spill] sm:$0xff] %v6142_v38  ;;  %3989 = vpow2.f32 %v2946_v49  ;;  %v7438_v43 = vld [vmem:[#allocation62_spill] sm:$0xff]  ;;  %v7439_v37 = vld [vmem:[#allocation92_spill] sm:$0xff]  ;;  %v6149_v40 = vsel %vm2802_vm13, 0.0, %v7130_v11  ;;  %v7442_v24 = vld [vmem:[#allocation13_spill] sm:$0xff]  ;;  %vm3201_vm10 = vcmask 15360  }
 0x504   : > { %v2905_v44 = vsub.f32 %v7439_v37, %v7438_v43  ;;  %7440 = vst [vmem:[#allocation40_spill] sm:$0xff] %v6149_v40  ;;  %v6151_v42 = vpop.eup %3971  ;;  %vm2804_vm15 = vcmp.eq.s32.totalorder %v7442_v24, 7  ;;  %3991 = vpow2.f32 %v2944_v57  ;;  %v2952_v15 = vmul.f32 1.442695, %v2900_v7  ;;  %v7443_v13 = vld [vmem:[#allocation59_spill] sm:$0xff]  ;;  %v7444_v8 = vld [vmem:[#allocation93_spill] sm:$0xff] }
 0x505   : > { %7441 = vst [vmem:[#allocation28_spill] sm:$0xff] %v6151_v42  ;;  %v2904_v27 = vsub.f32 %v7444_v8, %v7443_v13  ;;  %v6156_v38 = vpop.eup %3973  ;;  %3993 = vpow2.f32 %v2950_v2  ;;  %v2958_v49 = vmul.f32 1.442695, %v2903_v52  ;;  %v7446_v14 = vld [vmem:[#allocation66_spill] sm:$0xff]  ;;  %v7447_v43 = vld [vmem:[#allocation96_spill] sm:$0xff]  ;;  %v6163_v40 = vsel %vm2805_vm14, 0.0, %v7130_v11 }
 0x506   : > { %7445 = vst [vmem:[#allocation39_spill] sm:$0xff] %v6156_v38  ;;  %v2907_v37 = vsub.f32 %v7447_v43, %v7446_v14  ;;  %7448 = vst [vmem:[#allocation29_spill] sm:$0xff] %v6163_v40  ;;  %v6165_v55 = vpop.eup %3975  ;;  %v7450_v42 = vld [vmem:[#allocation14_spill] sm:$0xff]  ;;  %3995 = vpow2.f32 %v2948_v23  ;;  %v2956_v57 = vmul.f32 1.442695, %v2902_v50  ;;  %v7451_v7 = vld [vmem:[#allocation63_spill] sm:$0xff] }
 0x507   : > { %7449 = vst [vmem:[#allocation42_spill] sm:$0xff] %v6165_v55  ;;  %vm2807_vm0 = vcmp.eq.s32.totalorder %v7450_v42, 7  ;;  %v7452_v13 = vld [vmem:[#allocation97_spill] sm:$0xff]  ;;  %v6170_v38 = vpop.eup %3977  ;;  %3997 = vpow2.f32 %v2954_v18  ;;  %v2962_v2 = vmul.f32 1.442695, %v2905_v44  ;;  %v7455_v14 = vld [vmem:[#allocation100_spill] sm:$0xff] }
 0x508   : > { %v2906_v8 = vsub.f32 %v7452_v13, %v7451_v7  ;;  %7453 = vst [vmem:[#allocation30_spill] sm:$0xff] %v6170_v38  ;;  %v7454_v52 = vld [vmem:[#allocation69_spill] sm:$0xff]  ;;  %v6177_v40 = vsel %vm2804_vm15, 0.0, %v7130_v11  ;;  %v6179_v12 = vpop.eup %3979  ;;  %v7458_v55 = vld [vmem:[#allocation15_spill] sm:$0xff]  ;;  %3999 = vpow2.f32 %v2952_v15  ;;  %v2960_v23 = vmul.f32 1.442695, %v2904_v27 }
 0x509   : > { %v2909_v43 = vsub.f32 %v7455_v14, %v7454_v52  ;;  %7456 = vst [vmem:[#allocation41_spill] sm:$0xff] %v6177_v40  ;;  %7457 = vst [vmem:[#allocation31_spill] sm:$0xff] %v6179_v12  ;;  %vm2806_vm2 = vcmp.eq.s32.totalorder %v7458_v55, 7  ;;  %v7459_v50 = vld [vmem:[#allocation67_spill] sm:$0xff]  ;;  %v7460_v7 = vld [vmem:[#allocation101_spill] sm:$0xff]  ;;  %v6184_v38 = vpop.eup %3981  ;;  %4001 = vpow2.f32 %v2958_v49  ;;  %v6191_v40 = vsel %vm2807_vm0, 0.0, %v7130_v11 }
 0x50a   : > { %v2908_v13 = vsub.f32 %v7460_v7, %v7459_v50  ;;  %7461 = vst [vmem:[#allocation44_spill] sm:$0xff] %v6184_v38  ;;  %v2966_v18 = vmul.f32 1.442695, %v2907_v37  ;;  %v7462_v44 = vld [vmem:[#allocation73_spill] sm:$0xff]  ;;  %v7463_v52 = vld [vmem:[#allocation104_spill] sm:$0xff]  ;;  %7464 = vst [vmem:[#allocation32_spill] sm:$0xff] %v6191_v40  ;;  %v6193_v24 = vpop.eup %3983  ;;  %4003 = vpow2.f32 %v2956_v57 }
 0x50b   : > { %v2911_v14 = vsub.f32 %v7463_v52, %v7462_v44  ;;  %v7465_v12 = vld [vmem:[#allocation16_spill] sm:$0xff]  ;;  %v2964_v15 = vmul.f32 1.442695, %v2906_v8  ;;  %v7466_v27 = vld [vmem:[#allocation70_spill] sm:$0xff]  ;;  %v7467_v50 = vld [vmem:[#allocation105_spill] sm:$0xff]  ;;  %v6198_v38 = vpop.eup %3985  ;;  %4005 = vpow2.f32 %v2962_v2 }
 0x50c   : > { %vm2809_vm3 = vcmp.eq.s32.totalorder %v7465_v12, 7  ;;  %v2910_v7 = vsub.f32 %v7467_v50, %v7466_v27  ;;  %7468 = vst [vmem:[#allocation43_spill] sm:$0xff] %v6198_v38  ;;  %v7469_v49 = vld [vmem:[#allocation17_spill] sm:$0xff]  ;;  %v7470_v37 = vld [vmem:[#allocation18_spill] sm:$0xff]  ;;  %v2970_v44 = vmul.f32 1.442695, %v2909_v43  ;;  %v6202_v52 = vpop.eup %3987  ;;  %4007 = vpow2.f32 %v2960_v23 }
 0x50d   : > { %vm2808_vm4 = vcmp.eq.s32.totalorder %v7469_v49, 7  ;;  %vm2811_vm5 = vcmp.eq.s32.totalorder %v7470_v37, 7  ;;  %v7471_v11 = vld [vmem:[#allocation19_spill] sm:$0xff]  ;;  %v7472_v40 = vld [vmem:[#allocation20_spill] sm:$0xff]  ;;  %v2968_v57 = vmul.f32 1.442695, %v2908_v13  ;;  %v6206_v8 = vpop.eup %3989  ;;  %4009 = vpow2.f32 %v2966_v18 }
 0x50e   : > { %vm2810_vm6 = vcmp.eq.s32.totalorder %v7471_v11, 7  ;;  %vm2813_vm7 = vcmp.eq.s32.totalorder %v7472_v40, 7  ;;  %v7473_v42 = vld [vmem:[#allocation21_spill] sm:$0xff]  ;;  %v2974_v27 = vmul.f32 1.442695, %v2911_v14  ;;  %v7474_v50 = vmov 1.0   ;;  %v6214_v2 = vpop.eup %3991 }
 0x50f   : > { %vm2812_vm8 = vcmp.eq.s32.totalorder %v7473_v42, 7  ;;  %v6212_v38 = vsel %vm2806_vm2, 0.0, %v7474_v50  ;;  %4011 = vpow2.f32 %v2964_v15  ;;  %v2972_v43 = vmul.f32 1.442695, %v2910_v7  ;;  %v6226_v18 = vpop.eup %3993 }
 0x510   : > { %7475 = vst [vmem:[#allocation33_spill] sm:$0xff] %v6212_v38  ;;  %v6219_v23 = vsel %vm2809_vm3, 0.0, %v7474_v50  ;;  %v6224_v13 = vsel %vm2808_vm4, 0.0, %v7474_v50  ;;  %4013 = vpow2.f32 %v2970_v44  ;;  %v6231_v14 = vsel %vm2811_vm5, 0.0, %v7474_v50 }
 0x511   : > { %7476 = vst [vmem:[#allocation46_spill] sm:$0xff] %v6219_v23  ;;  %7477 = vst [vmem:[#allocation77_spill] sm:$0xff] %v6224_v13  ;;  %v6236_v15 = vsel %vm2810_vm6, 0.0, %v7474_v50  ;;  %v6241_v7 = vsel %vm2813_vm7, 0.0, %v7474_v50  ;;  %v6243_v23 = vpop.eup %3995  ;;  %4015 = vpow2.f32 %v2968_v57  ;;  %v2331_v44 = vcvt.f32.s32 %v5839_v45 }
 0x512   : > { %7478 = vst [vmem:[#allocation45_spill] sm:$0xff] %v6231_v14  ;;  %7479 = vst [vmem:[#allocation78_spill] sm:$0xff] %v6236_v15  ;;  %v2361_v13 = vcvt.f32.s32 %v5845_v30  ;;  %v6250_v37 = vsel %vm2812_vm8, 0.0, %v7474_v50  ;;  %v6252_v11 = vpop.eup %3997  ;;  %4017 = vpow2.f32 %v2974_v27  ;;  %v2316_v15 = vcvt.f32.s32 %v5849_v36  ;;  %v7482_v36 = vld [vmem:[#allocation34_spill] sm:$0xff] }
 0x513   : > { %7480 = vst [vmem:[#allocation48_spill] sm:$0xff] %v6241_v7  ;;  %7481 = vst [vmem:[#allocation79_spill] sm:$0xff] %v6250_v37  ;;  %v2346_v40 = vcvt.f32.s32 %v5854_v58  ;;  %v2391_v7 = vcvt.f32.s32 %v5860_v20  ;;  %v6257_v14 = vpop.eup %3999  ;;  %4019 = vpow2.f32 %v2972_v43  ;;  %v2376_v45 = vcvt.f32.s32 %v5865_v31 }
 0x514   : > { %v2421_v30 = vcvt.f32.s32 %v5870_v48  ;;  %v2406_v57 = vcvt.f32.s32 %v5875_v22  ;;  %v6262_v50 = vpop.eup %4001  ;;  %v2451_v37 = vcvt.f32.s32 %v5880_v26  ;;  %v2436_v27 = vcvt.f32.s32 %v5885_v56 }
 0x515   : > { %vm3168_vm9 = vcmp.eq.s32.totalorder %v7482_v36, 0  ;;  %v6267_v58 = vpop.eup %4003  ;;  %v2332_v20 = vshll.u32 %v2331_v44, 16  ;;  %v2362_v42 = vshll.u32 %v2361_v13, 16  ;;  %v2481_v43 = vcvt.f32.s32 %v5890_v53 }
 0x516   : > { %7483 = vst [vmem:[#allocation47_spill] sm:$0xff] %v6267_v58  ;;  %v2466_v31 = vcvt.f32.s32 %v5895_v35  ;;  %v6271_v48 = vpop.eup %4005  ;;  %v2317_v22 = vshll.u32 %v2316_v15, 16  ;;  %v6273_v49 = vshll.u32 %v2346_v40, 16  ;;  %v6275_v12 = vshll.u32 %v2391_v7, 16 }
 0x517   : > { %7484 = vst [vmem:[#allocation80_spill] sm:$0xff] %v6271_v48  ;;  %v2511_v26 = vcvt.f32.s32 %v5900_v60  ;;  %v6278_v38 = vpop.eup %4007  ;;  %v6280_v58 = vshll.u32 %v2376_v45, 16  ;;  %v6282_v13 = vshll.u32 %v2421_v30, 16  ;;  %v6284_v53 = vshll.u32 %v2406_v57, 16 }
 0x518   : > { %7485 = vst [vmem:[#allocation50_spill] sm:$0xff] %v6278_v38  ;;  %v6286_v44 = vpop.eup %4009  ;;  %v6288_v15 = vshll.u32 %v2451_v37, 16  ;;  %v6290_v40 = vshll.u32 %v2436_v27, 16  ;;  %v2496_v7 = vcvt.f32.s32 %v5905_v25  ;;  %v2541_v60 = vcvt.f32.s32 %v5910_v9 }
 0x519   : > { %v6294_v48 = vpop.eup %4011  ;;  %v6296_v38 = vshll.u32 %v2481_v43, 16  ;;  %v6298_v45 = vshll.u32 %v2466_v31, 16  ;;  %v2526_v30 = vcvt.f32.s32 %v5915_v32  ;;  %v6309_v25 = vshll.u32 %v2511_v26, 16 }
 0x51a   : > { %7486 = vst [vmem:[#allocation81_spill] sm:$0xff] %v6294_v48  ;;  %v6307_v57 = vpop.eup %4013  ;;  %v2571_v9 = vcvt.f32.s32 %v5920_v61  ;;  %v2556_v27 = vcvt.f32.s32 %v5925_v17  ;;  %v2601_v43 = vcvt.f32.s32 %v5930_v4  ;;  %v2586_v32 = vcvt.f32.s32 %v5935_v39 }
 0x51b   : > { %7487 = vst [vmem:[#allocation49_spill] sm:$0xff] %v6307_v57  ;;  %v6322_v48 = vshll.u32 %v2496_v7, 16  ;;  %v6324_v61 = vshll.u32 %v2541_v60, 16 }
 0x51c   : > { %v6340_v60 = vshll.u32 %v2556_v27, 16  ;;  %v2616_v27 = vcvt.f32.s32 %v5945_v54  ;;  %v2691_v54 = vcvt.f32.s32 %v5960_v6 }
 0x53c   : > { %v2329_v56 = vpop.xlane.xlu1 %2328 }
 0x53d   : > { %v2330_v35 = vcvt.f32.s32 %v2329_v56  ;;  %v6314_v56 = vpop.eup %4015 }
 0x53e   : > { %7488 = vst [vmem:[#allocation82_spill] sm:$0xff] %v6314_v56  ;;  %v6320_v26 = vpop.eup %4017  ;;  %v6333_v56 = vshll.u32 %v2526_v30, 16 }
 0x53f   : > { %v2333_v37 = vadd.s32 %v2332_v20, %v2330_v35  ;;  %v6331_v39 = vpop.eup %4019 }
 0x540   : > { %v2359_v31 = vpop.xlane.xlu1 %2358  ;;  %v2314_v57 = vpop.xlane.xlu0 %2313  ;;  %7489 = vst [vmem:[#allocation52_spill] sm:$0xff] %v6331_v39 }
 0x541   : > { %vm2849_vm1 = vcmp.eq.s32.totalorder %v2333_v37, 7  ;;  %v3235_v20 = vsel %vm3168_vm9, %v7351_v3, %v2333_v37  ;;  %v2360_v35 = vcvt.f32.s32 %v2359_v31  ;;  %v2315_v4 = vcvt.f32.s32 %v2314_v57 }
 0x542   : > { %v6327_v17 = vsel %vm2849_vm1, 0.0, %v6100_v10  ;;  %3267 = vst.msk [vmem:[%s6305_s21 + $0x8] sm:$0xff] %vm3201_vm10, %v3235_v20  ;;  %v2631_v3 = vcvt.f32.s32 %v5940_v46  ;;  %v6338_v31 = vshll.u32 %v2571_v9, 16  ;;  %v6342_v10 = vshll.u32 %v2601_v43, 16 }
 0x543   : > { %v3009_v37 = vadd.f32 %v6327_v17, %v6007_v0  ;;  %v2363_v7 = vadd.s32 %v2362_v42, %v2360_v35  ;;  %v2318_v20 = vadd.s32 %v2317_v22, %v2315_v4  ;;  %v6344_v57 = vshll.u32 %v2586_v32, 16 }
 0x544   : > { %v2344_v30 = vpop.xlane.xlu0 %2343  ;;  %v6357_v9 = vshll.u32 %v2631_v3, 16  ;;  %v2646_v32 = vcvt.f32.s32 %v5955_v63  ;;  %v2676_v4 = vcvt.f32.s32 %v5965_v34  ;;  %v2721_v3 = vcvt.f32.s32 %v5970_v33 }
 0x545   : > { %4021 = vrcp.f32 %v3009_v37  ;;  %vm2851_vm11 = vcmp.eq.s32.totalorder %v2363_v7, 7  ;;  %v3237_v46 = vsel %vm3168_vm9, %v7352_v1, %v2363_v7  ;;  %vm2848_vm12 = vcmp.eq.s32.totalorder %v2318_v20, 7 }
 0x546   : > { %v6350_v39 = vsel %vm2851_vm11, 0.0, %v6109_v5  ;;  %3269 = vst.msk [vmem:[%s6305_s21 + $0x18] sm:$0xff] %vm3201_vm10, %v3237_v46  ;;  %v3234_v42 = vsel %vm3168_vm9, %v7353_v62, %v2318_v20  ;;  %v2345_v22 = vcvt.f32.s32 %v2344_v30  ;;  %v6363_v1 = vsel %vm2848_vm12, 0.0, %v6114_v28 }
 0x547   : > { %v3011_v43 = vadd.f32 %v6350_v39, %v6013_v29  ;;  %3266 = vst.msk [vmem:[%s6305_s21] sm:$0xff] %vm3201_vm10, %v3234_v42  ;;  %v2661_v5 = vcvt.f32.s32 %v5950_v51  ;;  %v3008_v62 = vadd.f32 %v6363_v1, %v6016_v59  ;;  %v2706_v28 = vcvt.f32.s32 %v5975_v19 }
 0x548   : > { %v2348_v35 = vadd.s32 %v6273_v49, %v2345_v22  ;;  %v2389_v63 = vpop.xlane.xlu1 %2388  ;;  %v6379_v37 = vshll.u32 %v2616_v27, 16  ;;  %v2751_v49 = vcvt.f32.s32 %v5980_v21  ;;  %v2374_v33 = vpop.xlane.xlu0 %2373  ;;  %v6389_v19 = vshll.u32 %v2646_v32, 16  ;;  %v7490_v22 = vld [vmem:[#allocation91_spill] sm:$0xff] }
 0x549   : > { %4023 = vrcp.f32 %v3011_v43  ;;  %v2390_v34 = vcvt.f32.s32 %v2389_v63  ;;  %v6387_v7 = vshll.u32 %v2661_v5, 16  ;;  %v6393_v46 = vshll.u32 %v2691_v54, 16  ;;  %v7493_v63 = vld [vmem:[#allocation99_spill] sm:$0xff] }
 0x54a   : > { %4025 = vrcp.f32 %v3008_v62  ;;  %vm2850_vm13 = vcmp.eq.s32.totalorder %v2348_v35, 7  ;;  %v3236_v51 = vsel %vm3168_vm9, %v7354_v47, %v2348_v35  ;;  %v2375_v47 = vcvt.f32.s32 %v2374_v33  ;;  %v7491_v35 = vld [vmem:[#allocation68_spill] sm:$0xff] }
 0x54b   : > { %v6383_v6 = vsel %vm2850_vm13, 0.0, %v6123_v41  ;;  %3268 = vst.msk [vmem:[%s6305_s21 + $0x10] sm:$0xff] %vm3201_vm10, %v3236_v51  ;;  %v6395_v30 = vshll.u32 %v2676_v4, 16  ;;  %v6397_v21 = vshll.u32 %v2721_v3, 16  ;;  %v2393_v41 = vadd.s32 %v6275_v12, %v2390_v34  ;;  %v7494_v34 = vld [vmem:[#allocation38_spill] sm:$0xff] }
 0x54c   : > { %v3010_v20 = vadd.f32 %v6383_v6, %v6022_v16  ;;  %v6400_v42 = vshll.u32 %v2706_v28, 16  ;;  %v2736_v27 = vcvt.f32.s32 %v7490_v22  ;;  %v2378_v43 = vadd.s32 %v6280_v58, %v2375_v47  ;;  %v2419_v5 = vpop.xlane.xlu1 %2418  ;;  %v2404_v12 = vpop.xlane.xlu0 %2403  ;;  %v7492_v28 = vld [vmem:[#allocation36_spill] sm:$0xff]  ;;  %v7496_v22 = vld [vmem:[#allocation98_spill] sm:$0xff] }
 0x54d   : > { %v6404_v62 = vshll.u32 %v2751_v49, 16  ;;  %vm2853_vm14 = vcmp.eq.s32.totalorder %v2393_v41, 7  ;;  %v3239_v54 = vsel %vm3168_vm9, %v7491_v35, %v2393_v41  ;;  %v2420_v4 = vcvt.f32.s32 %v2419_v5 }
 0x54e   : > { %4027 = vrcp.f32 %v3010_v20  ;;  %v6418_v51 = vsel %vm2853_vm14, 0.0, %v7492_v28  ;;  %3271 = vst.msk [vmem:[%s6305_s21 + $0x28] sm:$0xff] %vm3201_vm10, %v3239_v54  ;;  %vm2852_vm15 = vcmp.eq.s32.totalorder %v2378_v43, 7  ;;  %v7495_v20 = vld [vmem:[#allocation72_spill] sm:$0xff]  ;;  %v6431_v41 = vshll.u32 %v2736_v27, 16 }
 0x54f   : > { %v4022_v32 = vpop.eup %4021  ;;  %v3013_v49 = vadd.f32 %v6418_v51, %v7493_v63  ;;  %v6425_v33 = vsel %vm2852_vm15, 0.0, %v7494_v34  ;;  %v3238_v47 = vsel %vm3168_vm9, %v7495_v20, %v2378_v43  ;;  %v7497_v43 = vld [vmem:[#allocation71_spill] sm:$0xff] }
 0x550   : > { %v3105_v3 = vmul.f32 %v4022_v32, %v6007_v0  ;;  %v3137_v58 = vmul.f32 %v4022_v32, %v6327_v17  ;;  %v2423_v0 = vadd.s32 %v6282_v13, %v2420_v4  ;;  %v3012_v5 = vadd.f32 %v6425_v33, %v7496_v22  ;;  %3270 = vst.msk [vmem:[%s6305_s21 + $0x20] sm:$0xff] %vm3201_vm10, %v3238_v47  ;;  %v2449_v35 = vpop.xlane.xlu1 %2448  ;;  %v2434_v4 = vpop.xlane.xlu0 %2433  ;;  %v7499_v47 = vld [vmem:[#allocation103_spill] sm:$0xff] }
 0x551   : > { %v2405_v32 = vcvt.f32.s32 %v2404_v12  ;;  %4029 = vrcp.f32 %v3013_v49  ;;  %v2450_v27 = vcvt.f32.s32 %v2449_v35  ;;  %v7498_v12 = vld [vmem:[#allocation27_spill] sm:$0xff] }
 0x552   : > { %v3170_v17 = vsel %vm3168_vm9, %v3105_v3, %v3137_v58  ;;  %vm2855_vm0 = vcmp.eq.s32.totalorder %v2423_v0, 7  ;;  %v3241_v13 = vsel %vm3168_vm9, %v7497_v43, %v2423_v0  ;;  %4031 = vrcp.f32 %v3012_v5 }
 0x553   : > { %v4024_v54 = vpop.eup %4023  ;;  %3203 = vst.msk [vmem:[%s6413_s25 + $0x8] sm:$0xff] %vm3201_vm10, %v3170_v17  ;;  %v6447_v34 = vsel %vm2855_vm0, 0.0, %v7498_v12  ;;  %3273 = vst.msk [vmem:[%s6305_s21 + $0x38] sm:$0xff] %vm3201_vm10, %v3241_v13  ;;  %v2408_v17 = vadd.s32 %v6284_v53, %v2405_v32  ;;  %v2453_v5 = vadd.s32 %v6288_v15, %v2450_v27  ;;  %v7503_v27 = vld [vmem:[#allocation75_spill] sm:$0xff] }
 0x554   : > { %v4026_v3 = vpop.eup %4025  ;;  %v3107_v58 = vmul.f32 %v4024_v54, %v6013_v29  ;;  %v3139_v28 = vmul.f32 %v4024_v54, %v6350_v39  ;;  %v3015_v0 = vadd.f32 %v6447_v34, %v7499_v47  ;;  %v7500_v29 = vld [vmem:[#allocation95_spill] sm:$0xff]  ;;  %v2435_v54 = vcvt.f32.s32 %v2434_v4  ;;  %v2479_v43 = vpop.xlane.xlu1 %2478 }
 0x555   : > { %v3104_v49 = vmul.f32 %v4026_v3, %v6016_v59  ;;  %v3136_v20 = vmul.f32 %v4026_v3, %v6363_v1  ;;  %v2781_v35 = vcvt.f32.s32 %v7500_v29  ;;  %vm2854_vm2 = vcmp.eq.s32.totalorder %v2408_v17, 7  ;;  %v7501_v1 = vld [vmem:[#allocation74_spill] sm:$0xff]  ;;  %v2464_v32 = vpop.xlane.xlu0 %2463  ;;  %v7502_v3 = vld [vmem:[#allocation28_spill] sm:$0xff] }
 0x556   : > { %v3172_v39 = vsel %vm3168_vm9, %v3107_v58, %v3139_v28  ;;  %4033 = vrcp.f32 %v3015_v0  ;;  %v3240_v53 = vsel %vm3168_vm9, %v7501_v1, %v2408_v17  ;;  %v6470_v15 = vsel %vm2854_vm2, 0.0, %v7502_v3  ;;  %v7505_v0 = vld [vmem:[#allocation39_spill] sm:$0xff]  ;;  %v7506_v29 = vld [vmem:[#allocation106_spill] sm:$0xff] }
 0x557   : > { %3205 = vst.msk [vmem:[%s6413_s25 + $0x18] sm:$0xff] %vm3201_vm10, %v3172_v39  ;;  %v3169_v59 = vsel %vm3168_vm9, %v3104_v49, %v3136_v20  ;;  %3272 = vst.msk [vmem:[%s6305_s21 + $0x30] sm:$0xff] %vm3201_vm10, %v3240_v53  ;;  %vm2857_vm3 = vcmp.eq.s32.totalorder %v2453_v5, 7  ;;  %v3243_v4 = vsel %vm3168_vm9, %v7503_v27, %v2453_v5  ;;  %v2438_v58 = vadd.s32 %v6290_v40, %v2435_v54  ;;  %v7504_v49 = vld [vmem:[#allocation102_spill] sm:$0xff]  ;;  %v7507_v5 = vld [vmem:[#allocation76_spill] sm:$0xff] }
 0x558   : > { %v4028_v13 = vpop.eup %4027  ;;  %3202 = vst.msk [vmem:[%s6413_s25] sm:$0xff] %vm3201_vm10, %v3169_v59  ;;  %v3014_v20 = vadd.f32 %v6470_v15, %v7504_v49  ;;  %v6483_v17 = vsel %vm2857_vm3, 0.0, %v7505_v0  ;;  %3275 = vst.msk [vmem:[%s6305_s21 + $0x48] sm:$0xff] %vm3201_vm10, %v3243_v4  ;;  %v2509_v54 = vpop.xlane.xlu1 %2508  ;;  %v7508_v59 = vld [vmem:[#allocation42_spill] sm:$0xff]  ;;  %v2465_v53 = vcvt.f32.s32 %v2464_v32  ;;  %v7510_v4 = vld [vmem:[#allocation107_spill] sm:$0xff] }
 0x559   : > { %v3106_v28 = vmul.f32 %v4028_v13, %v6022_v16  ;;  %v3138_v12 = vmul.f32 %v4028_v13, %v6383_v6  ;;  %v3017_v39 = vadd.f32 %v6483_v17, %v7506_v29  ;;  %vm2856_vm4 = vcmp.eq.s32.totalorder %v2438_v58, 7  ;;  %v2494_v13 = vpop.xlane.xlu0 %2493  ;;  %v7509_v3 = vld [vmem:[#allocation94_spill] sm:$0xff] }
 0x55a   : > { %v3242_v40 = vsel %vm3168_vm9, %v7507_v5, %v2438_v58  ;;  %v2480_v16 = vcvt.f32.s32 %v2479_v43  ;;  %4035 = vrcp.f32 %v3014_v20  ;;  %v6495_v1 = vsel %vm2856_vm4, 0.0, %v7508_v59 }
 0x55b   : > { %v3171_v6 = vsel %vm3168_vm9, %v3106_v28, %v3138_v12  ;;  %3274 = vst.msk [vmem:[%s6305_s21 + $0x40] sm:$0xff] %vm3201_vm10, %v3242_v40  ;;  %v2766_v27 = vcvt.f32.s32 %v7509_v3  ;;  %4037 = vrcp.f32 %v3017_v39  ;;  %v3016_v43 = vadd.f32 %v6495_v1, %v7510_v4  ;;  %v4030_v0 = vpop.eup %4029 }
 0x55c   : > { %3204 = vst.msk [vmem:[%s6413_s25 + $0x10] sm:$0xff] %vm3201_vm10, %v3171_v6  ;;  %v2483_v58 = vadd.s32 %v6296_v38, %v2480_v16  ;;  %v6505_v28 = vshll.u32 %v2781_v35, 16  ;;  %v2468_v12 = vadd.s32 %v6298_v45, %v2465_v53  ;;  %v2510_v20 = vcvt.f32.s32 %v2509_v54  ;;  %v4032_v32 = vpop.eup %4031  ;;  %v2539_v39 = vpop.xlane.xlu1 %2538  ;;  %v7511_v16 = vld [vmem:[#allocation30_spill] sm:$0xff]  ;;  %v7513_v53 = vld [vmem:[#allocation60_spill] sm:$0xff] }
 0x55d   : > { %v2495_v5 = vcvt.f32.s32 %v2494_v13  ;;  %v3109_v40 = vmul.f32 %v4030_v0, %v7493_v63  ;;  %v3141_v6 = vmul.f32 %v4030_v0, %v6418_v51  ;;  %4039 = vrcp.f32 %v3016_v43  ;;  %v7512_v54 = vld [vmem:[#allocation2_spill] sm:$0xff]  ;;  %v2524_v63 = vpop.xlane.xlu0 %2523  ;;  %v7515_v0 = vld [vmem:[#allocation31_spill] sm:$0xff] }
 0x55e   : > { %vm2859_vm5 = vcmp.eq.s32.totalorder %v2483_v58, 7  ;;  %v3108_v38 = vmul.f32 %v4032_v32, %v7496_v22  ;;  %v3140_v35 = vmul.f32 %v4032_v32, %v6425_v33  ;;  %v3245_v59 = vsel %vm3168_vm9, %v7512_v54, %v2483_v58  ;;  %v7514_v22 = vld [vmem:[#allocation4_spill] sm:$0xff] }
 0x55f   : > { %v6513_v45 = vsel %vm2859_vm5, 0.0, %v7511_v16  ;;  %v3174_v51 = vsel %vm3168_vm9, %v3109_v40, %v3141_v6  ;;  %3277 = vst.msk [vmem:[%s6305_s21 + $0x58] sm:$0xff] %vm3201_vm10, %v3245_v59  ;;  %vm2858_vm6 = vcmp.eq.s32.totalorder %v2468_v12, 7  ;;  %v3244_v33 = vsel %vm3168_vm9, %v7514_v22, %v2468_v12  ;;  %v7517_v59 = vld [vmem:[#allocation3_spill] sm:$0xff] }
 0x560   : > { %v3019_v13 = vadd.f32 %v6513_v45, %v7513_v53  ;;  %v4034_v43 = vpop.eup %4033  ;;  %3207 = vst.msk [vmem:[%s6413_s25 + $0x28] sm:$0xff] %vm3201_vm10, %v3174_v51  ;;  %v3173_v58 = vsel %vm3168_vm9, %v3108_v38, %v3140_v35  ;;  %v6532_v32 = vsel %vm2858_vm6, 0.0, %v7515_v0  ;;  %3276 = vst.msk [vmem:[%s6305_s21 + $0x50] sm:$0xff] %vm3201_vm10, %v3244_v33  ;;  %v2513_v40 = vadd.s32 %v6309_v25, %v2510_v20  ;;  %v7516_v38 = vld [vmem:[#allocation61_spill] sm:$0xff]  ;;  %v2569_v54 = vpop.xlane.xlu1 %2568 }
 0x561   : > { %v2498_v6 = vadd.s32 %v6322_v48, %v2495_v5  ;;  %3206 = vst.msk [vmem:[%s6413_s25 + $0x20] sm:$0xff] %vm3201_vm10, %v3173_v58  ;;  %v3111_v12 = vmul.f32 %v4034_v43, %v7499_v47  ;;  %v3143_v16 = vmul.f32 %v4034_v43, %v6447_v34  ;;  %v3018_v35 = vadd.f32 %v6532_v32, %v7516_v38  ;;  %v7518_v48 = vld [vmem:[#allocation5_spill] sm:$0xff]  ;;  %v2554_v5 = vpop.xlane.xlu0 %2553  ;;  %v7519_v47 = vld [vmem:[#allocation44_spill] sm:$0xff] }
 0x562   : > { %4041 = vrcp.f32 %v3019_v13  ;;  %vm2861_vm7 = vcmp.eq.s32.totalorder %v2513_v40, 7  ;;  %v3247_v25 = vsel %vm3168_vm9, %v7517_v59, %v2513_v40  ;;  %v7520_v33 = vld [vmem:[#allocation65_spill] sm:$0xff]  ;;  %v7521_v58 = vld [vmem:[#allocation64_spill] sm:$0xff]  ;;  %v2540_v40 = vcvt.f32.s32 %v2539_v39 }
 0x563   : > { %vm2860_vm8 = vcmp.eq.s32.totalorder %v2498_v6, 7  ;;  %v3246_v20 = vsel %vm3168_vm9, %v7518_v48, %v2498_v6  ;;  %v3176_v34 = vsel %vm3168_vm9, %v3111_v12, %v3143_v16  ;;  %4043 = vrcp.f32 %v3018_v35  ;;  %3279 = vst.msk [vmem:[%s6305_s21 + $0x68] sm:$0xff] %vm3201_vm10, %v3247_v25 }
 0x564   : > { %v6553_v51 = vsel %vm2861_vm7, 0.0, %v7519_v47  ;;  %v6558_v13 = vsel %vm2860_vm8, 0.0, %v6193_v24  ;;  %3278 = vst.msk [vmem:[%s6305_s21 + $0x60] sm:$0xff] %vm3201_vm10, %v3246_v20  ;;  %v4036_v22 = vpop.eup %4035  ;;  %3209 = vst.msk [vmem:[%s6413_s25 + $0x38] sm:$0xff] %vm3201_vm10, %v3176_v34  ;;  %v2525_v6 = vcvt.f32.s32 %v2524_v63  ;;  %v2570_v35 = vcvt.f32.s32 %v2569_v54  ;;  %v2599_v25 = vpop.xlane.xlu1 %2598  ;;  %v7522_v54 = vld [vmem:[#allocation43_spill] sm:$0xff] }
 0x565   : > { %v3021_v43 = vadd.f32 %v6553_v51, %v7520_v33  ;;  %v3020_v0 = vadd.f32 %v6558_v13, %v7521_v58  ;;  %v4038_v12 = vpop.eup %4037  ;;  %v3110_v16 = vmul.f32 %v4036_v22, %v7504_v49  ;;  %v3142_v24 = vmul.f32 %v4036_v22, %v6470_v15  ;;  %v6573_v47 = vpop.xlane.xlu0 %2583  ;;  %v7524_v22 = vld [vmem:[#allocation7_spill] sm:$0xff] }
 0x566   : > { %v2555_v59 = vcvt.f32.s32 %v2554_v5  ;;  %v3113_v48 = vmul.f32 %v4038_v12, %v7506_v29  ;;  %v3145_v20 = vmul.f32 %v4038_v12, %v6483_v17  ;;  %v2543_v34 = vadd.s32 %v6324_v61, %v2540_v40 }
 0x567   : > { %4045 = vrcp.f32 %v3021_v43  ;;  %v4040_v39 = vpop.eup %4039  ;;  %v3175_v63 = vsel %vm3168_vm9, %v3110_v16, %v3142_v24  ;;  %v2528_v15 = vadd.s32 %v6333_v56, %v2525_v6  ;;  %v2573_v49 = vadd.s32 %v6338_v31, %v2570_v35  ;;  %v7523_v56 = vld [vmem:[#allocation6_spill] sm:$0xff]  ;;  %v7526_v24 = vld [vmem:[#allocation24_spill] sm:$0xff] }
 0x568   : > { %4047 = vrcp.f32 %v3020_v0  ;;  %3208 = vst.msk [vmem:[%s6413_s25 + $0x30] sm:$0xff] %vm3201_vm10, %v3175_v63  ;;  %v3178_v17 = vsel %vm3168_vm9, %v3113_v48, %v3145_v20  ;;  %v3112_v61 = vmul.f32 %v4040_v39, %v7510_v4  ;;  %v3144_v29 = vmul.f32 %v4040_v39, %v6495_v1  ;;  %v2629_v0 = vpop.xlane.xlu1 %2628  ;;  %v7525_v4 = vld [vmem:[#allocation35_spill] sm:$0xff]  ;;  %v7527_v20 = vld [vmem:[#allocation8_spill] sm:$0xff] }
 0x569   : > { %vm2863_vm1 = vcmp.eq.s32.totalorder %v2543_v34, 7  ;;  %3211 = vst.msk [vmem:[%s6413_s25 + $0x48] sm:$0xff] %vm3201_vm10, %v3178_v17  ;;  %v3249_v31 = vsel %vm3168_vm9, %v7523_v56, %v2543_v34  ;;  %vm2862_vm11 = vcmp.eq.s32.totalorder %v2528_v15, 7  ;;  %v3248_v43 = vsel %vm3168_vm9, %v7524_v22, %v2528_v15  ;;  %v2614_v12 = vpop.xlane.xlu0 %2613  ;;  %v7528_v15 = vld [vmem:[#allocation37_spill] sm:$0xff] }
 0x56a   : > { %v6588_v5 = vsel %vm2863_vm1, 0.0, %v7522_v54  ;;  %v3177_v1 = vsel %vm3168_vm9, %v3112_v61, %v3144_v29  ;;  %3281 = vst.msk [vmem:[%s6305_s21 + $0x78] sm:$0xff] %vm3201_vm10, %v3249_v31  ;;  %v6603_v6 = vsel %vm2862_vm11, 0.0, %v6202_v52  ;;  %3280 = vst.msk [vmem:[%s6305_s21 + $0x70] sm:$0xff] %vm3201_vm10, %v3248_v43  ;;  %vm2865_vm12 = vcmp.eq.s32.totalorder %v2573_v49, 7  ;;  %v7529_v61 = vld [vmem:[#allocation9_spill] sm:$0xff] }
 0x56b   : > { %v3023_v40 = vadd.f32 %v6588_v5, %v7525_v4  ;;  %3210 = vst.msk [vmem:[%s6413_s25 + $0x40] sm:$0xff] %vm3201_vm10, %v3177_v1  ;;  %v3022_v35 = vadd.f32 %v6603_v6, %v7526_v24  ;;  %v6612_v48 = vsel %vm2865_vm12, 0.0, %v6206_v8  ;;  %v3251_v34 = vsel %vm3168_vm9, %v7527_v20, %v2573_v49  ;;  %v7530_v43 = vld [vmem:[#allocation25_spill] sm:$0xff] }
 0x56c   : > { %v4042_v16 = vpop.eup %4041  ;;  %v2558_v52 = vadd.s32 %v6340_v60, %v2555_v59  ;;  %v3025_v17 = vadd.f32 %v6612_v48, %v7528_v15  ;;  %3283 = vst.msk [vmem:[%s6305_s21 + $0x88] sm:$0xff] %vm3201_vm10, %v3251_v34  ;;  %v2600_v60 = vcvt.f32.s32 %v2599_v25  ;;  %v2659_v59 = vpop.xlane.xlu1 %2658  ;;  %v2585_v31 = vcvt.f32.s32 %v6573_v47  ;;  %v7531_v47 = vld [vmem:[#allocation10_spill] sm:$0xff] }
 0x56d   : > { %v3115_v39 = vmul.f32 %v4042_v16, %v7513_v53  ;;  %v3147_v63 = vmul.f32 %v4042_v16, %v6513_v45  ;;  %4049 = vrcp.f32 %v3023_v40  ;;  %v4044_v8 = vpop.eup %4043  ;;  %v6633_v54 = vpop.xlane.xlu0 %2643  ;;  %v2630_v22 = vcvt.f32.s32 %v2629_v0 }
 0x56e   : > { %4051 = vrcp.f32 %v3022_v35  ;;  %vm2864_vm13 = vcmp.eq.s32.totalorder %v2558_v52, 7  ;;  %v3250_v49 = vsel %vm3168_vm9, %v7529_v61, %v2558_v52  ;;  %v3114_v45 = vmul.f32 %v4044_v8, %v7516_v38 }
 0x56f   : > { %v3180_v53 = vsel %vm3168_vm9, %v3115_v39, %v3147_v63  ;;  %v3146_v29 = vmul.f32 %v4044_v8, %v6532_v32  ;;  %4053 = vrcp.f32 %v3025_v17  ;;  %3282 = vst.msk [vmem:[%s6305_s21 + $0x80] sm:$0xff] %vm3201_vm10, %v3250_v49  ;;  %v6638_v56 = vsel %vm2864_vm13, 0.0, %v6214_v2 }
 0x570   : > { %3213 = vst.msk [vmem:[%s6413_s25 + $0x58] sm:$0xff] %vm3201_vm10, %v3180_v53  ;;  %v2603_v25 = vadd.s32 %v6342_v10, %v2600_v60  ;;  %v3024_v1 = vadd.f32 %v6638_v56, %v7530_v43  ;;  %v2615_v40 = vcvt.f32.s32 %v2614_v12  ;;  %v2660_v16 = vcvt.f32.s32 %v2659_v59  ;;  %v2689_v8 = vpop.xlane.xlu1 %2688 }
 0x571   : > { %v4046_v38 = vpop.eup %4045  ;;  %v3179_v32 = vsel %vm3168_vm9, %v3114_v45, %v3146_v29  ;;  %v2588_v39 = vadd.s32 %v6344_v57, %v2585_v31  ;;  %v2645_v17 = vcvt.f32.s32 %v6633_v54  ;;  %v2674_v61 = vpop.xlane.xlu0 %2673  ;;  %v7533_v57 = vld [vmem:[#allocation11_spill] sm:$0xff]  ;;  %v7535_v54 = vld [vmem:[#allocation40_spill] sm:$0xff] }
 0x572   : > { %v4048_v35 = vpop.eup %4047  ;;  %3212 = vst.msk [vmem:[%s6413_s25 + $0x50] sm:$0xff] %vm3201_vm10, %v3179_v32  ;;  %v3117_v2 = vmul.f32 %v4046_v38, %v7520_v33  ;;  %v3149_v10 = vmul.f32 %v4046_v38, %v6553_v51  ;;  %vm2867_vm14 = vcmp.eq.s32.totalorder %v2603_v25, 7  ;;  %v3253_v0 = vsel %vm3168_vm9, %v7531_v47, %v2603_v25  ;;  %v7532_v51 = vld [vmem:[#allocation26_spill] sm:$0xff]  ;;  %v7536_v25 = vld [vmem:[#allocation29_spill] sm:$0xff] }
 0x573   : > { %v3116_v20 = vmul.f32 %v4048_v35, %v7521_v58  ;;  %v3148_v34 = vmul.f32 %v4048_v35, %v6558_v13  ;;  %4055 = vrcp.f32 %v3024_v1  ;;  %v6656_v12 = vsel %vm2867_vm14, 0.0, %v6226_v18  ;;  %3285 = vst.msk [vmem:[%s6305_s21 + $0x98] sm:$0xff] %vm3201_vm10, %v3253_v0 }
 0x574   : > { %v3182_v33 = vsel %vm3168_vm9, %v3117_v2, %v3149_v10  ;;  %v3027_v52 = vadd.f32 %v6656_v12, %v7532_v51  ;;  %v2633_v58 = vadd.s32 %v6357_v9, %v2630_v22  ;;  %v2618_v18 = vadd.s32 %v6379_v37, %v2615_v40  ;;  %v2719_v35 = vpop.xlane.xlu1 %2718  ;;  %v7539_v10 = vld [vmem:[#allocation14_spill] sm:$0xff] }
 0x575   : > { %3215 = vst.msk [vmem:[%s6413_s25 + $0x68] sm:$0xff] %vm3201_vm10, %v3182_v33  ;;  %v3181_v13 = vsel %vm3168_vm9, %v3116_v20, %v3148_v34  ;;  %v2663_v63 = vadd.s32 %v6387_v7, %v2660_v16  ;;  %vm2866_vm15 = vcmp.eq.s32.totalorder %v2588_v39, 7  ;;  %v3252_v9 = vsel %vm3168_vm9, %v7533_v57, %v2588_v39  ;;  %v7534_v7 = vld [vmem:[#allocation12_spill] sm:$0xff]  ;;  %v2704_v2 = vpop.xlane.xlu0 %2703 }
 0x576   : > { %3214 = vst.msk [vmem:[%s6413_s25 + $0x60] sm:$0xff] %vm3201_vm10, %v3181_v13  ;;  %4057 = vrcp.f32 %v3027_v52  ;;  %vm2869_vm0 = vcmp.eq.s32.totalorder %v2633_v58, 7  ;;  %v6679_v60 = vsel %vm2866_vm15, 0.0, %v6243_v23  ;;  %3284 = vst.msk [vmem:[%s6305_s21 + $0x90] sm:$0xff] %vm3201_vm10, %v3252_v9  ;;  %v3255_v59 = vsel %vm3168_vm9, %v7534_v7, %v2633_v58  ;;  %v7540_v34 = vld [vmem:[#allocation32_spill] sm:$0xff]  ;;  %v7541_v13 = vld [vmem:[#allocation47_spill] sm:$0xff] }
 0x577   : > { %v4050_v49 = vpop.eup %4049  ;;  %v6684_v37 = vsel %vm2869_vm0, 0.0, %v6252_v11  ;;  %vm2868_vm2 = vcmp.eq.s32.totalorder %v2618_v18, 7  ;;  %v3026_v23 = vadd.f32 %v6679_v60, %v7535_v54  ;;  %3287 = vst.msk [vmem:[%s6305_s21 + $0xa8] sm:$0xff] %vm3201_vm10, %v3255_v59  ;;  %vm2871_vm3 = vcmp.eq.s32.totalorder %v2663_v63, 7 }
 0x578   : > { %v4052_v53 = vpop.eup %4051  ;;  %v3119_v45 = vmul.f32 %v4050_v49, %v7525_v4  ;;  %v3151_v29 = vmul.f32 %v4050_v49, %v6588_v5  ;;  %v3029_v31 = vadd.f32 %v6684_v37, %v7536_v25  ;;  %v6700_v32 = vsel %vm2868_vm2, 0.0, %v6257_v14  ;;  %v7537_v4 = vld [vmem:[#allocation13_spill] sm:$0xff]  ;;  %v2749_v7 = vpop.xlane.xlu1 %2748 }
 0x579   : > { %v4054_v11 = vpop.eup %4053  ;;  %v3118_v22 = vmul.f32 %v4052_v53, %v7526_v24  ;;  %v3150_v38 = vmul.f32 %v4052_v53, %v6603_v6  ;;  %v3254_v5 = vsel %vm3168_vm9, %v7537_v4, %v2618_v18  ;;  %4059 = vrcp.f32 %v3026_v23  ;;  %v7538_v6 = vld [vmem:[#allocation41_spill] sm:$0xff]  ;;  %v2734_v59 = vpop.xlane.xlu0 %2733  ;;  %v7544_v53 = vld [vmem:[#allocation80_spill] sm:$0xff]  ;;  %v7546_v23 = vld [vmem:[#allocation46_spill] sm:$0xff] }
 0x57a   : > { %v3184_v1 = vsel %vm3168_vm9, %v3119_v45, %v3151_v29  ;;  %v3121_v40 = vmul.f32 %v4054_v11, %v7528_v15  ;;  %v3153_v16 = vmul.f32 %v4054_v11, %v6612_v48  ;;  %3286 = vst.msk [vmem:[%s6305_s21 + $0xa0] sm:$0xff] %vm3201_vm10, %v3254_v5  ;;  %4061 = vrcp.f32 %v3029_v31  ;;  %v7545_v29 = vld [vmem:[#allocation17_spill] sm:$0xff]  ;;  %v7547_v11 = vld [vmem:[#allocation50_spill] sm:$0xff] }
 0x57b   : > { %3217 = vst.msk [vmem:[%s6413_s25 + $0x78] sm:$0xff] %vm3201_vm10, %v3184_v1  ;;  %v3183_v14 = vsel %vm3168_vm9, %v3118_v22, %v3150_v38  ;;  %v3028_v24 = vadd.f32 %v6700_v32, %v7538_v6  ;;  %v6722_v15 = vsel %vm2871_vm3, 0.0, %v6262_v50  ;;  %v3257_v47 = vsel %vm3168_vm9, %v7539_v10, %v2663_v63  ;;  %v7548_v5 = vld [vmem:[#allocation22_spill] sm:$0xff]  ;;  %v7549_v1 = vld [vmem:[#allocation77_spill] sm:$0xff] }
 0x57c   : > { %3216 = vst.msk [vmem:[%s6413_s25 + $0x70] sm:$0xff] %vm3201_vm10, %v3183_v14  ;;  %v3186_v48 = vsel %vm3168_vm9, %v3121_v40, %v3153_v16  ;;  %v2648_v0 = vadd.s32 %v6389_v19, %v2645_v17  ;;  %v3031_v33 = vadd.f32 %v6722_v15, %v7540_v34  ;;  %3289 = vst.msk [vmem:[%s6305_s21 + $0xb8] sm:$0xff] %vm3201_vm10, %v3257_v47  ;;  %v2690_v52 = vcvt.f32.s32 %v2689_v8 }
 0x57d   : > { %v4056_v20 = vpop.eup %4055  ;;  %3219 = vst.msk [vmem:[%s6413_s25 + $0x88] sm:$0xff] %vm3201_vm10, %v3186_v48  ;;  %4063 = vrcp.f32 %v3028_v24  ;;  %v2675_v50 = vcvt.f32.s32 %v2674_v61  ;;  %v2720_v57 = vcvt.f32.s32 %v2719_v35  ;;  %vm2815_vm7 = vcmp.eq.s32.totalorder %v7548_v5, 7 }
 0x57e   : > { %v3120_v39 = vmul.f32 %v4056_v20, %v7530_v43  ;;  %v3152_v58 = vmul.f32 %v4056_v20, %v6638_v56  ;;  %vm2870_vm4 = vcmp.eq.s32.totalorder %v2648_v0, 7  ;;  %v3256_v19 = vsel %vm3168_vm9, %v7458_v55, %v2648_v0  ;;  %v7542_v43 = vld [vmem:[#allocation33_spill] sm:$0xff] }
 0x57f   : > { %4065 = vrcp.f32 %v3031_v33  ;;  %v6740_v18 = vsel %vm2870_vm4, 0.0, %v7541_v13  ;;  %3288 = vst.msk [vmem:[%s6305_s21 + $0xb0] sm:$0xff] %vm3201_vm10, %v3256_v19  ;;  %v2693_v63 = vadd.s32 %v6393_v46, %v2690_v52  ;;  %v2678_v17 = vadd.s32 %v6395_v30, %v2675_v50  ;;  %v7543_v46 = vld [vmem:[#allocation16_spill] sm:$0xff]  ;;  %v7550_v20 = vld [vmem:[#allocation45_spill] sm:$0xff]  ;;  %v7553_v19 = vld [vmem:[#allocation78_spill] sm:$0xff] }
 0x580   : > { %v4058_v8 = vpop.eup %4057  ;;  %v3185_v56 = vsel %vm3168_vm9, %v3120_v39, %v3152_v58  ;;  %v3030_v61 = vadd.f32 %v6740_v18, %v7542_v43  ;;  %v2705_v55 = vcvt.f32.s32 %v2704_v2  ;;  %v2723_v38 = vadd.s32 %v6397_v21, %v2720_v57  ;;  %v7552_v52 = vld [vmem:[#allocation81_spill] sm:$0xff]  ;;  %v2779_v39 = vpop.xlane.xlu1 %2778  ;;  %v7555_v57 = vld [vmem:[#allocation20_spill] sm:$0xff] }
 0x581   : > { %3218 = vst.msk [vmem:[%s6413_s25 + $0x80] sm:$0xff] %vm3201_vm10, %v3185_v56  ;;  %v3123_v9 = vmul.f32 %v4058_v8, %v7532_v51  ;;  %v3155_v49 = vmul.f32 %v4058_v8, %v6656_v12  ;;  %vm2873_vm5 = vcmp.eq.s32.totalorder %v2693_v63, 7  ;;  %v3259_v30 = vsel %vm3168_vm9, %v7543_v46, %v2693_v63  ;;  %v7554_v63 = vld [vmem:[#allocation19_spill] sm:$0xff] }
 0x582   : > { %4067 = vrcp.f32 %v3030_v61  ;;  %v6758_v45 = vsel %vm2873_vm5, 0.0, %v7544_v53  ;;  %3291 = vst.msk [vmem:[%s6305_s21 + $0xc8] sm:$0xff] %vm3201_vm10, %v3259_v30  ;;  %vm2872_vm6 = vcmp.eq.s32.totalorder %v2678_v17, 7  ;;  %v3258_v51 = vsel %vm3168_vm9, %v7545_v29, %v2678_v17  ;;  %v7558_v53 = vld [vmem:[#allocation48_spill] sm:$0xff] }
 0x583   : > { %v3188_v12 = vsel %vm3168_vm9, %v3123_v9, %v3155_v49  ;;  %v3033_v31 = vadd.f32 %v6758_v45, %v7546_v23  ;;  %v6770_v22 = vsel %vm2872_vm6, 0.0, %v7547_v11  ;;  %3290 = vst.msk [vmem:[%s6305_s21 + $0xc0] sm:$0xff] %vm3201_vm10, %v3258_v51  ;;  %v4060_v4 = vpop.eup %4059  ;;  %v2708_v16 = vadd.s32 %v6400_v42, %v2705_v55  ;;  %v2764_v9 = vpop.xlane.xlu0 %2763  ;;  %v7559_v51 = vld [vmem:[#allocation82_spill] sm:$0xff] }
 0x584   : > { %3221 = vst.msk [vmem:[%s6413_s25 + $0x98] sm:$0xff] %vm3201_vm10, %v3188_v12  ;;  %v3032_v40 = vadd.f32 %v6770_v22, %v7549_v1  ;;  %v2750_v14 = vcvt.f32.s32 %v2749_v7  ;;  %v2735_v24 = vcvt.f32.s32 %v2734_v59  ;;  %v4062_v35 = vpop.eup %4061  ;;  %v3122_v2 = vmul.f32 %v4060_v4, %v7535_v54 }
 0x585   : > { %v3154_v48 = vmul.f32 %v4060_v4, %v6679_v60  ;;  %4069 = vrcp.f32 %v3033_v31  ;;  %vm2875_vm8 = vcmp.eq.s32.totalorder %v2723_v38, 7  ;;  %v3125_v21 = vmul.f32 %v4062_v35, %v7536_v25  ;;  %v7551_v60 = vld [vmem:[#allocation18_spill] sm:$0xff]  ;;  %v7560_v31 = vld [vmem:[#allocation79_spill] sm:$0xff] }
 0x586   : > { %v3157_v10 = vmul.f32 %v4062_v35, %v6684_v37  ;;  %4071 = vrcp.f32 %v3032_v40  ;;  %v6786_v47 = vsel %vm2875_vm8, 0.0, %v6286_v44  ;;  %v3261_v33 = vsel %vm3168_vm9, %v7551_v60, %v2723_v38 }
 0x587   : > { %v4064_v42 = vpop.eup %4063  ;;  %v3187_v0 = vsel %vm3168_vm9, %v3122_v2, %v3154_v48  ;;  %v3035_v54 = vadd.f32 %v6786_v47, %v7550_v20  ;;  %vm2874_vm1 = vcmp.eq.s32.totalorder %v2708_v16, 7  ;;  %3293 = vst.msk [vmem:[%s6305_s21 + $0xd8] sm:$0xff] %vm3201_vm10, %v3261_v33  ;;  %v2738_v61 = vadd.s32 %v6431_v41, %v2735_v24  ;;  %v7557_v41 = vld [vmem:[#allocation21_spill] sm:$0xff] }
 0x588   : > { %3220 = vst.msk [vmem:[%s6413_s25 + $0x90] sm:$0xff] %vm3201_vm10, %v3187_v0  ;;  %v3190_v37 = vsel %vm3168_vm9, %v3125_v21, %v3157_v10  ;;  %v3124_v44 = vmul.f32 %v4064_v42, %v7538_v6  ;;  %v3156_v25 = vmul.f32 %v4064_v42, %v6700_v32  ;;  %v6804_v50 = vsel %vm2874_vm1, 0.0, %v7552_v52  ;;  %v7562_v21 = vld [vmem:[#allocation23_spill] sm:$0xff] }
 0x589   : > { %v4066_v58 = vpop.eup %4065  ;;  %3223 = vst.msk [vmem:[%s6413_s25 + $0xa8] sm:$0xff] %vm3201_vm10, %v3190_v37  ;;  %4073 = vrcp.f32 %v3035_v54  ;;  %v3034_v13 = vadd.f32 %v6804_v50, %v7553_v19  ;;  %v3260_v6 = vsel %vm3168_vm9, %v7554_v63, %v2708_v16  ;;  %v2753_v32 = vadd.s32 %v6404_v62, %v2750_v14  ;;  %v7563_v54 = vld [vmem:[#allocation52_spill] sm:$0xff] }
 0x58a   : > { %v3189_v17 = vsel %vm3168_vm9, %v3124_v44, %v3156_v25  ;;  %v3127_v8 = vmul.f32 %v4066_v58, %v7540_v34  ;;  %v3159_v56 = vmul.f32 %v4066_v58, %v6722_v15  ;;  %3292 = vst.msk [vmem:[%s6305_s21 + $0xd0] sm:$0xff] %vm3201_vm10, %v3260_v6  ;;  %v2780_v55 = vcvt.f32.s32 %v2779_v39  ;;  %v7556_v15 = vld [vmem:[#allocation49_spill] sm:$0xff] }
 0x58b   : > { %3222 = vst.msk [vmem:[%s6413_s25 + $0xa0] sm:$0xff] %vm3201_vm10, %v3189_v17  ;;  %4075 = vrcp.f32 %v3034_v13  ;;  %vm2877_vm11 = vcmp.eq.s32.totalorder %v2753_v32, 7  ;;  %v3263_v62 = vsel %vm3168_vm9, %v7555_v57, %v2753_v32  ;;  %vm2876_vm12 = vcmp.eq.s32.totalorder %v2738_v61, 7 }
 0x58c   : > { %v4068_v49 = vpop.eup %4067  ;;  %v3192_v34 = vsel %vm3168_vm9, %v3127_v8, %v3159_v56  ;;  %v3005_v46 = vsel %vm2877_vm11, 0.0, %v7556_v15  ;;  %3295 = vst.msk [vmem:[%s6305_s21 + $0xe8] sm:$0xff] %vm3201_vm10, %v3263_v62  ;;  %v3262_v30 = vsel %vm3168_vm9, %v7557_v41, %v2738_v61  ;;  %v3004_v12 = vsel %vm2876_vm12, 0.0, %v7559_v51 }
 0x58d   : > { %3225 = vst.msk [vmem:[%s6413_s25 + $0xb8] sm:$0xff] %vm3201_vm10, %v3192_v34  ;;  %v3126_v7 = vmul.f32 %v4068_v49, %v7542_v43  ;;  %v3158_v59 = vmul.f32 %v4068_v49, %v6740_v18  ;;  %v3037_v29 = vadd.f32 %v3005_v46, %v7558_v53  ;;  %3294 = vst.msk [vmem:[%s6305_s21 + $0xe0] sm:$0xff] %vm3201_vm10, %v3262_v30  ;;  %v2765_v4 = vcvt.f32.s32 %v2764_v9 }
 0x58e   : > { %v3036_v11 = vadd.f32 %v3004_v12, %v7560_v31  ;;  %v2783_v38 = vadd.s32 %v6505_v28, %v2780_v55  ;;  %v2767_v16 = vshll.u32 %v2766_v27, 16  ;;  %v7561_v18 = vmov 1.0  }
 0x58f   : > { %v4070_v40 = vpop.eup %4069  ;;  %v3191_v43 = vsel %vm3168_vm9, %v3126_v7, %v3158_v59  ;;  %4077 = vrcp.f32 %v3037_v29  ;;  %v2847_v14 = vsel %vm2815_vm7, 0.0, %v7561_v18  ;;  %vm2814_vm14 = vcmp.eq.s32.totalorder %v7562_v21, 7 }
 0x590   : > { %v4072_v24 = vpop.eup %4071  ;;  %3224 = vst.msk [vmem:[%s6413_s25 + $0xb0] sm:$0xff] %vm3201_vm10, %v3191_v43  ;;  %v3129_v28 = vmul.f32 %v4070_v40, %v7546_v23  ;;  %v3161_v35 = vmul.f32 %v4070_v40, %v6758_v45  ;;  %4079 = vrcp.f32 %v3036_v11  ;;  %vm2879_vm13 = vcmp.eq.s32.totalorder %v2783_v38, 7 }
 0x591   : > { %v3128_v3 = vmul.f32 %v4072_v24, %v7549_v1  ;;  %v3160_v27 = vmul.f32 %v4072_v24, %v6770_v22  ;;  %v3007_v2 = vsel %vm2879_vm13, 0.0, %v6320_v26  ;;  %v3265_v48 = vsel %vm3168_vm9, %v7548_v5, %v2783_v38 }
 0x592   : > { %v3194_v23 = vsel %vm3168_vm9, %v3129_v28, %v3161_v35  ;;  %v3039_v10 = vadd.f32 %v3007_v2, %v2847_v14  ;;  %3297 = vst.msk [vmem:[%s6305_s21 + $0xf8] sm:$0xff] %vm3201_vm10, %v3265_v48  ;;  %v2768_v45 = vadd.s32 %v2767_v16, %v2765_v4  ;;  %v2846_v0 = vsel %vm2814_vm14, 0.0, %v7561_v18 }
 0x593   : > { %v4074_v42 = vpop.eup %4073  ;;  %3227 = vst.msk [vmem:[%s6413_s25 + $0xc8] sm:$0xff] %vm3201_vm10, %v3194_v23  ;;  %v3193_v26 = vsel %vm3168_vm9, %v3128_v3, %v3160_v27 }
 0x594   : > { %3226 = vst.msk [vmem:[%s6413_s25 + $0xc0] sm:$0xff] %vm3201_vm10, %v3193_v26  ;;  %v3131_v22 = vmul.f32 %v4074_v42, %v7550_v20  ;;  %v3163_v5 = vmul.f32 %v4074_v42, %v6786_v47  ;;  %4081 = vrcp.f32 %v3039_v10  ;;  %vm2878_vm15 = vcmp.eq.s32.totalorder %v2768_v45, 7 }
 0x595   : > { %v4076_v1 = vpop.eup %4075  ;;  %v3006_v60 = vsel %vm2878_vm15, 0.0, %v7563_v54  ;;  %v3264_v33 = vsel %vm3168_vm9, %v7562_v21, %v2768_v45 }
 0x596   : > { %v3196_v37 = vsel %vm3168_vm9, %v3131_v22, %v3163_v5  ;;  %v3130_v20 = vmul.f32 %v4076_v1, %v7553_v19  ;;  %v3162_v47 = vmul.f32 %v4076_v1, %v6804_v50  ;;  %v3038_v44 = vadd.f32 %v3006_v60, %v2846_v0  ;;  %3296 = vst.msk [vmem:[%s6305_s21 + $0xf0] sm:$0xff] %vm3201_vm10, %v3264_v33 }
 0x597   : > { %3229 = vst.msk [vmem:[%s6413_s25 + $0xd8] sm:$0xff] %vm3201_vm10, %v3196_v37 }
 0x598   : > { %v3195_v25 = vsel %vm3168_vm9, %v3130_v20, %v3162_v47  ;;  %4083 = vrcp.f32 %v3038_v44 }
 0x599   : > { %v4078_v52 = vpop.eup %4077  ;;  %3228 = vst.msk [vmem:[%s6413_s25 + $0xd0] sm:$0xff] %vm3201_vm10, %v3195_v25 }
 0x59a   : > { %v4080_v39 = vpop.eup %4079  ;;  %v3133_v58 = vmul.f32 %v4078_v52, %v7558_v53  ;;  %v3165_v19 = vmul.f32 %v4078_v52, %v3005_v46 }
 0x59b   : > { %v3132_v50 = vmul.f32 %v4080_v39, %v7560_v31  ;;  %v3164_v13 = vmul.f32 %v4080_v39, %v3004_v12 }
 0x59c   : > { %v3198_v63 = vsel %vm3168_vm9, %v3133_v58, %v3165_v19 }
 0x59d   : > { %3231 = vst.msk [vmem:[%s6413_s25 + $0xe8] sm:$0xff] %vm3201_vm10, %v3198_v63  ;;  %v3197_v6 = vsel %vm3168_vm9, %v3132_v50, %v3164_v13 }
 0x59e   : > { %v4082_v32 = vpop.eup %4081  ;;  %3230 = vst.msk [vmem:[%s6413_s25 + $0xe0] sm:$0xff] %vm3201_vm10, %v3197_v6 }
 0x59f   : > { %v3135_v17 = vmul.f32 %v4082_v32, %v2847_v14  ;;  %v3167_v8 = vmul.f32 %v4082_v32, %v3007_v2 }
 0x5a1   : > { %v3200_v56 = vsel %vm3168_vm9, %v3135_v17, %v3167_v8 }
 0x5a2   : > { %v4084_v61 = vpop.eup %4083  ;;  %3233 = vst.msk [vmem:[%s6413_s25 + $0xf8] sm:$0xff] %vm3201_vm10, %v3200_v56 }
 0x5a3   : > { %v3134_v57 = vmul.f32 %v4084_v61, %v2846_v0  ;;  %v3166_v62 = vmul.f32 %v4084_v61, %v3006_v60 }
 0x5a5   : > { %v3199_v55 = vsel %vm3168_vm9, %v3134_v57, %v3166_v62 }
 0x5a6   : > { %3232 = vst.msk [vmem:[%s6413_s25 + $0xf0] sm:$0xff] %vm3201_vm10, %v3199_v55 }
 0x5a7 PF: > { %s18_s24 = sadd.s32 1, %s4091_s24  }
 0x5a8   : > { %p15_p4 = scmp.ge.s32.totalorder %s18_s24, 4  }
 0x5aa   :  { %17 = sbr.rel (!%p15_p4) target bundleno = 1 (0x1), region = 97 }

</bundles_post_ra>
